<compile_context>
chip_gen: v7x
topology: tpu7x:2x2x1
jax: 0.10.0
libtpu: 0.0.40
codegen_flags: <defaults>
</compile_context>

<pallas_src>
import jax
import jax.numpy as jnp
from jax.experimental import pallas as pl
from jax.experimental.pallas import tpu as pltpu


LATENT = 128
FEAT = 256
IMG_H = IMG_W = 16
IMG_PIX = IMG_H * IMG_W
CTR_PAD = 128           # lane-padded width of the (center, depth) = 3-wide head


def _round_up(x, m):
    return ((x + m - 1) // m) * m


def _act(y, act):
    """Exact activations (pure-JAX reference path)."""
    if act == "leaky_relu":
        return jnp.where(y >= 0.0, y, 0.01 * y)
    if act == "relu":
        return jnp.maximum(y, 0.0)
    if act == "sigmoid":
        return 1.0 / (1.0 + jnp.exp(-y))
    return y


def _kact(y, act):
    """Kernel-side activations: sigmoid reciprocal runs on the EUP slot."""
    if act == "sigmoid":
        return pl.reciprocal(1.0 + jnp.exp(-y), approx=True)
    return _act(y, act)


# ----------------------------------------------------------------------------
# Fused Pallas kernel: whole Student forward, weights resident in VMEM except
# csien fc1 which is manually DMA'd and hidden behind the teacher path.
# ----------------------------------------------------------------------------
def _student_kernel(
    # data (rows padded to a multiple of 16)
    xcsi_ref, ximg_ref, eps_s_ref, eps_t_ref,
    # CSI encoder (student): fc1 weight stays in HBM (pl.ANY) -> manual DMA
    cs_w1_hbm, cs_b1, cs_w2, cs_b2, cs_wml, cs_bml,
    # Image encoder (teacher): convs pre-folded to dense matmuls, fused mu|logvar
    ie_w1, ie_b1, ie_w2, ie_b2, ie_wml, ie_bml,
    # shared decoders: cimgde/rimgde fc1 fused (N=512), separate fc2, ctrde
    cr_w1, cr_b1, ci_w2, ci_b2, ri_w2, ri_b2,
    ct_w1, ct_b1, ct_w2, ct_b2,
    # outputs
    s_fea_ref, s_mulv_ref, s_z_ref,
    t_fea_ref, t_mulv_ref, t_z_ref,
    cimg_ref, rimg_ref, ctr_ref,
    # scratch
    cs_w1_vmem, w1_sem, z_both_sc, fea_both_sc,
):
    m = s_z_ref.shape[0]

    # Kick off the biggest weight DMA (~1.5 MiB) immediately; it is hidden
    # behind the teacher-path matmuls below.
    w1_cp = pltpu.make_async_copy(cs_w1_hbm, cs_w1_vmem, w1_sem)
    w1_cp.start()

    def dense(x, w, b_ref, act):
        # bf16 MXU inputs, f32 accumulation; bias/activation math stays f32
        # (v5e has no bf16 VPU/EUP).
        y = jnp.dot(x.astype(jnp.bfloat16), w,
                    preferred_element_type=jnp.float32)
        return _kact(y + b_ref[...], act)

    # ---- teacher path first (overlaps the cs_w1 DMA) ----
    h1 = dense(ximg_ref[...], ie_w1[...], ie_b1, "leaky_relu")
    t_fea = dense(h1, ie_w2[...], ie_b2, "leaky_relu")
    t_mulv = dense(t_fea, ie_wml[...], ie_bml, "none")
    t_z = t_mulv[:, :LATENT] + jnp.exp(0.5 * t_mulv[:, LATENT:]) * eps_t_ref[...]
    t_fea_ref[...] = t_fea
    t_mulv_ref[...] = t_mulv
    t_z_ref[...] = t_z

    # ---- student path (needs cs_w1: wait only now) ----
    w1_cp.wait()
    h = dense(xcsi_ref[...], cs_w1_vmem[...], cs_b1, "leaky_relu")
    s_fea = dense(h, cs_w2[...], cs_b2, "none")
    s_mulv = dense(s_fea, cs_wml[...], cs_bml, "none")
    s_z = s_mulv[:, :LATENT] + jnp.exp(0.5 * s_mulv[:, LATENT:]) * eps_s_ref[...]
    s_fea_ref[...] = s_fea
    s_mulv_ref[...] = s_mulv
    s_z_ref[...] = s_z

    # ---- stack student/teacher rows into scratch halves (no sublane concat) ----
    z_both_sc[:m, :] = s_z
    z_both_sc[m:, :] = t_z
    fea_both_sc[:m, :] = s_fea
    fea_both_sc[m:, :] = t_fea
    z_both = z_both_sc[...]
    fea_both = fea_both_sc[...]

    # ---- shared decoders: fused cimgde|rimgde fc1 (single 128x512 matmul) ----
    h_cr = dense(z_both, cr_w1[...], cr_b1, "relu")                 # (2m, 512)
    cimg_ref[...] = dense(h_cr[:, :FEAT], ci_w2[...], ci_b2, "sigmoid")
    rimg_ref[...] = dense(h_cr[:, FEAT:], ri_w2[...], ri_b2, "sigmoid")
    ctr_ref[...] = dense(dense(fea_both, ct_w1[...], ct_b1, "relu"),
                         ct_w2[...], ct_b2, "sigmoid")


# ----------------------------------------------------------------------------
# Forward wrapper
# ----------------------------------------------------------------------------
def student_forward(packed, csi, pd, rimg, eps_s, eps_t):
    B = csi.shape[0]
    m = _round_up(B, 16)                 # 16-row padding: clean bf16 sublane packing

    kp = packed[0].shape[0]              # padded K of csien fc1 (multiple of 128)
    x = jnp.concatenate([csi.reshape(B, -1), pd.reshape(B, -1)], axis=1)
    x = jnp.pad(x, ((0, m - B), (0, kp - x.shape[1]))).astype(jnp.bfloat16)
    ximg = jnp.pad(rimg.reshape(B, -1), ((0, m - B), (0, 0))).astype(jnp.bfloat16)
    es = jnp.pad(eps_s.astype(jnp.float32), ((0, m - B), (0, 0)))
    et = jnp.pad(eps_t.astype(jnp.float32), ((0, m - B), (0, 0)))

    f32 = jnp.float32
    out_shape = (
        jax.ShapeDtypeStruct((m, FEAT), f32),          # s_fea
        jax.ShapeDtypeStruct((m, 2 * LATENT), f32),    # s_mu | s_logvar
        jax.ShapeDtypeStruct((m, LATENT), f32),        # s_z
        jax.ShapeDtypeStruct((m, FEAT), f32),          # t_fea
        jax.ShapeDtypeStruct((m, 2 * LATENT), f32),    # t_mu | t_logvar
        jax.ShapeDtypeStruct((m, LATENT), f32),        # t_z
        jax.ShapeDtypeStruct((2 * m, IMG_PIX), f32),   # cimage  [student; teacher]
        jax.ShapeDtypeStruct((2 * m, IMG_PIX), f32),   # rimage  [student; teacher]
        jax.ShapeDtypeStruct((2 * m, CTR_PAD), f32),   # center/depth (lane-padded)
    )

    vmem = pl.BlockSpec(memory_space=pltpu.MemorySpace.VMEM)
    hbm = pl.BlockSpec(memory_space=pl.ANY)   # cs_w1 stays in HBM, DMA'd in-kernel

    outs = pl.pallas_call(
        _student_kernel,
        out_shape=out_shape,
        in_specs=[vmem] * 4 + [hbm] + [vmem] * (len(packed) - 1),
        out_specs=tuple([vmem] * len(out_shape)),
        scratch_shapes=[
            pltpu.VMEM((kp, 512), jnp.bfloat16),       # landing buffer for cs_w1
            pltpu.SemaphoreType.DMA(()),
            pltpu.VMEM((2 * m, LATENT), f32),          # z_both  [student; teacher]
            pltpu.VMEM((2 * m, FEAT), f32),            # fea_both[student; teacher]
        ],
        compiler_params=pltpu.CompilerParams(
            vmem_limit_bytes=8 * 1024 * 1024),         # actual footprint ~4 MiB
    )(x, ximg, es, et, *packed)

    (s_fea, s_mulv, s_z, t_fea, t_mulv, t_z, cimg, rimg_rec, ctr) = outs

    def img(rows):
        return rows.reshape(-1, 1, IMG_H, IMG_W)

    ret = {
        "s_fea": s_fea[:B], "s_mu": s_mulv[:B, :LATENT],
        "s_logvar": s_mulv[:B, LATENT:], "s_z": s_z[:B],
        "s_cimage": img(cimg[:B]), "s_rimage": img(rimg_rec[:B]),
        "s_center": ctr[:B, :2], "s_depth": ctr[:B, 2:3],
    }
    teacher = {
        "t_fea": t_fea[:B], "t_mu": t_mulv[:B, :LATENT],
        "t_logvar": t_mulv[:B, LATENT:], "t_z": t_z[:B],
        "t_cimage": img(cimg[m:m + B]), "t_rimage": img(rimg_rec[m:m + B]),
        "t_center": ctr[m:m + B, :2], "t_depth": ctr[m:m + B, 2:3],
    }
    # torch.no_grad() teacher path -> stop_gradient (forward values identical)
    ret.update(jax.tree_util.tree_map(jax.lax.stop_gradient, teacher))
    return ret


# ----------------------------------------------------------------------------
# Parameters: logical init (PyTorch layouts) + packing into kernel operands
# ----------------------------------------------------------------------------
def _dense_init(key, n_in, n_out, scale=0.02):
    return (scale * jax.random.normal(key, (n_in, n_out), jnp.float32),
            jnp.zeros((n_out,), jnp.float32))


def _conv_init(key, c_out, c_in, kh, kw, scale=0.05):
    return (scale * jax.random.normal(key, (c_out, c_in, kh, kw), jnp.float32),
            jnp.zeros((c_out,), jnp.float32))


def init_params(key, csi_flat_dim, pd_dim):
    keys = jax.random.split(key, 16)
    imgen = {}
    imgen["c1_w"], imgen["c1_b"] = _conv_init(keys[0], 8, 1, 3, 3)
    imgen["c2_w"], imgen["c2_b"] = _conv_init(keys[1], 16, 8, 3, 3)
    imgen["mu_w"], imgen["mu_b"] = _dense_init(keys[2], FEAT, LATENT)
    imgen["lv_w"], imgen["lv_b"] = _dense_init(keys[3], FEAT, LATENT)

    def decoder(k1, k2):
        d = {}
        d["fc1_w"], d["fc1_b"] = _dense_init(k1, LATENT, FEAT)
        d["fc2_w"], d["fc2_b"] = _dense_init(k2, FEAT, IMG_PIX)
        return d

    rimgde = decoder(keys[4], keys[5])
    cimgde = decoder(keys[6], keys[7])

    ctrde = {}
    ctrde["fc1_w"], ctrde["fc1_b"] = _dense_init(keys[8], FEAT, 64)
    ctrde["fc2_w"], ctrde["fc2_b"] = _dense_init(keys[9], 64, 3)

    csien = {}
    csien["fc1_w"], csien["fc1_b"] = _dense_init(keys[10], csi_flat_dim + pd_dim, 512)
    csien["fc2_w"], csien["fc2_b"] = _dense_init(keys[11], 512, FEAT)
    csien["mu_w"], csien["mu_b"] = _dense_init(keys[12], FEAT, LATENT)
    csien["lv_w"], csien["lv_b"] = _dense_init(keys[13], FEAT, LATENT)

    return {"imgen": imgen, "rimgde": rimgde, "cimgde": cimgde,
            "ctrde": ctrde, "csien": csien}


def _conv_to_matmul(w, b, in_shape, stride=2, pad=1):
    """Exactly fold a strided Conv2d (OIHW weights) into a dense matmul
    mapping the flattened NCHW input to the flattened NCHW output."""
    C, H, W = in_shape
    eye = jnp.eye(C * H * W, dtype=jnp.float32).reshape(C * H * W, C, H, W)
    out = jax.lax.conv_general_dilated(
        eye, w, window_strides=(stride, stride),
        padding=((pad, pad), (pad, pad)),
        dimension_numbers=("NCHW", "OIHW", "NCHW"))
    _, O, Ho, Wo = out.shape
    return out.reshape(C * H * W, O * Ho * Wo), jnp.repeat(b, Ho * Wo), (O, Ho, Wo)


def pack_params(p):
    """One-time packing: fold convs, fuse mu|logvar heads, fuse the two image
    decoders' fc1 weights, zero-pad K/N to multiples of 128, cast weights to
    bf16 (biases stay f32, shaped (1, N))."""
    def w(x):
        return x.astype(jnp.bfloat16)

    def b(x):
        return x.astype(jnp.float32).reshape(1, -1)

    cs = p["csien"]
    k0 = cs["fc1_w"].shape[0]
    cs_w1 = jnp.pad(cs["fc1_w"], ((0, _round_up(k0, 128) - k0), (0, 0)))
    cs_wml = jnp.concatenate([cs["mu_w"], cs["lv_w"]], axis=1)
    cs_bml = jnp.concatenate([cs["mu_b"], cs["lv_b"]])

    ig = p["imgen"]
    c1m, c1b, shp1 = _conv_to_matmul(ig["c1_w"], ig["c1_b"], (1, IMG_H, IMG_W))
    c2m, c2b, _ = _conv_to_matmul(ig["c2_w"], ig["c2_b"], shp1)
    ig_wml = jnp.concatenate([ig["mu_w"], ig["lv_w"]], axis=1)
    ig_bml = jnp.concatenate([ig["mu_b"], ig["lv_b"]])

    ci, ri = p["cimgde"], p["rimgde"]
    cr_w1 = jnp.concatenate([ci["fc1_w"], ri["fc1_w"]], axis=1)   # (128, 512)
    cr_b1 = jnp.concatenate([ci["fc1_b"], ri["fc1_b"]])           # (512,)

    ct = p["ctrde"]
    h, n_out = ct["fc1_w"].shape[1], ct["fc2_w"].shape[1]
    hp = _round_up(h, 128)
    ct_w1 = jnp.pad(ct["fc1_w"], ((0, 0), (0, hp - h)))
    ct_b1 = jnp.pad(ct["fc1_b"], (0, hp - h))
    ct_w2 = jnp.pad(ct["fc2_w"], ((0, hp - h), (0, CTR_PAD - n_out)))
    ct_b2 = jnp.pad(ct["fc2_b"], (0, CTR_PAD - n_out))

    return (
        w(cs_w1), b(cs["fc1_b"]), w(cs["fc2_w"]), b(cs["fc2_b"]),
        w(cs_wml), b(cs_bml),
        w(c1m), b(c1b), w(c2m), b(c2b), w(ig_wml), b(ig_bml),
        w(cr_w1), b(cr_b1),
        w(ci["fc2_w"]), b(ci["fc2_b"]), w(ri["fc2_w"]), b(ri["fc2_b"]),
        w(ct_w1), b(ct_b1), w(ct_w2), b(ct_b2),
    )


# ----------------------------------------------------------------------------
# Pure-JAX f32 reference (mirrors the logical module) for a correctness check
# ----------------------------------------------------------------------------
def _ref_forward(p, csi, pd, rimg, eps_s, eps_t):
    B = csi.shape[0]

    def lin(x, ww, bb, act="none"):
        return _act(x @ ww + bb, act)

    cs = p["csien"]
    x = jnp.concatenate([csi.reshape(B, -1), pd.reshape(B, -1)], axis=1)
    h = lin(x, cs["fc1_w"], cs["fc1_b"], "leaky_relu")
    s_fea = lin(h, cs["fc2_w"], cs["fc2_b"])
    s_mu = lin(s_fea, cs["mu_w"], cs["mu_b"])
    s_lv = lin(s_fea, cs["lv_w"], cs["lv_b"])
    s_z = s_mu + jnp.exp(0.5 * s_lv) * eps_s

    ig = p["imgen"]

    def conv(xx, ww, bb):
        y = jax.lax.conv_general_dilated(
            xx, ww, window_strides=(2, 2), padding=((1, 1), (1, 1)),
            dimension_numbers=("NCHW", "OIHW", "NCHW"))
        return _act(y + bb[None, :, None, None], "leaky_relu")

    t_fea = conv(conv(rimg, ig["c1_w"], ig["c1_b"]),
                 ig["c2_w"], ig["c2_b"]).reshape(B, -1)
    t_mu = lin(t_fea, ig["mu_w"], ig["mu_b"])
    t_lv = lin(t_fea, ig["lv_w"], ig["lv_b"])
    t_z = t_mu + jnp.exp(0.5 * t_lv) * eps_t

    def imgde(d, z):
        hh = lin(z, d["fc1_w"], d["fc1_b"], "relu")
        return lin(hh, d["fc2_w"], d["fc2_b"], "sigmoid").reshape(-1, 1, IMG_H, IMG_W)

    def ctrde(d, fea):
        hh = lin(fea, d["fc1_w"], d["fc1_b"], "relu")
        o = lin(hh, d["fc2_w"], d["fc2_b"], "sigmoid")
        return o[:, :2], o[:, 2:3]

    s_center, s_depth = ctrde(p["ctrde"], s_fea)
    t_center, t_depth = ctrde(p["ctrde"], t_fea)
    return {
        "s_fea": s_fea, "s_mu": s_mu, "s_logvar": s_lv, "s_z": s_z,
        "s_cimage": imgde(p["cimgde"], s_z), "s_rimage": imgde(p["rimgde"], s_z),
        "s_center": s_center, "s_depth": s_depth,
        "t_fea": t_fea, "t_mu": t_mu, "t_logvar": t_lv, "t_z": t_z,
        "t_cimage": imgde(p["cimgde"], t_z), "t_rimage": imgde(p["rimgde"], t_z),
        "t_center": t_center, "t_depth": t_depth,
    }


# ----------------------------------------------------------------------------
if __name__ == "__main__":
    B, CSI_C, CSI_H, CSI_T, PD_DIM = 2, 6, 30, 8, 62

    key = jax.random.PRNGKey(0)
    k_par, k_csi, k_pd, k_img, k_es, k_et = jax.random.split(key, 6)

    csi = jax.random.normal(k_csi, (B, CSI_C, CSI_H, CSI_T), jnp.float32)
    pd = jax.random.normal(k_pd, (B, PD_DIM), jnp.float32)
    rimg = jax.random.uniform(k_img, (B, 1, IMG_H, IMG_W), jnp.float32)
    # torch.randn_like eps made explicit & deterministic:
    eps_s = jax.random.normal(k_es, (B, LATENT), jnp.float32)
    eps_t = jax.random.normal(k_et, (B, LATENT), jnp.float32)

    params = init_params(k_par, CSI_C * CSI_H * CSI_T, PD_DIM)
    packed = pack_params(params)          # one-time conv folding / fusing / bf16

    fwd = jax.jit(student_forward)
    out = fwd(packed, csi, pd, rimg, eps_s, eps_t)
    jax.block_until_ready(out)

    # shape checks
    assert out["s_z"].shape == (B, LATENT)
    assert out["t_cimage"].shape == (B, 1, IMG_H, IMG_W)
    assert out["s_center"].shape == (B, 2) and out["s_depth"].shape == (B, 1)

    # numeric check vs. pure-JAX f32 reference (loose tol: bf16 MXU inputs,
    # approx-reciprocal sigmoid)
    ref = _ref_forward(params, csi, pd, rimg, eps_s, eps_t)
    for k in ref:
        diff = float(jnp.max(jnp.abs(out[k] - ref[k])))
        assert diff < 5e-2, f"{k}: max abs diff {diff}"

    print("KERNEL_OK")
</pallas_src>

<mosaic_0001>
module attributes {stable_mosaic.version = 11 : i64} {
  func.func @_student_kernel(%arg0: memref<16x1536xbf16, #tpu.memory_space<vmem>>, %arg1: memref<16x256xbf16, #tpu.memory_space<vmem>>, %arg2: memref<16x128xf32, #tpu.memory_space<vmem>>, %arg3: memref<16x128xf32, #tpu.memory_space<vmem>>, %arg4: memref<1536x512xbf16, #tpu.memory_space<any>>, %arg5: memref<1x512xf32, #tpu.memory_space<vmem>>, %arg6: memref<512x256xbf16, #tpu.memory_space<vmem>>, %arg7: memref<1x256xf32, #tpu.memory_space<vmem>>, %arg8: memref<256x256xbf16, #tpu.memory_space<vmem>>, %arg9: memref<1x256xf32, #tpu.memory_space<vmem>>, %arg10: memref<256x512xbf16, #tpu.memory_space<vmem>>, %arg11: memref<1x512xf32, #tpu.memory_space<vmem>>, %arg12: memref<512x256xbf16, #tpu.memory_space<vmem>>, %arg13: memref<1x256xf32, #tpu.memory_space<vmem>>, %arg14: memref<256x256xbf16, #tpu.memory_space<vmem>>, %arg15: memref<1x256xf32, #tpu.memory_space<vmem>>, %arg16: memref<128x512xbf16, #tpu.memory_space<vmem>>, %arg17: memref<1x512xf32, #tpu.memory_space<vmem>>, %arg18: memref<256x256xbf16, #tpu.memory_space<vmem>>, %arg19: memref<1x256xf32, #tpu.memory_space<vmem>>, %arg20: memref<256x256xbf16, #tpu.memory_space<vmem>>, %arg21: memref<1x256xf32, #tpu.memory_space<vmem>>, %arg22: memref<256x128xbf16, #tpu.memory_space<vmem>>, %arg23: memref<1x128xf32, #tpu.memory_space<vmem>>, %arg24: memref<128x128xbf16, #tpu.memory_space<vmem>>, %arg25: memref<1x128xf32, #tpu.memory_space<vmem>>, %arg26: memref<16x256xf32, #tpu.memory_space<vmem>>, %arg27: memref<16x256xf32, #tpu.memory_space<vmem>>, %arg28: memref<16x128xf32, #tpu.memory_space<vmem>>, %arg29: memref<16x256xf32, #tpu.memory_space<vmem>>, %arg30: memref<16x256xf32, #tpu.memory_space<vmem>>, %arg31: memref<16x128xf32, #tpu.memory_space<vmem>>, %arg32: memref<32x256xf32, #tpu.memory_space<vmem>>, %arg33: memref<32x256xf32, #tpu.memory_space<vmem>>, %arg34: memref<32x128xf32, #tpu.memory_space<vmem>>, %arg35: memref<1536x512xbf16, #tpu.memory_space<vmem>>, %arg36: memref<!tpu.dma_semaphore, #tpu.memory_space<semaphore_mem>>, %arg37: memref<32x128xf32, #tpu.memory_space<vmem>>, %arg38: memref<32x256xf32, #tpu.memory_space<vmem>>) attributes {dimension_semantics = [], scalar_prefetch = 0 : i64, scratch_operands = 4 : i64, tpu.core_type = #tpu.core_type<tc>} {
    tpu.enqueue_dma source(%arg4 : memref<1536x512xbf16, #tpu.memory_space<any>>) target(%arg35 : memref<1536x512xbf16, #tpu.memory_space<vmem>>) target_semaphore(%arg36 : memref<!tpu.dma_semaphore, #tpu.memory_space<semaphore_mem>>)
    %c0 = arith.constant 0 : index
    %c0_0 = arith.constant 0 : index
    %0 = vector.load %arg1[%c0, %c0_0] : memref<16x256xbf16, #tpu.memory_space<vmem>>, vector<16x256xbf16>
    %c0_1 = arith.constant 0 : index
    %c0_2 = arith.constant 0 : index
    %1 = vector.load %arg10[%c0_1, %c0_2] : memref<256x512xbf16, #tpu.memory_space<vmem>>, vector<256x512xbf16>
    %cst = arith.constant dense<0.000000e+00> : vector<16x512xf32>
    %2 = tpu.matmul %0, %1, %cst {dimension_numbers = #tpu.dot_dimension_numbers<[1], [0], [0], [1], [0, 0, 1, 1], [], []>} : vector<16x256xbf16>, vector<256x512xbf16>, vector<16x512xf32> -> vector<16x512xf32>
    %c0_3 = arith.constant 0 : index
    %c0_4 = arith.constant 0 : index
    %3 = vector.load %arg11[%c0_3, %c0_4] : memref<1x512xf32, #tpu.memory_space<vmem>>, vector<1x512xf32>
    %4 = vector.broadcast %3 : vector<1x512xf32> to vector<16x512xf32>
    %5 = arith.addf %2, %4 : vector<16x512xf32>
    %cst_5 = arith.constant 0.000000e+00 : f32
    %6 = vector.broadcast %cst_5 : f32 to vector<16x512xf32>
    %7 = arith.cmpf oge, %5, %6 : vector<16x512xf32>
    %cst_6 = arith.constant 0.00999999977 : f32
    %8 = vector.broadcast %cst_6 : f32 to vector<16x512xf32>
    %9 = arith.mulf %8, %5 : vector<16x512xf32>
    %10 = arith.select %7, %5, %9 : vector<16x512xi1>, vector<16x512xf32>
    %c0_7 = arith.constant 0 : index
    %c0_8 = arith.constant 0 : index
    %11 = vector.load %arg12[%c0_7, %c0_8] : memref<512x256xbf16, #tpu.memory_space<vmem>>, vector<512x256xbf16>
    %12 = arith.truncf %10 : vector<16x512xf32> to vector<16x512xbf16>
    %cst_9 = arith.constant dense<0.000000e+00> : vector<16x256xf32>
    %13 = tpu.matmul %12, %11, %cst_9 {dimension_numbers = #tpu.dot_dimension_numbers<[1], [0], [0], [1], [0, 0, 1, 1], [], []>} : vector<16x512xbf16>, vector<512x256xbf16>, vector<16x256xf32> -> vector<16x256xf32>
    %c0_10 = arith.constant 0 : index
    %c0_11 = arith.constant 0 : index
    %14 = vector.load %arg13[%c0_10, %c0_11] : memref<1x256xf32, #tpu.memory_space<vmem>>, vector<1x256xf32>
    %15 = vector.broadcast %14 : vector<1x256xf32> to vector<16x256xf32>
    %16 = arith.addf %13, %15 : vector<16x256xf32>
    %cst_12 = arith.constant 0.000000e+00 : f32
    %17 = vector.broadcast %cst_12 : f32 to vector<16x256xf32>
    %18 = arith.cmpf oge, %16, %17 : vector<16x256xf32>
    %cst_13 = arith.constant 0.00999999977 : f32
    %19 = vector.broadcast %cst_13 : f32 to vector<16x256xf32>
    %20 = arith.mulf %19, %16 : vector<16x256xf32>
    %21 = arith.select %18, %16, %20 : vector<16x256xi1>, vector<16x256xf32>
    %c0_14 = arith.constant 0 : index
    %c0_15 = arith.constant 0 : index
    %22 = vector.load %arg14[%c0_14, %c0_15] : memref<256x256xbf16, #tpu.memory_space<vmem>>, vector<256x256xbf16>
    %23 = arith.truncf %21 : vector<16x256xf32> to vector<16x256xbf16>
    %cst_16 = arith.constant dense<0.000000e+00> : vector<16x256xf32>
    %24 = tpu.matmul %23, %22, %cst_16 {dimension_numbers = #tpu.dot_dimension_numbers<[1], [0], [0], [1], [0, 0, 1, 1], [], []>} : vector<16x256xbf16>, vector<256x256xbf16>, vector<16x256xf32> -> vector<16x256xf32>
    %c0_17 = arith.constant 0 : index
    %c0_18 = arith.constant 0 : index
    %25 = vector.load %arg15[%c0_17, %c0_18] : memref<1x256xf32, #tpu.memory_space<vmem>>, vector<1x256xf32>
    %26 = vector.broadcast %25 : vector<1x256xf32> to vector<16x256xf32>
    %27 = arith.addf %24, %26 : vector<16x256xf32>
    %28 = vector.extract_strided_slice %27 {offsets = [0, 0], sizes = [16, 128], strides = [1, 1]} : vector<16x256xf32> to vector<16x128xf32>
    %29 = vector.extract_strided_slice %27 {offsets = [0, 128], sizes = [16, 128], strides = [1, 1]} : vector<16x256xf32> to vector<16x128xf32>
    %cst_19 = arith.constant 5.000000e-01 : f32
    %30 = vector.broadcast %cst_19 : f32 to vector<16x128xf32>
    %31 = arith.mulf %30, %29 : vector<16x128xf32>
    %32 = math.exp %31 : vector<16x128xf32>
    %c0_20 = arith.constant 0 : index
    %c0_21 = arith.constant 0 : index
    %33 = vector.load %arg3[%c0_20, %c0_21] : memref<16x128xf32, #tpu.memory_space<vmem>>, vector<16x128xf32>
    %34 = arith.mulf %32, %33 : vector<16x128xf32>
    %35 = arith.addf %28, %34 : vector<16x128xf32>
    %c0_22 = arith.constant 0 : index
    %c0_23 = arith.constant 0 : index
    %36 = vector.load %arg29[%c0_22, %c0_23] : memref<16x256xf32, #tpu.memory_space<vmem>>, vector<16x256xf32>
    tpu.vector_store %arg29[%c0_22, %c0_23], %21 {strides = array<i32>} : memref<16x256xf32, #tpu.memory_space<vmem>>, vector<16x256xf32>,
    %c0_24 = arith.constant 0 : index
    %c0_25 = arith.constant 0 : index
    %37 = vector.load %arg30[%c0_24, %c0_25] : memref<16x256xf32, #tpu.memory_space<vmem>>, vector<16x256xf32>
    tpu.vector_store %arg30[%c0_24, %c0_25], %27 {strides = array<i32>} : memref<16x256xf32, #tpu.memory_space<vmem>>, vector<16x256xf32>,
    %c0_26 = arith.constant 0 : index
    %c0_27 = arith.constant 0 : index
    %38 = vector.load %arg31[%c0_26, %c0_27] : memref<16x128xf32, #tpu.memory_space<vmem>>, vector<16x128xf32>
    tpu.vector_store %arg31[%c0_26, %c0_27], %35 {strides = array<i32>} : memref<16x128xf32, #tpu.memory_space<vmem>>, vector<16x128xf32>,
    tpu.wait_dma2 semaphore(%arg36 : memref<!tpu.dma_semaphore, #tpu.memory_space<semaphore_mem>>) src(%arg4 : memref<1536x512xbf16, #tpu.memory_space<any>>) dst(%arg35 : memref<1536x512xbf16, #tpu.memory_space<vmem>>)
    %c0_28 = arith.constant 0 : index
    %c0_29 = arith.constant 0 : index
    %39 = vector.load %arg0[%c0_28, %c0_29] : memref<16x1536xbf16, #tpu.memory_space<vmem>>, vector<16x1536xbf16>
    %c0_30 = arith.constant 0 : index
    %c0_31 = arith.constant 0 : index
    %40 = vector.load %arg35[%c0_30, %c0_31] : memref<1536x512xbf16, #tpu.memory_space<vmem>>, vector<1536x512xbf16>
    %cst_32 = arith.constant dense<0.000000e+00> : vector<16x512xf32>
    %41 = tpu.matmul %39, %40, %cst_32 {dimension_numbers = #tpu.dot_dimension_numbers<[1], [0], [0], [1], [0, 0, 1, 1], [], []>} : vector<16x1536xbf16>, vector<1536x512xbf16>, vector<16x512xf32> -> vector<16x512xf32>
    %c0_33 = arith.constant 0 : index
    %c0_34 = arith.constant 0 : index
    %42 = vector.load %arg5[%c0_33, %c0_34] : memref<1x512xf32, #tpu.memory_space<vmem>>, vector<1x512xf32>
    %43 = vector.broadcast %42 : vector<1x512xf32> to vector<16x512xf32>
    %44 = arith.addf %41, %43 : vector<16x512xf32>
    %cst_35 = arith.constant 0.000000e+00 : f32
    %45 = vector.broadcast %cst_35 : f32 to vector<16x512xf32>
    %46 = arith.cmpf oge, %44, %45 : vector<16x512xf32>
    %cst_36 = arith.constant 0.00999999977 : f32
    %47 = vector.broadcast %cst_36 : f32 to vector<16x512xf32>
    %48 = arith.mulf %47, %44 : vector<16x512xf32>
    %49 = arith.select %46, %44, %48 : vector<16x512xi1>, vector<16x512xf32>
    %c0_37 = arith.constant 0 : index
    %c0_38 = arith.constant 0 : index
    %50 = vector.load %arg6[%c0_37, %c0_38] : memref<512x256xbf16, #tpu.memory_space<vmem>>, vector<512x256xbf16>
    %51 = arith.truncf %49 : vector<16x512xf32> to vector<16x512xbf16>
    %cst_39 = arith.constant dense<0.000000e+00> : vector<16x256xf32>
    %52 = tpu.matmul %51, %50, %cst_39 {dimension_numbers = #tpu.dot_dimension_numbers<[1], [0], [0], [1], [0, 0, 1, 1], [], []>} : vector<16x512xbf16>, vector<512x256xbf16>, vector<16x256xf32> -> vector<16x256xf32>
    %c0_40 = arith.constant 0 : index
    %c0_41 = arith.constant 0 : index
    %53 = vector.load %arg7[%c0_40, %c0_41] : memref<1x256xf32, #tpu.memory_space<vmem>>, vector<1x256xf32>
    %54 = vector.broadcast %53 : vector<1x256xf32> to vector<16x256xf32>
    %55 = arith.addf %52, %54 : vector<16x256xf32>
    %c0_42 = arith.constant 0 : index
    %c0_43 = arith.constant 0 : index
    %56 = vector.load %arg8[%c0_42, %c0_43] : memref<256x256xbf16, #tpu.memory_space<vmem>>, vector<256x256xbf16>
    %57 = arith.truncf %55 : vector<16x256xf32> to vector<16x256xbf16>
    %cst_44 = arith.constant dense<0.000000e+00> : vector<16x256xf32>
    %58 = tpu.matmul %57, %56, %cst_44 {dimension_numbers = #tpu.dot_dimension_numbers<[1], [0], [0], [1], [0, 0, 1, 1], [], []>} : vector<16x256xbf16>, vector<256x256xbf16>, vector<16x256xf32> -> vector<16x256xf32>
    %c0_45 = arith.constant 0 : index
    %c0_46 = arith.constant 0 : index
    %59 = vector.load %arg9[%c0_45, %c0_46] : memref<1x256xf32, #tpu.memory_space<vmem>>, vector<1x256xf32>
    %60 = vector.broadcast %59 : vector<1x256xf32> to vector<16x256xf32>
    %61 = arith.addf %58, %60 : vector<16x256xf32>
    %62 = vector.extract_strided_slice %61 {offsets = [0, 0], sizes = [16, 128], strides = [1, 1]} : vector<16x256xf32> to vector<16x128xf32>
    %63 = vector.extract_strided_slice %61 {offsets = [0, 128], sizes = [16, 128], strides = [1, 1]} : vector<16x256xf32> to vector<16x128xf32>
    %cst_47 = arith.constant 5.000000e-01 : f32
    %64 = vector.broadcast %cst_47 : f32 to vector<16x128xf32>
    %65 = arith.mulf %64, %63 : vector<16x128xf32>
    %66 = math.exp %65 : vector<16x128xf32>
    %c0_48 = arith.constant 0 : index
    %c0_49 = arith.constant 0 : index
    %67 = vector.load %arg2[%c0_48, %c0_49] : memref<16x128xf32, #tpu.memory_space<vmem>>, vector<16x128xf32>
    %68 = arith.mulf %66, %67 : vector<16x128xf32>
    %69 = arith.addf %62, %68 : vector<16x128xf32>
    %c0_50 = arith.constant 0 : index
    %c0_51 = arith.constant 0 : index
    %70 = vector.load %arg26[%c0_50, %c0_51] : memref<16x256xf32, #tpu.memory_space<vmem>>, vector<16x256xf32>
    tpu.vector_store %arg26[%c0_50, %c0_51], %55 {strides = array<i32>} : memref<16x256xf32, #tpu.memory_space<vmem>>, vector<16x256xf32>,
    %c0_52 = arith.constant 0 : index
    %c0_53 = arith.constant 0 : index
    %71 = vector.load %arg27[%c0_52, %c0_53] : memref<16x256xf32, #tpu.memory_space<vmem>>, vector<16x256xf32>
    tpu.vector_store %arg27[%c0_52, %c0_53], %61 {strides = array<i32>} : memref<16x256xf32, #tpu.memory_space<vmem>>, vector<16x256xf32>,
    %c0_54 = arith.constant 0 : index
    %c0_55 = arith.constant 0 : index
    %72 = vector.load %arg28[%c0_54, %c0_55] : memref<16x128xf32, #tpu.memory_space<vmem>>, vector<16x128xf32>
    tpu.vector_store %arg28[%c0_54, %c0_55], %69 {strides = array<i32>} : memref<16x128xf32, #tpu.memory_space<vmem>>, vector<16x128xf32>,
    %c0_56 = arith.constant 0 : index
    %c0_57 = arith.constant 0 : index
    %73 = vector.load %arg37[%c0_56, %c0_57] : memref<32x128xf32, #tpu.memory_space<vmem>>, vector<16x128xf32>
    tpu.vector_store %arg37[%c0_56, %c0_57], %69 {strides = array<i32>} : memref<32x128xf32, #tpu.memory_space<vmem>>, vector<16x128xf32>,
    %c16 = arith.constant 16 : index
    %c0_58 = arith.constant 0 : index
    %74 = vector.load %arg37[%c16, %c0_58] : memref<32x128xf32, #tpu.memory_space<vmem>>, vector<16x128xf32>
    tpu.vector_store %arg37[%c16, %c0_58], %35 {strides = array<i32>} : memref<32x128xf32, #tpu.memory_space<vmem>>, vector<16x128xf32>,
    %c0_59 = arith.constant 0 : index
    %c0_60 = arith.constant 0 : index
    %75 = vector.load %arg38[%c0_59, %c0_60] : memref<32x256xf32, #tpu.memory_space<vmem>>, vector<16x256xf32>
    tpu.vector_store %arg38[%c0_59, %c0_60], %55 {strides = array<i32>} : memref<32x256xf32, #tpu.memory_space<vmem>>, vector<16x256xf32>,
    %c16_61 = arith.constant 16 : index
    %c0_62 = arith.constant 0 : index
    %76 = vector.load %arg38[%c16_61, %c0_62] : memref<32x256xf32, #tpu.memory_space<vmem>>, vector<16x256xf32>
    tpu.vector_store %arg38[%c16_61, %c0_62], %21 {strides = array<i32>} : memref<32x256xf32, #tpu.memory_space<vmem>>, vector<16x256xf32>,
    %c0_63 = arith.constant 0 : index
    %c0_64 = arith.constant 0 : index
    %77 = vector.load %arg37[%c0_63, %c0_64] : memref<32x128xf32, #tpu.memory_space<vmem>>, vector<32x128xf32>
    %c0_65 = arith.constant 0 : index
    %c0_66 = arith.constant 0 : index
    %78 = vector.load %arg38[%c0_65, %c0_66] : memref<32x256xf32, #tpu.memory_space<vmem>>, vector<32x256xf32>
    %c0_67 = arith.constant 0 : index
    %c0_68 = arith.constant 0 : index
    %79 = vector.load %arg16[%c0_67, %c0_68] : memref<128x512xbf16, #tpu.memory_space<vmem>>, vector<128x512xbf16>
    %80 = arith.truncf %77 : vector<32x128xf32> to vector<32x128xbf16>
    %cst_69 = arith.constant dense<0.000000e+00> : vector<32x512xf32>
    %81 = tpu.matmul %80, %79, %cst_69 {dimension_numbers = #tpu.dot_dimension_numbers<[1], [0], [0], [1], [0, 0, 1, 1], [], []>} : vector<32x128xbf16>, vector<128x512xbf16>, vector<32x512xf32> -> vector<32x512xf32>
    %c0_70 = arith.constant 0 : index
    %c0_71 = arith.constant 0 : index
    %82 = vector.load %arg17[%c0_70, %c0_71] : memref<1x512xf32, #tpu.memory_space<vmem>>, vector<1x512xf32>
    %83 = vector.broadcast %82 : vector<1x512xf32> to vector<32x512xf32>
    %84 = arith.addf %81, %83 : vector<32x512xf32>
    %cst_72 = arith.constant 0.000000e+00 : f32
    %85 = vector.broadcast %cst_72 : f32 to vector<32x512xf32>
    %86 = arith.maximumf %84, %85 : vector<32x512xf32>
    %87 = vector.extract_strided_slice %86 {offsets = [0, 0], sizes = [32, 256], strides = [1, 1]} : vector<32x512xf32> to vector<32x256xf32>
    %c0_73 = arith.constant 0 : index
    %c0_74 = arith.constant 0 : index
    %88 = vector.load %arg18[%c0_73, %c0_74] : memref<256x256xbf16, #tpu.memory_space<vmem>>, vector<256x256xbf16>
    %89 = arith.truncf %87 : vector<32x256xf32> to vector<32x256xbf16>
    %cst_75 = arith.constant dense<0.000000e+00> : vector<32x256xf32>
    %90 = tpu.matmul %89, %88, %cst_75 {dimension_numbers = #tpu.dot_dimension_numbers<[1], [0], [0], [1], [0, 0, 1, 1], [], []>} : vector<32x256xbf16>, vector<256x256xbf16>, vector<32x256xf32> -> vector<32x256xf32>
    %c0_76 = arith.constant 0 : index
    %c0_77 = arith.constant 0 : index
    %91 = vector.load %arg19[%c0_76, %c0_77] : memref<1x256xf32, #tpu.memory_space<vmem>>, vector<1x256xf32>
    %92 = vector.broadcast %91 : vector<1x256xf32> to vector<32x256xf32>
    %93 = arith.addf %90, %92 : vector<32x256xf32>
    %cst_78 = arith.constant 0.000000e+00 : f32
    %94 = vector.broadcast %cst_78 : f32 to vector<32x256xf32>
    %95 = arith.subf %94, %93 : vector<32x256xf32>
    %96 = math.exp %95 : vector<32x256xf32>
    %cst_79 = arith.constant 1.000000e+00 : f32
    %97 = vector.broadcast %cst_79 : f32 to vector<32x256xf32>
    %98 = arith.addf %97, %96 : vector<32x256xf32>
    %99 = tpu.reciprocal %98 {approx = true} : vector<32x256xf32> -> vector<32x256xf32>
    %c0_80 = arith.constant 0 : index
    %c0_81 = arith.constant 0 : index
    %100 = vector.load %arg32[%c0_80, %c0_81] : memref<32x256xf32, #tpu.memory_space<vmem>>, vector<32x256xf32>
    tpu.vector_store %arg32[%c0_80, %c0_81], %99 {strides = array<i32>} : memref<32x256xf32, #tpu.memory_space<vmem>>, vector<32x256xf32>,
    %101 = vector.extract_strided_slice %86 {offsets = [0, 256], sizes = [32, 256], strides = [1, 1]} : vector<32x512xf32> to vector<32x256xf32>
    %c0_82 = arith.constant 0 : index
    %c0_83 = arith.constant 0 : index
    %102 = vector.load %arg20[%c0_82, %c0_83] : memref<256x256xbf16, #tpu.memory_space<vmem>>, vector<256x256xbf16>
    %103 = arith.truncf %101 : vector<32x256xf32> to vector<32x256xbf16>
    %cst_84 = arith.constant dense<0.000000e+00> : vector<32x256xf32>
    %104 = tpu.matmul %103, %102, %cst_84 {dimension_numbers = #tpu.dot_dimension_numbers<[1], [0], [0], [1], [0, 0, 1, 1], [], []>} : vector<32x256xbf16>, vector<256x256xbf16>, vector<32x256xf32> -> vector<32x256xf32>
    %c0_85 = arith.constant 0 : index
    %c0_86 = arith.constant 0 : index
    %105 = vector.load %arg21[%c0_85, %c0_86] : memref<1x256xf32, #tpu.memory_space<vmem>>, vector<1x256xf32>
    %106 = vector.broadcast %105 : vector<1x256xf32> to vector<32x256xf32>
    %107 = arith.addf %104, %106 : vector<32x256xf32>
    %cst_87 = arith.constant 0.000000e+00 : f32
    %108 = vector.broadcast %cst_87 : f32 to vector<32x256xf32>
    %109 = arith.subf %108, %107 : vector<32x256xf32>
    %110 = math.exp %109 : vector<32x256xf32>
    %cst_88 = arith.constant 1.000000e+00 : f32
    %111 = vector.broadcast %cst_88 : f32 to vector<32x256xf32>
    %112 = arith.addf %111, %110 : vector<32x256xf32>
    %113 = tpu.reciprocal %112 {approx = true} : vector<32x256xf32> -> vector<32x256xf32>
    %c0_89 = arith.constant 0 : index
    %c0_90 = arith.constant 0 : index
    %114 = vector.load %arg33[%c0_89, %c0_90] : memref<32x256xf32, #tpu.memory_space<vmem>>, vector<32x256xf32>
    tpu.vector_store %arg33[%c0_89, %c0_90], %113 {strides = array<i32>} : memref<32x256xf32, #tpu.memory_space<vmem>>, vector<32x256xf32>,
    %c0_91 = arith.constant 0 : index
    %c0_92 = arith.constant 0 : index
    %115 = vector.load %arg22[%c0_91, %c0_92] : memref<256x128xbf16, #tpu.memory_space<vmem>>, vector<256x128xbf16>
    %116 = arith.truncf %78 : vector<32x256xf32> to vector<32x256xbf16>
    %cst_93 = arith.constant dense<0.000000e+00> : vector<32x128xf32>
    %117 = tpu.matmul %116, %115, %cst_93 {dimension_numbers = #tpu.dot_dimension_numbers<[1], [0], [0], [1], [0, 0, 1, 1], [], []>} : vector<32x256xbf16>, vector<256x128xbf16>, vector<32x128xf32> -> vector<32x128xf32>
    %c0_94 = arith.constant 0 : index
    %c0_95 = arith.constant 0 : index
    %118 = vector.load %arg23[%c0_94, %c0_95] : memref<1x128xf32, #tpu.memory_space<vmem>>, vector<1x128xf32>
    %119 = vector.broadcast %118 : vector<1x128xf32> to vector<32x128xf32>
    %120 = arith.addf %117, %119 : vector<32x128xf32>
    %cst_96 = arith.constant 0.000000e+00 : f32
    %121 = vector.broadcast %cst_96 : f32 to vector<32x128xf32>
    %122 = arith.maximumf %120, %121 : vector<32x128xf32>
    %c0_97 = arith.constant 0 : index
    %c0_98 = arith.constant 0 : index
    %123 = vector.load %arg24[%c0_97, %c0_98] : memref<128x128xbf16, #tpu.memory_space<vmem>>, vector<128x128xbf16>
    %124 = arith.truncf %122 : vector<32x128xf32> to vector<32x128xbf16>
    %cst_99 = arith.constant dense<0.000000e+00> : vector<32x128xf32>
    %125 = tpu.matmul %124, %123, %cst_99 {dimension_numbers = #tpu.dot_dimension_numbers<[1], [0], [0], [1], [0, 0, 1, 1], [], []>} : vector<32x128xbf16>, vector<128x128xbf16>, vector<32x128xf32> -> vector<32x128xf32>
    %c0_100 = arith.constant 0 : index
    %c0_101 = arith.constant 0 : index
    %126 = vector.load %arg25[%c0_100, %c0_101] : memref<1x128xf32, #tpu.memory_space<vmem>>, vector<1x128xf32>
    %127 = vector.broadcast %126 : vector<1x128xf32> to vector<32x128xf32>
    %128 = arith.addf %125, %127 : vector<32x128xf32>
    %cst_102 = arith.constant 0.000000e+00 : f32
    %129 = vector.broadcast %cst_102 : f32 to vector<32x128xf32>
    %130 = arith.subf %129, %128 : vector<32x128xf32>
    %131 = math.exp %130 : vector<32x128xf32>
    %cst_103 = arith.constant 1.000000e+00 : f32
    %132 = vector.broadcast %cst_103 : f32 to vector<32x128xf32>
    %133 = arith.addf %132, %131 : vector<32x128xf32>
    %134 = tpu.reciprocal %133 {approx = true} : vector<32x128xf32> -> vector<32x128xf32>
    %c0_104 = arith.constant 0 : index
    %c0_105 = arith.constant 0 : index
    %135 = vector.load %arg34[%c0_104, %c0_105] : memref<32x128xf32, #tpu.memory_space<vmem>>, vector<32x128xf32>
    tpu.vector_store %arg34[%c0_104, %c0_105], %134 {strides = array<i32>} : memref<32x128xf32, #tpu.memory_space<vmem>>, vector<32x128xf32>,
    return
  }
}

</mosaic_0001>

<bundles_post_ra>
// kernel: student_forward.1
= control target key start
LH: loop header
LB: loop body
LE: loop exit
PB: predicated region body
PF: predicated region fallthrough
CT: control target
= control target key end

     0   :  { %s6635_s6 = smov 1   ;;  %s6636_s10 = smov 2   ;;  %s7144_s0 = inlined_call_operand.smem [shape: u32[35], index: -1, kind: input, shape index: {}] }
   0x1   :  { %s6710_s5 = sld [smem:[%s7144_s0]]   ;;  %s6637_s14 = smov 3  }
   0x2   :  { %s6715_s9 = sld [smem:[%s7144_s0 + %s6635_s6]]   ;;  %s6638_s18 = smov 4  }
   0x3   :  { %s6720_s13 = sld [smem:[%s7144_s0 + %s6636_s10]]   ;;  %s6639_s22 = smov 5  }
   0x4   :  { %s6725_s17 = sld [smem:[%s7144_s0 + %s6637_s14]]   ;;  %s6640_s26 = smov 6  }
   0x5   :  { %s6730_s21 = sld [smem:[%s7144_s0 + %s6638_s18]]   ;;  %s6641_s30 = smov 7  }
   0x6   :  { %s6735_s25 = sld [smem:[%s7144_s0 + %s6639_s22]]   ;;  %s6642_s4 = smov 8  }
   0x7   :  { %7161 = sst [smem:[#allocation52_spill]] %s6710_s5  ;;  %s6643_s10 = smov 9  }
   0x8   :  { %7162 = sst [smem:[#allocation53_spill]] %s6715_s9  ;;  %s6644_s15 = smov 10  }
   0x9   :  { %7163 = sst [smem:[#allocation54_spill]] %s6720_s13  ;;  %s6645_s20 = smov 11  }
   0xa   :  { %7164 = sst [smem:[#allocation55_spill]] %s6725_s17  ;;  %s6647_s1 = smov 13  }
   0xb   :  { %7165 = sst [smem:[#allocation56_spill]] %s6730_s21  ;;  %s6648_s7 = smov 14  }
   0xc   :  { %s6740_s29 = sld [smem:[%s7144_s0 + %s6640_s26]]   ;;  %s6646_s26 = smov 12  }
   0xd   :  { %s6745_s3 = sld [smem:[%s7144_s0 + %s6641_s30]]   ;;  %s6650_s22 = smov 16  }
   0xe   :  { %s6750_s8 = sld [smem:[%s7144_s0 + %s6642_s4]]   ;;  %s6651_s28 = smov 17  }
   0xf   :  { %s6755_s14 = sld [smem:[%s7144_s0 + %s6643_s10]]  }
  0x10   :  { %s6760_s19 = sld [smem:[%s7144_s0 + %s6644_s15]]   ;;  %s6649_s15 = smov 15  }
  0x11   :  { %s6765_s24 = sld [smem:[%s7144_s0 + %s6645_s20]]  }
  0x12   :  { %s6770_s30 = sld [smem:[%s7144_s0 + %s6646_s26]]  }
  0x13   :  { %s6775_s6 = sld [smem:[%s7144_s0 + %s6647_s1]]  }
  0x14   :  { %s6780_s12 = sld [smem:[%s7144_s0 + %s6648_s7]]   ;;  %s6652_s7 = smov 18  }
  0x15   :  { %s6785_s20 = sld [smem:[%s7144_s0 + %s6649_s15]]   ;;  %s6653_s15 = smov 19  }
  0x16   :  { %s6790_s27 = sld [smem:[%s7144_s0 + %s6650_s22]]   ;;  %s6654_s22 = smov 20  }
  0x17   :  { %s6795_s4 = sld [smem:[%s7144_s0 + %s6651_s28]]   ;;  %s6655_s28 = smov 21  }
  0x18   :  { %s6800_s13 = sld [smem:[%s7144_s0 + %s6652_s7]]   ;;  %s6656_s7 = smov 22  }
  0x19   :  { %7166 = sst [smem:[#allocation57_spill]] %s6775_s6 }
  0x1a   :  { %s6805_s5 = sld [smem:[%s7144_s0 + %s6653_s15]]   ;;  %s6657_s15 = smov 23  }
  0x1b   :  { %7167 = sst [smem:[#allocation58_spill]] %s6785_s20 }
  0x1c   :  { %s6810_s17 = sld [smem:[%s7144_s0 + %s6654_s22]]   ;;  %s6658_s22 = smov 24  }
  0x1d   :  { %7168 = sst [smem:[#allocation59_spill]] %s6795_s4 }
  0x1e   :  { %s6815_s9 = sld [smem:[%s7144_s0 + %s6655_s28]]   ;;  %s6659_s28 = smov 25  }
  0x1f   :  { %s6820_s21 = sld [smem:[%s7144_s0 + %s6656_s7]]   ;;  %s6660_s7 = smov 26  }
  0x20   :  { %7169 = sst [smem:[#allocation60_spill]] %s6805_s5 }
  0x21   :  { %s6825_s5 = sld [smem:[%s7144_s0 + %s6657_s15]]   ;;  %s6661_s15 = smov 27  }
  0x22   :  { %s6830_s4 = sld [smem:[%s7144_s0 + %s6658_s22]]   ;;  %s6662_s22 = smov 28  }
  0x23   :  { %s6840_s20 = sld [smem:[%s7144_s0 + %s6660_s7]]   ;;  %s6664_s7 = smov 30  }
  0x24   :  { %7170 = sst [smem:[#allocation61_spill]] %s6815_s9 }
  0x25   :  { %s6835_s9 = sld [smem:[%s7144_s0 + %s6659_s28]]   ;;  %s6663_s28 = smov 29  }
  0x26   :  { %s6850_s6 = sld [smem:[%s7144_s0 + %s6662_s22]]   ;;  %s6666_s22 = smov 32  }
  0x27   :  { %7171 = sst [smem:[#allocation62_spill]] %s6825_s5 }
  0x28   :  { %s6845_s5 = sld [smem:[%s7144_s0 + %s6661_s15]]   ;;  %s6665_s15 = smov 31  }
  0x29   :  { %7173 = sst [smem:[#allocation64_spill]] %s6840_s20 }
  0x2a   :  { %s6860_s20 = sld [smem:[%s7144_s0 + %s6664_s7]]   ;;  %s6668_s7 = smov 34  }
  0x2b   :  { %7172 = sst [smem:[#allocation63_spill]] %s6835_s9 }
  0x2c   :  { %7175 = sst [smem:[#allocation66_spill]] %s6850_s6 }
  0x2d   :  { %s6855_s9 = sld [smem:[%s7144_s0 + %s6663_s28]]   ;;  %s6667_s28 = smov 33  }
  0x2e   :  { %7174 = sst [smem:[#allocation65_spill]] %s6845_s5 }
  0x2f   :  { %s6865_s5 = sld [smem:[%s7144_s0 + %s6665_s15]]  }
  0x30   :  { %7177 = sst [smem:[#allocation68_spill]] %s6860_s20 }
  0x31   :  { %s6870_s6 = sld [smem:[%s7144_s0 + %s6666_s22]]  }
  0x32   :  { %s6880_s20 = sld [smem:[%s7144_s0 + %s6668_s7]]  }
  0x33   :  { %7176 = sst [smem:[#allocation67_spill]] %s6855_s9 }
  0x34   :  { %s6875_s9 = sld [smem:[%s7144_s0 + %s6667_s28]]  }
  0x35   :  { %75 = vsyncpa [#allocation7], 0 }
  0x36   :  { %76 = vsyncpa [#allocation9], 0 }
  0x37   :  { %77 = vsyncpa [#allocation12], 0 }
  0x38   :  { %78 = vsyncpa [#allocation15], 0 }
  0x39   :  { %79 = vsyncpa [#allocation18], 0 }
  0x3a   :  { %80 = vsyncpa [#allocation21], 0 }
  0x3b   :  { %81 = vsyncpa [#allocation24], 0 }
  0x3c   :  { %82 = vsyncpa [#allocation27], 0 }
  0x3d   :  { %83 = vsyncpa [#allocation30], 0 }
  0x3e   :  { %84 = vsyncpa [#allocation33], 0 }
  0x3f   :  { %85 = vsyncpa [#allocation36], 0  ;;  %s6669_s15 = smov [#allocation8]   ;;  %s6149_s18 = scalar_lea.hbm %s6740_s29, 8192 }
  0x40   :  { %s109_s16 = sshll.u32 %s6669_s15, 4  ;;  %p6150_p0 = scmp.ne.s32.totalorder %s6740_s29, %s6149_s18  ;;  %s110_s16 = int_to_ptr.vmem [resolvable:$true] %s109_s16 }
  0x41   :  { %p6153_p1 = scmp.lt.u32.totalorder %s6149_s18, %s6740_s29 }
  0x43   :  { %p6155_p2 = pnand %p6153_p1, %p6150_p0 }
  0x45   :  { %6158 = shalt.err (!%p6155_p2)
}
  0x46   :  { %s6159_s0 = scalar_lea.vmem %s110_s16, 8192  ;;  %p6164_p4 = scmp.lt.s32.totalorder %s110_s16, %s110_s16 }
  0x47   :  { %p6160_p3 = scmp.ne.s32.totalorder %s110_s16, %s6159_s0  ;;  %p6165_p5 = scmp.lt.s32.totalorder %s6159_s0, %s6159_s0 }
  0x49   :  { %p6166_p6 = por %p6165_p5, %p6164_p4 }
  0x4b   :  { %p6167_p7 = pnand %p6166_p6, %p6160_p3 }
  0x4d   :  { %6170 = shalt.err (!%p6167_p7)
}
  0x4e   :  { %s6670_s22 = smov 128   ;;  %s6671_s23 = smov 8  }
  0x4f   :  { %115 = dma.hbm_to_vmem [thread:$0]  %s6740_s29, 8192, %s110_s16, [#allocation9], %s6670_s22, %s6670_s22, %s6671_s23  }
  0x50   :  { %s6672_s26 = smov [#allocation11]   ;;  %s6673_s1 = smov [#allocation14]  }
  0x51   :  { %s131_s28 = sshll.u32 %s6672_s26, 4  ;;  %s153_s2 = sshll.u32 %s6673_s1, 4  ;;  %s132_s28 = int_to_ptr.vmem [resolvable:$true] %s131_s28  ;;  %s154_s2 = int_to_ptr.vmem [resolvable:$true] %s153_s2 }
  0x52   :  { %s6171_s7 = scalar_lea.hbm %s6750_s8, 4096 }
  0x53   :  { %p6172_p8 = scmp.ne.s32.totalorder %s6750_s8, %s6171_s7  ;;  %p6175_p9 = scmp.lt.u32.totalorder %s6171_s7, %s6750_s8 }
  0x55   :  { %p6177_p10 = pnand %p6175_p9, %p6172_p8 }
  0x57   :  { %6180 = shalt.err (!%p6177_p10)
}
  0x58   :  { %s6181_s10 = scalar_lea.vmem %s132_s28, 4096  ;;  %p6186_p12 = scmp.lt.s32.totalorder %s132_s28, %s132_s28 }
  0x59   :  { %p6182_p11 = scmp.ne.s32.totalorder %s132_s28, %s6181_s10  ;;  %p6187_p13 = scmp.lt.s32.totalorder %s6181_s10, %s6181_s10 }
  0x5b   :  { %p6188_p0 = por %p6187_p13, %p6186_p12 }
  0x5d   :  { %p6189_p1 = pnand %p6188_p0, %p6182_p11 }
  0x5f   :  { %6192 = shalt.err (!%p6189_p1)
}
  0x60   :  { %137 = dma.hbm_to_vmem [thread:$0]  %s6750_s8, 4096, %s132_s28, [#allocation12], %s6670_s22, %s6670_s22, %s6671_s23  }
  0x61   :  { %s6193_s29 = scalar_lea.hbm %s6760_s19, 8192 }
  0x62   :  { %p6194_p2 = scmp.ne.s32.totalorder %s6760_s19, %s6193_s29  ;;  %p6197_p3 = scmp.lt.u32.totalorder %s6193_s29, %s6760_s19 }
  0x64   :  { %p6199_p4 = pnand %p6197_p3, %p6194_p2 }
  0x66   :  { %6202 = shalt.err (!%p6199_p4)
}
  0x67   :  { %s6203_s11 = scalar_lea.vmem %s154_s2, 8192  ;;  %p6208_p6 = scmp.lt.s32.totalorder %s154_s2, %s154_s2 }
  0x68   :  { %p6204_p5 = scmp.ne.s32.totalorder %s154_s2, %s6203_s11  ;;  %p6209_p7 = scmp.lt.s32.totalorder %s6203_s11, %s6203_s11 }
  0x6a   :  { %p6210_p8 = por %p6209_p7, %p6208_p6 }
  0x6c   :  { %p6211_p9 = pnand %p6210_p8, %p6204_p5 }
  0x6e   :  { %6214 = shalt.err (!%p6211_p9)
}
  0x6f   :  { %s6674_s15 = smov 256   ;;  %s6675_s16 = smov 16  }
  0x70   :  { %159 = dma.hbm_to_vmem [thread:$0]  %s6760_s19, 8192, %s154_s2, [#allocation15], %s6674_s15, %s6674_s15, %s6675_s16  }
  0x71   :  { %s6676_s8 = smov [#allocation17]   ;;  %s6677_s0 = smov [#allocation20]  }
  0x72   :  { %s175_s18 = sshll.u32 %s6676_s8, 4  ;;  %s197_s26 = sshll.u32 %s6677_s0, 4  ;;  %s176_s18 = int_to_ptr.vmem [resolvable:$true] %s175_s18  ;;  %s198_s26 = int_to_ptr.vmem [resolvable:$true] %s197_s26 }
  0x73   :  { %s6215_s28 = scalar_lea.hbm %s6770_s30, 8192 }
  0x74   :  { %p6216_p10 = scmp.ne.s32.totalorder %s6770_s30, %s6215_s28  ;;  %p6219_p11 = scmp.lt.u32.totalorder %s6215_s28, %s6770_s30 }
  0x76   :  { %p6221_p12 = pnand %p6219_p11, %p6216_p10 }
  0x78   :  { %6224 = shalt.err (!%p6221_p12)
}
  0x79   :  { %s6225_s1 = scalar_lea.vmem %s176_s18, 8192  ;;  %p6230_p0 = scmp.lt.s32.totalorder %s176_s18, %s176_s18 }
  0x7a   :  { %p6226_p13 = scmp.ne.s32.totalorder %s176_s18, %s6225_s1  ;;  %p6231_p1 = scmp.lt.s32.totalorder %s6225_s1, %s6225_s1 }
  0x7c   :  { %p6232_p2 = por %p6231_p1, %p6230_p0 }
  0x7e   :  { %p6233_p3 = pnand %p6232_p2, %p6226_p13 }
  0x80   :  { %6236 = shalt.err (!%p6233_p3)
}
  0x81   :  { %181 = dma.hbm_to_vmem [thread:$0]  %s6770_s30, 8192, %s176_s18, [#allocation18], %s6670_s22, %s6670_s22, %s6671_s23  }
  0x82   :  { %s6237_s19 = scalar_lea.hbm %s6780_s12, 4096 }
  0x83   :  { %p6238_p4 = scmp.ne.s32.totalorder %s6780_s12, %s6237_s19  ;;  %p6241_p5 = scmp.lt.u32.totalorder %s6237_s19, %s6780_s12 }
  0x85   :  { %p6243_p6 = pnand %p6241_p5, %p6238_p4 }
  0x87   :  { %6246 = shalt.err (!%p6243_p6)
}
  0x88   :  { %s6247_s2 = scalar_lea.vmem %s198_s26, 4096  ;;  %p6252_p8 = scmp.lt.s32.totalorder %s198_s26, %s198_s26 }
  0x89   :  { %p6248_p7 = scmp.ne.s32.totalorder %s198_s26, %s6247_s2  ;;  %p6253_p9 = scmp.lt.s32.totalorder %s6247_s2, %s6247_s2 }
  0x8b   :  { %p6254_p10 = por %p6253_p9, %p6252_p8 }
  0x8d   :  { %p6255_p11 = pnand %p6254_p10, %p6248_p7 }
  0x8f   :  { %6258 = shalt.err (!%p6255_p11)
}
  0x90   :  { %203 = dma.hbm_to_vmem [thread:$0]  %s6780_s12, 4096, %s198_s26, [#allocation21], %s6670_s22, %s6670_s22, %s6671_s23  }
  0x91   :  { %s6678_s30 = smov [#allocation23]   ;;  %s6679_s10 = smov [#allocation26]  }
  0x92   :  { %s219_s7 = sshll.u32 %s6678_s30, 4  ;;  %s241_s29 = sshll.u32 %s6679_s10, 4  ;;  %s220_s7 = int_to_ptr.vmem [resolvable:$true] %s219_s7  ;;  %s242_s29 = int_to_ptr.vmem [resolvable:$true] %s241_s29 }
  0x93   :  { %s6259_s11 = scalar_lea.hbm %s6790_s27, 4096 }
  0x94   :  { %p6260_p12 = scmp.ne.s32.totalorder %s6790_s27, %s6259_s11  ;;  %p6263_p13 = scmp.lt.u32.totalorder %s6259_s11, %s6790_s27 }
  0x96   :  { %p6265_p0 = pnand %p6263_p13, %p6260_p12 }
  0x98   :  { %6268 = shalt.err (!%p6265_p0)
}
  0x99   :  { %s6269_s8 = scalar_lea.vmem %s220_s7, 4096  ;;  %p6274_p2 = scmp.lt.s32.totalorder %s220_s7, %s220_s7 }
  0x9a   :  { %p6270_p1 = scmp.ne.s32.totalorder %s220_s7, %s6269_s8  ;;  %p6275_p3 = scmp.lt.s32.totalorder %s6269_s8, %s6269_s8 }
  0x9c   :  { %p6276_p4 = por %p6275_p3, %p6274_p2 }
  0x9e   :  { %p6277_p5 = pnand %p6276_p4, %p6270_p1 }
  0xa0   :  { %6280 = shalt.err (!%p6277_p5)
}
  0xa1   :  { %225 = dma.hbm_to_vmem [thread:$0]  %s6790_s27, 4096, %s220_s7, [#allocation24], %s6674_s15, %s6674_s15, %s6675_s16  }
  0xa2   :  { %s6281_s12 = scalar_lea.hbm %s6800_s13, 4096 }
  0xa3   :  { %p6282_p6 = scmp.ne.s32.totalorder %s6800_s13, %s6281_s12  ;;  %p6285_p7 = scmp.lt.u32.totalorder %s6281_s12, %s6800_s13 }
  0xa5   :  { %p6287_p8 = pnand %p6285_p7, %p6282_p6 }
  0xa7   :  { %6290 = shalt.err (!%p6287_p8)
}
  0xa8   :  { %s6291_s18 = scalar_lea.vmem %s242_s29, 4096  ;;  %p6296_p10 = scmp.lt.s32.totalorder %s242_s29, %s242_s29 }
  0xa9   :  { %p6292_p9 = scmp.ne.s32.totalorder %s242_s29, %s6291_s18  ;;  %p6297_p11 = scmp.lt.s32.totalorder %s6291_s18, %s6291_s18 }
  0xab   :  { %p6298_p12 = por %p6297_p11, %p6296_p10 }
  0xad   :  { %p6299_p13 = pnand %p6298_p12, %p6292_p9 }
  0xaf   :  { %6302 = shalt.err (!%p6299_p13)
}
  0xb0   :  { %247 = dma.hbm_to_vmem [thread:$0]  %s6800_s13, 4096, %s242_s29, [#allocation27], %s6670_s22, %s6670_s22, %s6671_s23  }
  0xb1   :  { %s6680_s27 = smov [#allocation29]   ;;  %s6681_s0 = smov [#allocation32]  }
  0xb2   :  { %s263_s16 = sshll.u32 %s6680_s27, 4  ;;  %s285_s26 = sshll.u32 %s6681_s0, 4  ;;  %s264_s16 = int_to_ptr.vmem [resolvable:$true] %s263_s16  ;;  %s286_s26 = int_to_ptr.vmem [resolvable:$true] %s285_s26 }
  0xb3   :  { %s6303_s28 = scalar_lea.hbm %s6810_s17, 4096 }
  0xb4   :  { %p6304_p0 = scmp.ne.s32.totalorder %s6810_s17, %s6303_s28  ;;  %p6307_p1 = scmp.lt.u32.totalorder %s6303_s28, %s6810_s17 }
  0xb6   :  { %p6309_p2 = pnand %p6307_p1, %p6304_p0 }
  0xb8   :  { %6312 = shalt.err (!%p6309_p2)
}
  0xb9   :  { %s6313_s1 = scalar_lea.vmem %s264_s16, 4096  ;;  %p6318_p4 = scmp.lt.s32.totalorder %s264_s16, %s264_s16 }
  0xba   :  { %p6314_p3 = scmp.ne.s32.totalorder %s264_s16, %s6313_s1  ;;  %p6319_p5 = scmp.lt.s32.totalorder %s6313_s1, %s6313_s1 }
  0xbc   :  { %p6320_p6 = por %p6319_p5, %p6318_p4 }
  0xbe   :  { %p6321_p7 = pnand %p6320_p6, %p6314_p3 }
  0xc0   :  { %6324 = shalt.err (!%p6321_p7)
}
  0xc1   :  { %269 = dma.hbm_to_vmem [thread:$0]  %s6810_s17, 4096, %s264_s16, [#allocation30], %s6670_s22, %s6670_s22, %s6671_s23  }
  0xc2   :  { %s6325_s13 = scalar_lea.hbm %s6820_s21, 2048 }
  0xc3   :  { %p6326_p8 = scmp.ne.s32.totalorder %s6820_s21, %s6325_s13  ;;  %p6329_p9 = scmp.lt.u32.totalorder %s6325_s13, %s6820_s21 }
  0xc5   :  { %p6331_p10 = pnand %p6329_p9, %p6326_p8 }
  0xc7   :  { %6334 = shalt.err (!%p6331_p10)
}
  0xc8   :  { %s6335_s19 = scalar_lea.vmem %s286_s26, 2048  ;;  %p6340_p12 = scmp.lt.s32.totalorder %s286_s26, %s286_s26 }
  0xc9   :  { %p6336_p11 = scmp.ne.s32.totalorder %s286_s26, %s6335_s19  ;;  %p6341_p13 = scmp.lt.s32.totalorder %s6335_s19, %s6335_s19 }
  0xcb   :  { %p6342_p0 = por %p6341_p13, %p6340_p12 }
  0xcd   :  { %p6343_p1 = pnand %p6342_p0, %p6336_p11 }
  0xcf   :  { %6346 = shalt.err (!%p6343_p1)
}
  0xd0   :  { %s6682_s2 = smov 64   ;;  %s6683_s30 = smov 4  }
  0xd1   :  { %291 = dma.hbm_to_vmem [thread:$0]  %s6820_s21, 2048, %s286_s26, [#allocation33], %s6682_s2, %s6682_s2, %s6683_s30  }
  0xd2   :  { %s6684_s17 = smov [#allocation35]   ;;  %s6685_s7 = smov [#allocation6]  }
  0xd3   :  { %s307_s23 = sshll.u32 %s6684_s17, 4  ;;  %s100_s10 = sshll.u32 %s6685_s7, 4  ;;  %s308_s23 = int_to_ptr.vmem [resolvable:$true] %s307_s23  ;;  %s101_s10 = int_to_ptr.vmem [resolvable:$true] %s100_s10 }
  0xd4   :  { %s6347_s29 = scalar_lea.hbm %s6830_s4, 1024 }
  0xd5   :  { %p6348_p2 = scmp.ne.s32.totalorder %s6830_s4, %s6347_s29  ;;  %p6351_p3 = scmp.lt.u32.totalorder %s6347_s29, %s6830_s4 }
  0xd7   :  { %p6353_p4 = pnand %p6351_p3, %p6348_p2 }
  0xd9   :  { %6356 = shalt.err (!%p6353_p4)
}
  0xda   :  { %s6357_s11 = scalar_lea.vmem %s308_s23, 1024  ;;  %p6362_p6 = scmp.lt.s32.totalorder %s308_s23, %s308_s23 }
  0xdb   :  { %p6358_p5 = scmp.ne.s32.totalorder %s308_s23, %s6357_s11  ;;  %p6363_p7 = scmp.lt.s32.totalorder %s6357_s11, %s6357_s11 }
  0xdd   :  { %p6364_p8 = por %p6363_p7, %p6362_p6 }
  0xdf   :  { %p6365_p9 = pnand %p6364_p8, %p6358_p5 }
  0xe1   :  { %6368 = shalt.err (!%p6365_p9)
}
  0xe2   :  { %313 = dma.hbm_to_vmem [thread:$0]  %s6830_s4, 1024, %s308_s23, [#allocation36], %s6682_s2, %s6682_s2, %s6683_s30  }
  0xe3   :  { %s6369_s21 = scalar_lea.hbm %s6735_s25, 64 }
  0xe4   :  { %p6370_p10 = scmp.ne.s32.totalorder %s6735_s25, %s6369_s21  ;;  %p6373_p11 = scmp.lt.u32.totalorder %s6369_s21, %s6735_s25 }
  0xe6   :  { %p6375_p12 = pnand %p6373_p11, %p6370_p10 }
  0xe8   :  { %6378 = shalt.err (!%p6375_p12)
}
  0xe9   :  { %s6379_s8 = scalar_lea.vmem %s101_s10, 64  ;;  %p6384_p0 = scmp.lt.s32.totalorder %s101_s10, %s101_s10 }
  0xea   :  { %p6380_p13 = scmp.ne.s32.totalorder %s101_s10, %s6379_s8  ;;  %p6385_p1 = scmp.lt.s32.totalorder %s6379_s8, %s6379_s8 }
  0xec   :  { %p6386_p2 = por %p6385_p1, %p6384_p0 }
  0xee   :  { %p6387_p3 = pnand %p6386_p2, %p6380_p13 }
  0xf0   :  { %6390 = shalt.err (!%p6387_p3)
}
  0xf1   :  { %103 = dma.hbm_to_vmem [thread:$0]  %s6735_s25, 64, %s101_s10, [#allocation7]  }
  0xf2   :  { %s6686_s12 = smov [#allocation10]   ;;  %s6687_s18 = smov [#allocation13]  }
  0xf3   :  { %s122_s4 = sshll.u32 %s6686_s12, 4  ;;  %s144_s27 = sshll.u32 %s6687_s18, 4  ;;  %s123_s4 = int_to_ptr.vmem [resolvable:$true] %s122_s4  ;;  %s145_s27 = int_to_ptr.vmem [resolvable:$true] %s144_s27 }
  0xf4   :  { %s6391_s16 = scalar_lea.hbm %s6745_s3, 32 }
  0xf5   :  { %p6392_p4 = scmp.ne.s32.totalorder %s6745_s3, %s6391_s16  ;;  %p6395_p5 = scmp.lt.u32.totalorder %s6391_s16, %s6745_s3 }
  0xf7   :  { %p6397_p6 = pnand %p6395_p5, %p6392_p4 }
  0xf9   :  { %6400 = shalt.err (!%p6397_p6)
}
  0xfa   :  { %s6401_s0 = scalar_lea.vmem %s123_s4, 32  ;;  %p6406_p8 = scmp.lt.s32.totalorder %s123_s4, %s123_s4 }
  0xfb   :  { %p6402_p7 = scmp.ne.s32.totalorder %s123_s4, %s6401_s0  ;;  %p6407_p9 = scmp.lt.s32.totalorder %s6401_s0, %s6401_s0 }
  0xfd   :  { %p6408_p10 = por %p6407_p9, %p6406_p8 }
  0xff   :  { %p6409_p11 = pnand %p6408_p10, %p6402_p7 }
 0x101   :  { %6412 = shalt.err (!%p6409_p11)
}
 0x102   :  { %125 = dma.hbm_to_vmem [thread:$0]  %s6745_s3, 32, %s123_s4, [#allocation9]  }
 0x103   :  { %s6413_s25 = scalar_lea.hbm %s6755_s14, 32 }
 0x104   :  { %p6414_p12 = scmp.ne.s32.totalorder %s6755_s14, %s6413_s25  ;;  %p6417_p13 = scmp.lt.u32.totalorder %s6413_s25, %s6755_s14 }
 0x106   :  { %p6419_p0 = pnand %p6417_p13, %p6414_p12 }
 0x108   :  { %6422 = shalt.err (!%p6419_p0)
}
 0x109   :  { %s6423_s26 = scalar_lea.vmem %s145_s27, 32  ;;  %p6428_p2 = scmp.lt.s32.totalorder %s145_s27, %s145_s27 }
 0x10a   :  { %p6424_p1 = scmp.ne.s32.totalorder %s145_s27, %s6423_s26  ;;  %p6429_p3 = scmp.lt.s32.totalorder %s6423_s26, %s6423_s26 }
 0x10c   :  { %p6430_p4 = por %p6429_p3, %p6428_p2 }
 0x10e   :  { %p6431_p5 = pnand %p6430_p4, %p6424_p1 }
 0x110   :  { %6434 = shalt.err (!%p6431_p5)
}
 0x111   :  { %147 = dma.hbm_to_vmem [thread:$0]  %s6755_s14, 32, %s145_s27, [#allocation12]  }
 0x112   :  { %s6688_s28 = smov [#allocation16]   ;;  %s6689_s1 = smov [#allocation19]  }
 0x113   :  { %s166_s3 = sshll.u32 %s6688_s28, 4  ;;  %s188_s13 = sshll.u32 %s6689_s1, 4  ;;  %s167_s3 = int_to_ptr.vmem [resolvable:$true] %s166_s3  ;;  %s189_s13 = int_to_ptr.vmem [resolvable:$true] %s188_s13 }
 0x114   :  { %s6435_s19 = scalar_lea.hbm %s6765_s24, 64 }
 0x115   :  { %p6436_p6 = scmp.ne.s32.totalorder %s6765_s24, %s6435_s19  ;;  %p6439_p7 = scmp.lt.u32.totalorder %s6435_s19, %s6765_s24 }
 0x117   :  { %p6441_p8 = pnand %p6439_p7, %p6436_p6 }
 0x119   :  { %6444 = shalt.err (!%p6441_p8)
}
 0x11a   :  { %s6445_s17 = scalar_lea.vmem %s167_s3, 64  ;;  %p6450_p10 = scmp.lt.s32.totalorder %s167_s3, %s167_s3 }
 0x11b   :  { %p6446_p9 = scmp.ne.s32.totalorder %s167_s3, %s6445_s17  ;;  %p6451_p11 = scmp.lt.s32.totalorder %s6445_s17, %s6445_s17 }
 0x11d   :  { %p6452_p12 = por %p6451_p11, %p6450_p10 }
 0x11f   :  { %p6453_p13 = pnand %p6452_p12, %p6446_p9 }
 0x121   :  { %6456 = shalt.err (!%p6453_p13)
}
 0x122   :  { %s7178_s23 = sld [smem:[#allocation57_spill]] }
 0x123   :  { %169 = dma.hbm_to_vmem [thread:$0]  %s6765_s24, 64, %s167_s3, [#allocation15]  }
 0x128   :  { %s6457_s14 = scalar_lea.hbm %s7178_s23, 32 }
 0x129   :  { %p6458_p0 = scmp.ne.s32.totalorder %s7178_s23, %s6457_s14  ;;  %p6461_p1 = scmp.lt.u32.totalorder %s6457_s14, %s7178_s23 }
 0x12b   :  { %p6463_p2 = pnand %p6461_p1, %p6458_p0 }
 0x12d   :  { %6466 = shalt.err (!%p6463_p2)
}
 0x12e   :  { %s6467_s7 = scalar_lea.vmem %s189_s13, 32  ;;  %p6472_p4 = scmp.lt.s32.totalorder %s189_s13, %s189_s13 }
 0x12f   :  { %p6468_p3 = scmp.ne.s32.totalorder %s189_s13, %s6467_s7  ;;  %p6473_p5 = scmp.lt.s32.totalorder %s6467_s7, %s6467_s7 }
 0x131   :  { %p6474_p6 = por %p6473_p5, %p6472_p4 }
 0x133   :  { %p6475_p7 = pnand %p6474_p6, %p6468_p3 }
 0x135   :  { %6478 = shalt.err (!%p6475_p7)
}
 0x136   :  { %s7179_s10 = sld [smem:[#allocation58_spill]]  ;;  %s6690_s29 = smov [#allocation22]  }
 0x137   :  { %191 = dma.hbm_to_vmem [thread:$0]  %s7178_s23, 32, %s189_s13, [#allocation18]  }
 0x138   :  { %s210_s24 = sshll.u32 %s6690_s29, 4  ;;  %s6691_s11 = smov [#allocation25]   ;;  %s211_s24 = int_to_ptr.vmem [resolvable:$true] %s210_s24 }
 0x139   :  { %s232_s21 = sshll.u32 %s6691_s11, 4  ;;  %s233_s21 = int_to_ptr.vmem [resolvable:$true] %s232_s21 }
 0x13c   :  { %s6479_s8 = scalar_lea.hbm %s7179_s10, 32 }
 0x13d   :  { %p6480_p8 = scmp.ne.s32.totalorder %s7179_s10, %s6479_s8  ;;  %p6483_p9 = scmp.lt.u32.totalorder %s6479_s8, %s7179_s10 }
 0x13f   :  { %p6485_p10 = pnand %p6483_p9, %p6480_p8 }
 0x141   :  { %6488 = shalt.err (!%p6485_p10)
}
 0x142   :  { %s6489_s12 = scalar_lea.vmem %s211_s24, 32  ;;  %p6494_p12 = scmp.lt.s32.totalorder %s211_s24, %s211_s24 }
 0x143   :  { %p6490_p11 = scmp.ne.s32.totalorder %s211_s24, %s6489_s12  ;;  %p6495_p13 = scmp.lt.s32.totalorder %s6489_s12, %s6489_s12 }
 0x145   :  { %p6496_p0 = por %p6495_p13, %p6494_p12 }
 0x147   :  { %p6497_p1 = pnand %p6496_p0, %p6490_p11 }
 0x149   :  { %6500 = shalt.err (!%p6497_p1)
}
 0x14a   :  { %s7180_s4 = sld [smem:[#allocation59_spill]] }
 0x14b   :  { %213 = dma.hbm_to_vmem [thread:$0]  %s7179_s10, 32, %s211_s24, [#allocation21]  }
 0x150   :  { %s6501_s18 = scalar_lea.hbm %s7180_s4, 64 }
 0x151   :  { %p6502_p2 = scmp.ne.s32.totalorder %s7180_s4, %s6501_s18  ;;  %p6505_p3 = scmp.lt.u32.totalorder %s6501_s18, %s7180_s4 }
 0x153   :  { %p6507_p4 = pnand %p6505_p3, %p6502_p2 }
 0x155   :  { %6510 = shalt.err (!%p6507_p4)
}
 0x156   :  { %s6511_s27 = scalar_lea.vmem %s233_s21, 64  ;;  %p6516_p6 = scmp.lt.s32.totalorder %s233_s21, %s233_s21 }
 0x157   :  { %p6512_p5 = scmp.ne.s32.totalorder %s233_s21, %s6511_s27  ;;  %p6517_p7 = scmp.lt.s32.totalorder %s6511_s27, %s6511_s27 }
 0x159   :  { %p6518_p8 = por %p6517_p7, %p6516_p6 }
 0x15b   :  { %p6519_p9 = pnand %p6518_p8, %p6512_p5 }
 0x15d   :  { %6522 = shalt.err (!%p6519_p9)
}
 0x15e   :  { %s7181_s16 = sld [smem:[#allocation60_spill]]  ;;  %s6692_s0 = smov [#allocation28]  }
 0x15f   :  { %235 = dma.hbm_to_vmem [thread:$0]  %s7180_s4, 64, %s233_s21, [#allocation24]  }
 0x160   :  { %s254_s25 = sshll.u32 %s6692_s0, 4  ;;  %s6693_s26 = smov [#allocation31]   ;;  %s255_s25 = int_to_ptr.vmem [resolvable:$true] %s254_s25 }
 0x161   :  { %s276_s28 = sshll.u32 %s6693_s26, 4  ;;  %s277_s28 = int_to_ptr.vmem [resolvable:$true] %s276_s28 }
 0x164   :  { %s6523_s3 = scalar_lea.hbm %s7181_s16, 32 }
 0x165   :  { %p6524_p10 = scmp.ne.s32.totalorder %s7181_s16, %s6523_s3  ;;  %p6527_p11 = scmp.lt.u32.totalorder %s6523_s3, %s7181_s16 }
 0x167   :  { %p6529_p12 = pnand %p6527_p11, %p6524_p10 }
 0x169   :  { %6532 = shalt.err (!%p6529_p12)
}
 0x16a   :  { %s6533_s1 = scalar_lea.vmem %s255_s25, 32  ;;  %p6538_p0 = scmp.lt.s32.totalorder %s255_s25, %s255_s25 }
 0x16b   :  { %p6534_p13 = scmp.ne.s32.totalorder %s255_s25, %s6533_s1  ;;  %p6539_p1 = scmp.lt.s32.totalorder %s6533_s1, %s6533_s1 }
 0x16d   :  { %p6540_p2 = por %p6539_p1, %p6538_p0 }
 0x16f   :  { %p6541_p3 = pnand %p6540_p2, %p6534_p13 }
 0x171   :  { %6544 = shalt.err (!%p6541_p3)
}
 0x172   :  { %s7182_s13 = sld [smem:[#allocation61_spill]] }
 0x173   :  { %257 = dma.hbm_to_vmem [thread:$0]  %s7181_s16, 32, %s255_s25, [#allocation27]  }
 0x178   :  { %s6545_s19 = scalar_lea.hbm %s7182_s13, 32 }
 0x179   :  { %p6546_p4 = scmp.ne.s32.totalorder %s7182_s13, %s6545_s19  ;;  %p6549_p5 = scmp.lt.u32.totalorder %s6545_s19, %s7182_s13 }
 0x17b   :  { %p6551_p6 = pnand %p6549_p5, %p6546_p4 }
 0x17d   :  { %6554 = shalt.err (!%p6551_p6)
}
 0x17e   :  { %s6555_s17 = scalar_lea.vmem %s277_s28, 32  ;;  %p6560_p8 = scmp.lt.s32.totalorder %s277_s28, %s277_s28 }
 0x17f   :  { %p6556_p7 = scmp.ne.s32.totalorder %s277_s28, %s6555_s17  ;;  %p6561_p9 = scmp.lt.s32.totalorder %s6555_s17, %s6555_s17 }
 0x181   :  { %p6562_p10 = por %p6561_p9, %p6560_p8 }
 0x183   :  { %p6563_p11 = pnand %p6562_p10, %p6556_p7 }
 0x185   :  { %6566 = shalt.err (!%p6563_p11)
}
 0x186   :  { %s7183_s23 = sld [smem:[#allocation62_spill]]  ;;  %s6694_s14 = smov [#allocation34]  }
 0x187   :  { %279 = dma.hbm_to_vmem [thread:$0]  %s7182_s13, 32, %s277_s28, [#allocation30]  }
 0x188   :  { %s298_s7 = sshll.u32 %s6694_s14, 4  ;;  %s6695_s10 = smov [#allocation37]   ;;  %s299_s7 = int_to_ptr.vmem [resolvable:$true] %s298_s7 }
 0x189   :  { %s320_s29 = sshll.u32 %s6695_s10, 4  ;;  %s321_s29 = int_to_ptr.vmem [resolvable:$true] %s320_s29 }
 0x18c   :  { %s6567_s24 = scalar_lea.hbm %s7183_s23, 16 }
 0x18d   :  { %p6568_p12 = scmp.ne.s32.totalorder %s7183_s23, %s6567_s24  ;;  %p6571_p13 = scmp.lt.u32.totalorder %s6567_s24, %s7183_s23 }
 0x18f   :  { %p6573_p0 = pnand %p6571_p13, %p6568_p12 }
 0x191   :  { %6576 = shalt.err (!%p6573_p0)
}
 0x192   :  { %s6577_s11 = scalar_lea.vmem %s299_s7, 16  ;;  %s6581_s21 = scalar_lea.vmem %s299_s7, 32 }
 0x193   :  { %p6578_p1 = scmp.ne.s32.totalorder %s299_s7, %s6577_s11  ;;  %p6582_p2 = scmp.lt.s32.totalorder %s299_s7, %s299_s7 }
 0x194   :  { %p6583_p3 = scmp.lt.s32.totalorder %s6581_s21, %s6577_s11 }
 0x196   :  { %p6584_p4 = por %p6583_p3, %p6582_p2 }
 0x198   :  { %p6585_p5 = pnand %p6584_p4, %p6578_p1 }
 0x19a   :  { %6588 = shalt.err (!%p6585_p5)
}
 0x19b   :  { %s7184_s8 = sld [smem:[#allocation63_spill]] }
 0x19c   :  { %301 = dma.hbm_to_vmem [thread:$0]  %s7183_s23, 16, %s299_s7, [#allocation33]  }
 0x1a1   :  { %s6589_s12 = scalar_lea.hbm %s7184_s8, 16 }
 0x1a2   :  { %p6590_p6 = scmp.ne.s32.totalorder %s7184_s8, %s6589_s12  ;;  %p6593_p7 = scmp.lt.u32.totalorder %s6589_s12, %s7184_s8 }
 0x1a4   :  { %p6595_p8 = pnand %p6593_p7, %p6590_p6 }
 0x1a6   :  { %6598 = shalt.err (!%p6595_p8)
}
 0x1a7   :  { %s6599_s4 = scalar_lea.vmem %s321_s29, 16  ;;  %s6603_s18 = scalar_lea.vmem %s321_s29, 32 }
 0x1a8   :  { %p6600_p9 = scmp.ne.s32.totalorder %s321_s29, %s6599_s4  ;;  %p6604_p10 = scmp.lt.s32.totalorder %s321_s29, %s321_s29 }
 0x1a9   :  { %p6605_p11 = scmp.lt.s32.totalorder %s6603_s18, %s6599_s4 }
 0x1ab   :  { %p6606_p12 = por %p6605_p11, %p6604_p10 }
 0x1ad   :  { %p6607_p13 = pnand %p6606_p12, %p6600_p9 }
 0x1af   :  { %6610 = shalt.err (!%p6607_p13)
}
 0x1b0   :  { %323 = dma.hbm_to_vmem [thread:$0]  %s7184_s8, 16, %s321_s29, [#allocation36]  }
 0x1b1   :  { %6611 = dma.done.wait [#allocation7], 64  }
 0x1b2   :  { %6612 = vsyncadd [#allocation7], 4294967232 }
 0x1b3   :  { %6613 = dma.done.wait [#allocation9], 8224  }
 0x1b4   :  { %6614 = vsyncadd [#allocation9], 4294959072 }
 0x1b5   :  { %6615 = dma.done.wait [#allocation12], 4128  }
 0x1b6   :  { %6616 = vsyncadd [#allocation12], 4294963168 }
 0x1b7   :  { %6617 = dma.done.wait [#allocation15], 8256  }
 0x1b8   :  { %6618 = vsyncadd [#allocation15], 4294959040 }
 0x1b9   :  { %6619 = dma.done.wait [#allocation18], 8224  }
 0x1ba   :  { %6620 = vsyncadd [#allocation18], 4294959072 }
 0x1bb   :  { %6621 = dma.done.wait [#allocation21], 4128  }
 0x1bc   :  { %6622 = vsyncadd [#allocation21], 4294963168 }
 0x1bd   :  { %6623 = dma.done.wait [#allocation24], 4160  }
 0x1be   :  { %6624 = vsyncadd [#allocation24], 4294963136 }
 0x1bf   :  { %6625 = dma.done.wait [#allocation27], 4128  }
 0x1c0   :  { %6626 = vsyncadd [#allocation27], 4294963168 }
 0x1c1   :  { %6627 = dma.done.wait [#allocation30], 4128  }
 0x1c2   :  { %6628 = vsyncadd [#allocation30], 4294963168 }
 0x1c3   :  { %6629 = dma.done.wait [#allocation33], 2064  }
 0x1c4   :  { %6630 = vsyncadd [#allocation33], 4294965232 }
 0x1c5   :  { %6631 = dma.done.wait [#allocation36], 1040  }
 0x1c6   :  { %6632 = vsyncadd [#allocation36], 4294966256  ;;  %s392_s27 = sld [smem:[#allocation0]]   ;;  %s6696_s16 = smov 512  }
 0x1c7   :  { %404 = sst [smem:[#allocation39]] %s6696_s16  ;;  %s7185_s0 = sld [smem:[#allocation56_spill]] }
 0x1c8   :  { %406 = sst [smem:[#allocation39 + $0x1]] %s6696_s16  ;;  %s6697_s25 = smov [#allocation2]  }
 0x1c9   :  { %408 = sst [smem:[#allocation39 + $0x2]] %s6683_s30  ;;  %s400_s26 = sshll.u32 %s6697_s25, 4  ;;  %s401_s26 = int_to_ptr.vmem [resolvable:$true] %s400_s26 }
 0x1ca   :  { %410 = sst [smem:[#allocation39 + $0x3]] %s6682_s2  ;;  %s6698_s28 = smov 2  }
 0x1cb   :  { %412 = sst [smem:[#allocation39 + $0x4]] %s6670_s22  ;;  %s6699_s13 = smov [#allocation3]  }
 0x1cc   :  { %414 = sst [smem:[#allocation39 + $0x5]] %s6698_s28  ;;  %s4904_s3 = sshll.u32 %s392_s27, 26 }
 0x1cd   :  { %416 = sst [smem:[#allocation39 + $0x6]] %s6674_s15  ;;  %s4905_s1 = sadd.s32 134217728, %s4904_s3 }
 0x1ce   :  { %418 = sst [smem:[#allocation39 + $0x7]] %s6682_s2  ;;  %s6700_s19 = smov [#allocation38]  }
 0x1cf   :  { %420 = sst [smem:[#allocation39 + $0x8]] %s6683_s30 }
 0x1d0   :  { %422 = dma.general %s7185_s0, 49152, %s401_s26, %s6699_s13, %s6700_s19, [#allocation39], %s4905_s1, 0  }
 0x1d1   :  { %v5488_v0 = vld [vmem:[#allocation14 + $0x4] ss:$16 sps:$4 sm:$0xff]   ;;  %v5490_v1 = vld [vmem:[#allocation14] ss:$16 sps:$4 sm:$0xff]   ;;  %s7186_s22 = sld [smem:[#allocation53_spill]]  ;;  %s7187_s15 = sld [smem:[#allocation67_spill]] }
 0x1d2   :  { %841 = vmatprep.subr.bf16.mxu0 %v5488_v0  ;;  %v5491_v2 = vld [vmem:[#allocation14 + $0x24] ss:$16 sps:$4 sm:$0xff]   ;;  %v5493_v3 = vld [vmem:[#allocation14 + $0x20] ss:$16 sps:$4 sm:$0xff]   ;;  %v5533_v13 = vld [vmem:[#allocation14 + $0xc] ss:$16 sps:$4 sm:$0xff]  }
 0x1d3   :  { %842 = vmatpush1.bf16.msra.mxu0 %v5490_v1  ;;  %v5494_v4 = vld [vmem:[#allocation14 + $0x44] ss:$16 sps:$4 sm:$0xff]   ;;  %v5496_v5 = vld [vmem:[#allocation14 + $0x40] ss:$16 sps:$4 sm:$0xff]   ;;  %v5535_v14 = vld [vmem:[#allocation14 + $0x8] ss:$16 sps:$4 sm:$0xff]   ;;  %884 = vmatprep.subr.bf16.mxu1 %v5533_v13 }
 0x1d4   :  { %843 = vmatprep.subr.bf16.mxu0 %v5491_v2  ;;  %v5497_v6 = vld [vmem:[#allocation14 + $0x64] ss:$16 sps:$4 sm:$0xff]   ;;  %v5499_v7 = vld [vmem:[#allocation14 + $0x60] ss:$16 sps:$4 sm:$0xff]   ;;  %885 = vmatpush1.bf16.msra.mxu1 %v5535_v14  ;;  %v5539_v16 = vld [vmem:[#allocation14 + $0x2c] ss:$16 sps:$4 sm:$0xff]  }
 0x1d5   :  { %v5500_v8 = vld [vmem:[#allocation14 + $0x84] ss:$16 sps:$4 sm:$0xff]   ;;  %v5502_v9 = vld [vmem:[#allocation14 + $0x80] ss:$16 sps:$4 sm:$0xff]   ;;  %886 = vmatprep.subr.bf16.mxu1 %v5539_v16  ;;  %v5544_v19 = vld [vmem:[#allocation14 + $0x28] ss:$16 sps:$4 sm:$0xff]  }
 0x1d6   :  { %v5503_v10 = vld [vmem:[#allocation14 + $0xa4] ss:$16 sps:$4 sm:$0xff]   ;;  %v5505_v11 = vld [vmem:[#allocation14 + $0xa0] ss:$16 sps:$4 sm:$0xff]   ;;  %v5545_v21 = vld [vmem:[#allocation14 + $0x4c] ss:$16 sps:$4 sm:$0xff]  }
 0x1d7   :  { %844 = vmatpush1.bf16.msra.mxu0 %v5493_v3  ;;  %v5506_v12 = vld [vmem:[#allocation14 + $0xc4] ss:$16 sps:$4 sm:$0xff]   ;;  %v5508_v15 = vld [vmem:[#allocation14 + $0xc0] ss:$16 sps:$4 sm:$0xff]   ;;  %v5547_v23 = vld [vmem:[#allocation14 + $0x48] ss:$16 sps:$4 sm:$0xff]  }
 0x1d8   :  { %845 = vmatprep.subr.bf16.mxu0 %v5494_v4  ;;  %v5509_v17 = vld [vmem:[#allocation14 + $0xe4] ss:$16 sps:$4 sm:$0xff]   ;;  %v5511_v20 = vld [vmem:[#allocation14 + $0xe0] ss:$16 sps:$4 sm:$0xff]   ;;  %887 = vmatpush1.bf16.msra.mxu1 %v5544_v19  ;;  %v5548_v24 = vld [vmem:[#allocation14 + $0x6c] ss:$16 sps:$4 sm:$0xff]  }
 0x1d9   :  { %v5543_v18 = vld [vmem:[%s7186_s22 + $0x4] ss:$8 sps:$4 sm:$0xff]   ;;  %888 = vmatprep.subr.bf16.mxu1 %v5545_v21  ;;  %v5514_v25 = vld [vmem:[#allocation14 + $0x100] ss:$16 sps:$4 sm:$0xff]   ;;  %v5550_v27 = vld [vmem:[#allocation14 + $0x68] ss:$16 sps:$4 sm:$0xff]  }
 0x1da   :  { %873 = vmatprep.mubr.bf16.mxu0 %v5543_v18  ;;  %916 = vmatprep.mubr.bf16.mxu1 %v5543_v18  ;;  %v5512_v22 = vld [vmem:[#allocation14 + $0x104] ss:$16 sps:$4 sm:$0xff]   ;;  %v5551_v28 = vld [vmem:[#allocation14 + $0x8c] ss:$16 sps:$4 sm:$0xff]   ;;  %v5517_v29 = vld [vmem:[#allocation14 + $0x120] ss:$16 sps:$4 sm:$0xff]  }
 0x1db   :  { %846 = vmatpush1.bf16.msra.mxu0 %v5496_v5  ;;  %v5515_v26 = vld [vmem:[#allocation14 + $0x124] ss:$16 sps:$4 sm:$0xff]   ;;  %v5553_v31 = vld [vmem:[#allocation14 + $0x88] ss:$16 sps:$4 sm:$0xff]   ;;  %v5554_v32 = vld [vmem:[#allocation14 + $0xac] ss:$16 sps:$4 sm:$0xff]  }
 0x1dc   :  { %847 = vmatprep.subr.bf16.mxu0 %v5497_v6  ;;  %889 = vmatpush1.bf16.msra.mxu1 %v5547_v23  ;;  %v5518_v30 = vld [vmem:[#allocation14 + $0x144] ss:$16 sps:$4 sm:$0xff]   ;;  %v5520_v33 = vld [vmem:[#allocation14 + $0x140] ss:$16 sps:$4 sm:$0xff]   ;;  %v5556_v35 = vld [vmem:[#allocation14 + $0xa8] ss:$16 sps:$4 sm:$0xff]  }
 0x1dd   :  { %890 = vmatprep.subr.bf16.mxu1 %v5548_v24  ;;  %v5521_v34 = vld [vmem:[#allocation14 + $0x164] ss:$16 sps:$4 sm:$0xff]   ;;  %v5557_v36 = vld [vmem:[#allocation14 + $0xcc] ss:$16 sps:$4 sm:$0xff]   ;;  %v5523_v37 = vld [vmem:[#allocation14 + $0x160] ss:$16 sps:$4 sm:$0xff]  }
 0x1de   :  { %v5524_v38 = vld [vmem:[#allocation14 + $0x184] ss:$16 sps:$4 sm:$0xff]   ;;  %v5559_v39 = vld [vmem:[#allocation14 + $0xc8] ss:$16 sps:$4 sm:$0xff]   ;;  %v5560_v40 = vld [vmem:[#allocation14 + $0xec] ss:$16 sps:$4 sm:$0xff]  }
 0x1df   :  { %848 = vmatpush1.bf16.msra.mxu0 %v5499_v7  ;;  %v5526_v41 = vld [vmem:[#allocation14 + $0x180] ss:$16 sps:$4 sm:$0xff]   ;;  %v5527_v42 = vld [vmem:[#allocation14 + $0x1a4] ss:$16 sps:$4 sm:$0xff]   ;;  %v5562_v43 = vld [vmem:[#allocation14 + $0xe8] ss:$16 sps:$4 sm:$0xff]  }
 0x1e0   :  { %849 = vmatprep.subr.bf16.mxu0 %v5500_v8  ;;  %891 = vmatpush1.bf16.msra.mxu1 %v5550_v27  ;;  %v5563_v44 = vld [vmem:[#allocation14 + $0x10c] ss:$16 sps:$4 sm:$0xff]   ;;  %v5529_v45 = vld [vmem:[#allocation14 + $0x1a0] ss:$16 sps:$4 sm:$0xff]   ;;  %v5530_v46 = vld [vmem:[#allocation14 + $0x1c4] ss:$16 sps:$4 sm:$0xff]  }
 0x1e1   :  { %892 = vmatprep.subr.bf16.mxu1 %v5551_v28  ;;  %v5565_v47 = vld [vmem:[#allocation14 + $0x108] ss:$16 sps:$4 sm:$0xff]   ;;  %v5566_v48 = vld [vmem:[#allocation14 + $0x12c] ss:$16 sps:$4 sm:$0xff]   ;;  %v5532_v49 = vld [vmem:[#allocation14 + $0x1c0] ss:$16 sps:$4 sm:$0xff]  }
 0x1e2   :  { %v5536_v50 = vld [vmem:[#allocation14 + $0x1e4] ss:$16 sps:$4 sm:$0xff]   ;;  %v5568_v51 = vld [vmem:[#allocation14 + $0x128] ss:$16 sps:$4 sm:$0xff]   ;;  %v5569_v52 = vld [vmem:[#allocation14 + $0x14c] ss:$16 sps:$4 sm:$0xff]  }
 0x1e3   :  { %850 = vmatpush1.bf16.msra.mxu0 %v5502_v9  ;;  %v5538_v53 = vld [vmem:[#allocation14 + $0x1e0] ss:$16 sps:$4 sm:$0xff]   ;;  %v5571_v54 = vld [vmem:[#allocation14 + $0x148] ss:$16 sps:$4 sm:$0xff]   ;;  %v5572_v55 = vld [vmem:[#allocation14 + $0x16c] ss:$16 sps:$4 sm:$0xff]  }
 0x1e4   :  { %851 = vmatprep.subr.bf16.mxu0 %v5503_v10  ;;  %893 = vmatpush1.bf16.msra.mxu1 %v5553_v31  ;;  %v5541_v56 = vld [vmem:[%s7186_s22] ss:$8 sps:$4 sm:$0xff]   ;;  %v5589_v57 = vld [vmem:[#allocation17 + $0x4] ss:$8 sps:$4 sm:$0xff]   ;;  %v5575_v59 = vld [vmem:[#allocation14 + $0x18c] ss:$16 sps:$4 sm:$0xff]  }
 0x1e5   :  { %894 = vmatprep.subr.bf16.mxu1 %v5554_v32  ;;  %v5574_v58 = vld [vmem:[#allocation14 + $0x168] ss:$16 sps:$4 sm:$0xff]   ;;  %v5587_v60 = vld [vmem:[#allocation17] ss:$8 sps:$4 sm:$0xff]   ;;  %v5590_v63 = vld [vmem:[#allocation17 + $0x10] ss:$8 sps:$4 sm:$0xff]  }
 0x1e6   :  { %v5592_v61 = vld [vmem:[#allocation17 + $0x14] ss:$8 sps:$4 sm:$0xff]   ;;  %v5578_v0 = vld [vmem:[#allocation14 + $0x1ac] ss:$16 sps:$4 sm:$0xff]   ;;  %v5595_v1 = vld [vmem:[#allocation17 + $0x24] ss:$8 sps:$4 sm:$0xff]  }
 0x1e7   :  { %852 = vmatpush1.bf16.msra.mxu0 %v5505_v11  ;;  %v5577_v62 = vld [vmem:[#allocation14 + $0x188] ss:$16 sps:$4 sm:$0xff]   ;;  %v5593_v3 = vld [vmem:[#allocation17 + $0x20] ss:$8 sps:$4 sm:$0xff]   ;;  %v5596_v7 = vld [vmem:[#allocation17 + $0x30] ss:$8 sps:$4 sm:$0xff]  }
 0x1e8   :  { %853 = vmatprep.subr.bf16.mxu0 %v5506_v12  ;;  %895 = vmatpush1.bf16.msra.mxu1 %v5556_v35  ;;  %v5580_v2 = vld [vmem:[#allocation14 + $0x1a8] ss:$16 sps:$4 sm:$0xff]   ;;  %v5581_v4 = vld [vmem:[#allocation14 + $0x1cc] ss:$16 sps:$4 sm:$0xff]   ;;  %s7188_s2 = sld [smem:[#allocation68_spill]]  ;;  %s7189_s30 = sld [smem:[#allocation55_spill]] }
 0x1e9   :  { %896 = vmatprep.subr.bf16.mxu1 %v5557_v36  ;;  %v5598_v5 = vld [vmem:[#allocation17 + $0x34] ss:$8 sps:$4 sm:$0xff]   ;;  %v5584_v8 = vld [vmem:[#allocation14 + $0x1ec] ss:$16 sps:$4 sm:$0xff]   ;;  %v5601_v9 = vld [vmem:[#allocation17 + $0x44] ss:$8 sps:$4 sm:$0xff]  }
 0x1ea   :  { %v5583_v6 = vld [vmem:[#allocation14 + $0x1c8] ss:$16 sps:$4 sm:$0xff]   ;;  %v5599_v11 = vld [vmem:[#allocation17 + $0x40] ss:$8 sps:$4 sm:$0xff]   ;;  %v5602_v13 = vld [vmem:[#allocation17 + $0x50] ss:$8 sps:$4 sm:$0xff]  }
 0x1eb   :  { %854 = vmatpush1.bf16.msra.mxu0 %v5508_v15  ;;  %v5586_v10 = vld [vmem:[#allocation14 + $0x1e8] ss:$16 sps:$4 sm:$0xff]   ;;  %v5605_v15 = vld [vmem:[#allocation17 + $0x60] ss:$8 sps:$4 sm:$0xff]   ;;  %v5614_v21 = vld [vmem:[#allocation17 + $0x90] ss:$8 sps:$4 sm:$0xff]  }
 0x1ec   :  { %855 = vmatprep.subr.bf16.mxu0 %v5509_v17  ;;  %897 = vmatpush1.bf16.msra.mxu1 %v5559_v39  ;;  %v5604_v12 = vld [vmem:[#allocation17 + $0x54] ss:$8 sps:$4 sm:$0xff]   ;;  %v5607_v14 = vld [vmem:[#allocation17 + $0x64] ss:$8 sps:$4 sm:$0xff]   ;;  %v5608_v17 = vld [vmem:[#allocation17 + $0x70] ss:$8 sps:$4 sm:$0xff]  }
 0x1ed   :  { %898 = vmatprep.subr.bf16.mxu1 %v5560_v40  ;;  %v5610_v16 = vld [vmem:[#allocation17 + $0x74] ss:$8 sps:$4 sm:$0xff]   ;;  %v5613_v18 = vld [vmem:[#allocation17 + $0x84] ss:$8 sps:$4 sm:$0xff]   ;;  %v5611_v19 = vld [vmem:[#allocation17 + $0x80] ss:$8 sps:$4 sm:$0xff]  }
 0x1ee   :  { %v5617_v23 = vld [vmem:[#allocation17 + $0xa0] ss:$8 sps:$4 sm:$0xff]   ;;  %v5622_v24 = vld [vmem:[#allocation17 + $0xb4] ss:$8 sps:$4 sm:$0xff]  }
 0x1ef   :  { %856 = vmatpush1.bf16.msra.mxu0 %v5511_v20  ;;  %v5616_v20 = vld [vmem:[#allocation17 + $0x94] ss:$8 sps:$4 sm:$0xff]   ;;  %v5623_v27 = vld [vmem:[#allocation17 + $0xc0] ss:$8 sps:$4 sm:$0xff]  }
 0x1f0   :  { %857 = vmatprep.subr.bf16.mxu0 %v5512_v22  ;;  %899 = vmatpush1.bf16.msra.mxu1 %v5562_v43  ;;  %v5619_v22 = vld [vmem:[#allocation17 + $0xa4] ss:$8 sps:$4 sm:$0xff]   ;;  %v5628_v28 = vld [vmem:[#allocation17 + $0xd4] ss:$8 sps:$4 sm:$0xff]   ;;  %v5629_v31 = vld [vmem:[#allocation17 + $0xe0] ss:$8 sps:$4 sm:$0xff]  }
 0x1f1   :  { %900 = vmatprep.subr.bf16.mxu1 %v5563_v44  ;;  %v5634_v32 = vld [vmem:[#allocation17 + $0xf4] ss:$8 sps:$4 sm:$0xff]   ;;  %v5683_v35 = vld [vmem:[#allocation20] ss:$8 sps:$4 sm:$0xff]   ;;  %v5685_v36 = vld [vmem:[#allocation20 + $0x4] ss:$8 sps:$4 sm:$0xff]  }
 0x1f2   :  { %v5691_v39 = vld [vmem:[#allocation20 + $0x24] ss:$8 sps:$4 sm:$0xff]   ;;  %v5689_v40 = vld [vmem:[#allocation20 + $0x20] ss:$8 sps:$4 sm:$0xff]  }
 0x1f3   :  { %858 = vmatpush1.bf16.msra.mxu0 %v5514_v25  ;;  %v5620_v25 = vld [vmem:[#allocation17 + $0xb0] ss:$8 sps:$4 sm:$0xff]   ;;  %v5695_v44 = vld [vmem:[#allocation20 + $0x40] ss:$8 sps:$4 sm:$0xff]  }
 0x1f4   :  { %859 = vmatprep.subr.bf16.mxu0 %v5515_v26  ;;  %901 = vmatpush1.bf16.msra.mxu1 %v5565_v47  ;;  %v5625_v26 = vld [vmem:[#allocation17 + $0xc4] ss:$8 sps:$4 sm:$0xff]  }
 0x1f5   :  { %902 = vmatprep.subr.bf16.mxu1 %v5566_v48  ;;  %v5697_v43 = vld [vmem:[#allocation20 + $0x44] ss:$8 sps:$4 sm:$0xff]   ;;  %v5701_v48 = vld [vmem:[#allocation20 + $0x60] ss:$8 sps:$4 sm:$0xff]  }
 0x1f6   :  { %v5703_v47 = vld [vmem:[#allocation20 + $0x64] ss:$8 sps:$4 sm:$0xff]  }
 0x1f7   :  { %860 = vmatpush1.bf16.msra.mxu0 %v5517_v29  ;;  %v5626_v29 = vld [vmem:[#allocation17 + $0xd0] ss:$8 sps:$4 sm:$0xff]  }
 0x1f8   :  { %861 = vmatprep.subr.bf16.mxu0 %v5518_v30  ;;  %903 = vmatpush1.bf16.msra.mxu1 %v5568_v51  ;;  %v5631_v30 = vld [vmem:[#allocation17 + $0xe4] ss:$8 sps:$4 sm:$0xff]  }
 0x1f9   :  { %904 = vmatprep.subr.bf16.mxu1 %v5569_v52  ;;  %v5709_v51 = vld [vmem:[#allocation20 + $0x84] ss:$8 sps:$4 sm:$0xff]   ;;  %v5707_v52 = vld [vmem:[#allocation20 + $0x80] ss:$8 sps:$4 sm:$0xff]  }
 0x1fb   :  { %862 = vmatpush1.bf16.msra.mxu0 %v5520_v33  ;;  %v5632_v33 = vld [vmem:[#allocation17 + $0xf0] ss:$8 sps:$4 sm:$0xff]  }
 0x1fc   :  { %863 = vmatprep.subr.bf16.mxu0 %v5521_v34  ;;  %905 = vmatpush1.bf16.msra.mxu1 %v5571_v54  ;;  %v5637_v34 = vld [vmem:[#allocation17 + $0x104] ss:$8 sps:$4 sm:$0xff]   ;;  %v5710_v54 = vld [vmem:[#allocation20 + $0x90] ss:$8 sps:$4 sm:$0xff]  }
 0x1fd   :  { %906 = vmatprep.subr.bf16.mxu1 %v5572_v55  ;;  %v5715_v55 = vld [vmem:[#allocation20 + $0xa4] ss:$8 sps:$4 sm:$0xff]  }
 0x1ff   :  { %864 = vmatpush1.bf16.msra.mxu0 %v5523_v37  ;;  %v5688_v37 = vld [vmem:[#allocation20 + $0x14] ss:$8 sps:$4 sm:$0xff]  }
 0x200   :  { %865 = vmatprep.subr.bf16.mxu0 %v5524_v38  ;;  %907 = vmatpush1.bf16.msra.mxu1 %v5574_v58  ;;  %v5686_v38 = vld [vmem:[#allocation20 + $0x10] ss:$8 sps:$4 sm:$0xff]   ;;  %v5718_v58 = vld [vmem:[#allocation20 + $0xb4] ss:$8 sps:$4 sm:$0xff]  }
 0x201   :  { %908 = vmatprep.subr.bf16.mxu1 %v5575_v59 }
 0x203   :  { %866 = vmatpush1.bf16.msra.mxu0 %v5526_v41  ;;  %v5694_v41 = vld [vmem:[#allocation20 + $0x34] ss:$8 sps:$4 sm:$0xff]  }
 0x204   :  { %867 = vmatprep.subr.bf16.mxu0 %v5527_v42  ;;  %909 = vmatpush1.bf16.msra.mxu1 %v5577_v62  ;;  %v5692_v42 = vld [vmem:[#allocation20 + $0x30] ss:$8 sps:$4 sm:$0xff]  }
 0x205   :  { %910 = vmatprep.subr.bf16.mxu1 %v5578_v0 }
 0x207   :  { %868 = vmatpush1.bf16.msra.mxu0 %v5529_v45  ;;  %v5700_v45 = vld [vmem:[#allocation20 + $0x54] ss:$8 sps:$4 sm:$0xff]  }
 0x208   :  { %869 = vmatprep.subr.bf16.mxu0 %v5530_v46  ;;  %911 = vmatpush1.bf16.msra.mxu1 %v5580_v2  ;;  %v5698_v46 = vld [vmem:[#allocation20 + $0x50] ss:$8 sps:$4 sm:$0xff]  }
 0x209   :  { %912 = vmatprep.subr.bf16.mxu1 %v5581_v4 }
 0x20b   :  { %870 = vmatpush1.bf16.msra.mxu0 %v5532_v49  ;;  %v5706_v49 = vld [vmem:[#allocation20 + $0x74] ss:$8 sps:$4 sm:$0xff]  }
 0x20c   :  { %871 = vmatprep.subr.bf16.mxu0 %v5536_v50  ;;  %913 = vmatpush1.bf16.msra.mxu1 %v5583_v6  ;;  %v5704_v50 = vld [vmem:[#allocation20 + $0x70] ss:$8 sps:$4 sm:$0xff]  }
 0x20d   :  { %914 = vmatprep.subr.bf16.mxu1 %v5584_v8 }
 0x20f   :  { %872 = vmatpush1.bf16.msra.mxu0 %v5538_v53  ;;  %v5712_v53 = vld [vmem:[#allocation20 + $0x94] ss:$8 sps:$4 sm:$0xff]  }
 0x210   :  { %1351 = vmatprep.subr.bf16.mxu0 %v5589_v57  ;;  %915 = vmatpush1.bf16.msra.mxu1 %v5586_v10  ;;  %v5713_v57 = vld [vmem:[#allocation20 + $0xa0] ss:$8 sps:$4 sm:$0xff]  }
 0x211   :  { %1655 = vmatprep.subr.bf16.mxu1 %v5685_v36  ;;  %v5649_v36 = vld [vmem:[#allocation17 + $0x144] ss:$8 sps:$4 sm:$0xff]  }
 0x212   :  { %874 = vmatmul.mubr.bf16.vlgmr.msra.gmra.mrb[0].mxu0 %v5541_v56 }
 0x213   :  { %1352 = vmatpush1.bf16.msra.mxu0 %v5587_v60  ;;  %917 = vmatmul.mubr.bf16.vlgmr.msra.gmra.mrb[0].mxu1 %v5541_v56  ;;  %v491_v56 = vlaneseq  ;;  %v5716_v60 = vld [vmem:[#allocation20 + $0xb0] ss:$8 sps:$4 sm:$0xff]  }
 0x214   :  { %1353 = vmatprep.subr.bf16.mxu0 %v5592_v61  ;;  %1656 = vmatpush1.bf16.msra.mxu1 %v5683_v35  ;;  %v5721_v61 = vld [vmem:[#allocation20 + $0xc4] ss:$8 sps:$4 sm:$0xff]  }
 0x215   :  { %1657 = vmatprep.subr.bf16.mxu1 %v5688_v37  ;;  %v492_v59 = vshrl.u32 %v491_v56, 7  ;;  %v5653_v56 = vld [vmem:[#allocation17 + $0x160] ss:$8 sps:$4 sm:$0xff]  }
 0x217   :  { %1354 = vmatpush1.bf16.msra.mxu0 %v5590_v63  ;;  %v7005_v62 = vsub.s32 0, %v492_v59  ;;  %v489_v63 = vld [vmem:[#allocation16] sm:$0xf]  ;;  %v7007_v0 = vsub.s32 1, %v492_v59 }
 0x218   :  { %1355 = vmatprep.subr.bf16.mxu0 %v5595_v1  ;;  %1658 = vmatpush1.bf16.msra.mxu1 %v5686_v38  ;;  %v5719_v1 = vld [vmem:[#allocation20 + $0xc0] ss:$8 sps:$4 sm:$0xff]  }
 0x219   :  { %1659 = vmatprep.subr.bf16.mxu1 %v5691_v39  ;;  %v494_v2 = vrot.slane %v489_v63, %v7005_v62 }
 0x21b   :  { %1356 = vmatpush1.bf16.msra.mxu0 %v5593_v3  ;;  %v498_v3 = vrot.slane %v489_v63, %v7007_v0 }
 0x21c   :  { %1357 = vmatprep.subr.bf16.mxu0 %v5598_v5  ;;  %1660 = vmatpush1.bf16.msra.mxu1 %v5689_v40 }
 0x21d   :  { %1661 = vmatprep.subr.bf16.mxu1 %v5694_v41 }
 0x21f   :  { %1358 = vmatpush1.bf16.msra.mxu0 %v5596_v7 }
 0x220   :  { %1359 = vmatprep.subr.bf16.mxu0 %v5601_v9  ;;  %1662 = vmatpush1.bf16.msra.mxu1 %v5692_v42 }
 0x221   :  { %1663 = vmatprep.subr.bf16.mxu1 %v5697_v43 }
 0x223   :  { %1360 = vmatpush1.bf16.msra.mxu0 %v5599_v11 }
 0x224   :  { %1361 = vmatprep.subr.bf16.mxu0 %v5604_v12  ;;  %1664 = vmatpush1.bf16.msra.mxu1 %v5695_v44  ;;  %v5647_v44 = vld [vmem:[#allocation17 + $0x140] ss:$8 sps:$4 sm:$0xff]  }
 0x225   :  { %1665 = vmatprep.subr.bf16.mxu1 %v5700_v45 }
 0x227   :  { %1362 = vmatpush1.bf16.msra.mxu0 %v5602_v13 }
 0x228   :  { %1363 = vmatprep.subr.bf16.mxu0 %v5607_v14  ;;  %1666 = vmatpush1.bf16.msra.mxu1 %v5698_v46 }
 0x229   :  { %1667 = vmatprep.subr.bf16.mxu1 %v5703_v47  ;;  %v5652_v47 = vld [vmem:[#allocation17 + $0x154] ss:$8 sps:$4 sm:$0xff]  }
 0x22b   :  { %1364 = vmatpush1.bf16.msra.mxu0 %v5605_v15 }
 0x22c   :  { %1365 = vmatprep.subr.bf16.mxu0 %v5610_v16  ;;  %1668 = vmatpush1.bf16.msra.mxu1 %v5701_v48 }
 0x22d   :  { %1669 = vmatprep.subr.bf16.mxu1 %v5706_v49 }
 0x22f   :  { %1366 = vmatpush1.bf16.msra.mxu0 %v5608_v17 }
 0x230   :  { %1367 = vmatprep.subr.bf16.mxu0 %v5613_v18  ;;  %1670 = vmatpush1.bf16.msra.mxu1 %v5704_v50 }
 0x231   :  { %1671 = vmatprep.subr.bf16.mxu1 %v5709_v51 }
 0x233   :  { %1368 = vmatpush1.bf16.msra.mxu0 %v5611_v19 }
 0x234   :  { %1369 = vmatprep.subr.bf16.mxu0 %v5616_v20  ;;  %1672 = vmatpush1.bf16.msra.mxu1 %v5707_v52 }
 0x235   :  { %1673 = vmatprep.subr.bf16.mxu1 %v5712_v53  ;;  %v5650_v53 = vld [vmem:[#allocation17 + $0x150] ss:$8 sps:$4 sm:$0xff]  }
 0x237   :  { %1370 = vmatpush1.bf16.msra.mxu0 %v5614_v21 }
 0x238   :  { %1371 = vmatprep.subr.bf16.mxu0 %v5619_v22  ;;  %1674 = vmatpush1.bf16.msra.mxu1 %v5710_v54  ;;  %v5635_v22 = vld [vmem:[#allocation17 + $0x100] ss:$8 sps:$4 sm:$0xff]  }
 0x239   :  { %1675 = vmatprep.subr.bf16.mxu1 %v5715_v55  ;;  %v5655_v55 = vld [vmem:[#allocation17 + $0x164] ss:$8 sps:$4 sm:$0xff]  }
 0x23b   :  { %1372 = vmatpush1.bf16.msra.mxu0 %v5617_v23  ;;  %v5640_v23 = vld [vmem:[#allocation17 + $0x114] ss:$8 sps:$4 sm:$0xff]  }
 0x23c   :  { %1373 = vmatprep.subr.bf16.mxu0 %v5622_v24  ;;  %1676 = vmatpush1.bf16.msra.mxu1 %v5713_v57  ;;  %v5638_v24 = vld [vmem:[#allocation17 + $0x110] ss:$8 sps:$4 sm:$0xff]   ;;  %v5658_v57 = vld [vmem:[#allocation17 + $0x174] ss:$8 sps:$4 sm:$0xff]  }
 0x23d   :  { %1677 = vmatprep.subr.bf16.mxu1 %v5718_v58  ;;  %v5656_v58 = vld [vmem:[#allocation17 + $0x170] ss:$8 sps:$4 sm:$0xff]  }
 0x23f   :  { %1374 = vmatpush1.bf16.msra.mxu0 %v5620_v25  ;;  %v7011_v25 = vsub.s32 2, %v492_v59 }
 0x240   :  { %1375 = vmatprep.subr.bf16.mxu0 %v5625_v26  ;;  %1678 = vmatpush1.bf16.msra.mxu1 %v5716_v60  ;;  %v5643_v26 = vld [vmem:[#allocation17 + $0x124] ss:$8 sps:$4 sm:$0xff]   ;;  %v5659_v60 = vld [vmem:[#allocation17 + $0x180] ss:$8 sps:$4 sm:$0xff]  }
 0x241   :  { %1679 = vmatprep.subr.bf16.mxu1 %v5721_v61  ;;  %v5664_v61 = vld [vmem:[#allocation17 + $0x194] ss:$8 sps:$4 sm:$0xff]  }
 0x243   :  { %1376 = vmatpush1.bf16.msra.mxu0 %v5623_v27  ;;  %v7013_v27 = vsub.s32 3, %v492_v59  ;;  %v5661_v59 = vld [vmem:[#allocation17 + $0x184] ss:$8 sps:$4 sm:$0xff]  }
 0x244   :  { %1377 = vmatprep.subr.bf16.mxu0 %v5628_v28  ;;  %1680 = vmatpush1.bf16.msra.mxu1 %v5719_v1  ;;  %v5641_v28 = vld [vmem:[#allocation17 + $0x120] ss:$8 sps:$4 sm:$0xff]   ;;  %v5667_v1 = vld [vmem:[#allocation17 + $0x1a4] ss:$8 sps:$4 sm:$0xff]  }
 0x247   :  { %1378 = vmatpush1.bf16.msra.mxu0 %v5626_v29  ;;  %v502_v29 = vrot.slane %v489_v63, %v7011_v25 }
 0x248   :  { %1379 = vmatprep.subr.bf16.mxu0 %v5631_v30  ;;  %v5646_v30 = vld [vmem:[#allocation17 + $0x134] ss:$8 sps:$4 sm:$0xff]  }
 0x24b   :  { %1380 = vmatpush1.bf16.msra.mxu0 %v5629_v31  ;;  %v506_v31 = vrot.slane %v489_v63, %v7013_v27  ;;  %v5662_v63 = vld [vmem:[#allocation17 + $0x190] ss:$8 sps:$4 sm:$0xff]  }
 0x24c   :  { %1381 = vmatprep.subr.bf16.mxu0 %v5634_v32 }
 0x24f   :  { %1382 = vmatpush1.bf16.msra.mxu0 %v5632_v33  ;;  %v5644_v33 = vld [vmem:[#allocation17 + $0x130] ss:$8 sps:$4 sm:$0xff]  }
 0x250   :  { %1394 = vmatprep.subr.bf16.mxu0 %v5637_v34 }
 0x2e5   :  { %v875_v4 = vpop.f32.mrb[0].mxu0 }
 0x2e6   :  { %v876_v5 = vadd.f32 %v875_v4, %v494_v2  ;;  %v877_v6 = vpop.f32.mrb[1].mxu0  ;;  %v918_v32 = vpop.f32.mrb[0].mxu1  ;;  %v5668_v4 = vld [vmem:[#allocation17 + $0x1b0] ss:$8 sps:$4 sm:$0xff]  }
 0x2e7   :  { %v878_v7 = vadd.f32 %v877_v6, %v498_v3  ;;  %v879_v8 = vpop.f32.mrb[2].mxu0  ;;  %v919_v34 = vadd.f32 %v918_v32, %v502_v29  ;;  %v920_v35 = vpop.f32.mrb[1].mxu1  ;;  %v5671_v6 = vld [vmem:[#allocation17 + $0x1c0] ss:$8 sps:$4 sm:$0xff]  }
 0x2e8   :  { %v935_v9 = vmul.f32 0.01, %v876_v5  ;;  %v880_v10 = vadd.f32 %v879_v8, %v494_v2  ;;  %v881_v11 = vpop.f32.mrb[3].mxu0  ;;  %vm927_vm0 = vcmp.ge.f32.partialorder %v876_v5, 0.0  ;;  %v921_v37 = vadd.f32 %v920_v35, %v506_v31  ;;  %v922_v38 = vpop.f32.mrb[2].mxu1 }
 0x2e9   :  { %v936_v12 = vmul.f32 0.01, %v878_v7  ;;  %v882_v13 = vadd.f32 %v881_v11, %v498_v3  ;;  %vm928_vm1 = vcmp.ge.f32.partialorder %v878_v7, 0.0  ;;  %vm929_vm4 = vcmp.ge.f32.partialorder %v919_v34, 0.0  ;;  %v924_v41 = vpop.f32.mrb[3].mxu1 }
 0x2ea   :  { %vm931_vm2 = vcmp.ge.f32.partialorder %v880_v10, 0.0  ;;  %v939_v14 = vmul.f32 0.01, %v880_v10  ;;  %v943_v16 = vsel %vm927_vm0, %v876_v5, %v935_v9  ;;  %v937_v39 = vmul.f32 0.01, %v919_v34 }
 0x2eb   :  { %vm932_vm3 = vcmp.ge.f32.partialorder %v882_v13, 0.0  ;;  %v940_v15 = vmul.f32 0.01, %v882_v13  ;;  %v944_v19 = vsel %vm928_vm1, %v878_v7, %v936_v12  ;;  %v923_v40 = vadd.f32 %v922_v38, %v502_v29  ;;  %v5665_v2 = vld [vmem:[#allocation17 + $0x1a0] ss:$8 sps:$4 sm:$0xff]  }
 0x2ec   :  { %v947_v17 = vsel %vm931_vm2, %v880_v10, %v939_v14  ;;  %vm930_vm5 = vcmp.ge.f32.partialorder %v921_v37, 0.0  ;;  %v938_v42 = vmul.f32 0.01, %v921_v37  ;;  %v925_v43 = vadd.f32 %v924_v41, %v506_v31  ;;  %v5670_v3 = vld [vmem:[#allocation17 + $0x1b4] ss:$8 sps:$4 sm:$0xff]  }
 0x2ed   :  { %v1015_v18 = vpack.c.bf16 %v947_v17, %v943_v16  ;;  %v948_v20 = vsel %vm932_vm3, %v882_v13, %v940_v15  ;;  %v945_v45 = vsel %vm929_vm4, %v919_v34, %v937_v39  ;;  %vm933_vm6 = vcmp.ge.f32.partialorder %v923_v40, 0.0  ;;  %v5673_v5 = vld [vmem:[#allocation17 + $0x1c4] ss:$8 sps:$4 sm:$0xff]   ;;  %v5676_v7 = vld [vmem:[#allocation17 + $0x1d4] ss:$8 sps:$4 sm:$0xff]  }
 0x2ee   :  { %v1016_v21 = vpack.c.bf16 %v948_v20, %v944_v19  ;;  %v941_v46 = vmul.f32 0.01, %v923_v40  ;;  %vm934_vm7 = vcmp.ge.f32.partialorder %v925_v43, 0.0  ;;  %v942_v48 = vmul.f32 0.01, %v925_v43 }
 0x2ef   :  { %v946_v49 = vsel %vm930_vm5, %v921_v37, %v938_v42  ;;  %v5674_v8 = vld [vmem:[#allocation17 + $0x1d0] ss:$8 sps:$4 sm:$0xff]   ;;  %v5679_v9 = vld [vmem:[#allocation17 + $0x1e4] ss:$8 sps:$4 sm:$0xff]   ;;  %v5677_v10 = vld [vmem:[#allocation17 + $0x1e0] ss:$8 sps:$4 sm:$0xff]  }
 0x2f0   :  { %1383 = vmatprep.mubr.bf16.mxu0 %v1016_v21  ;;  %v949_v50 = vsel %vm933_vm6, %v923_v40, %v941_v46  ;;  %v950_v52 = vsel %vm934_vm7, %v925_v43, %v942_v48  ;;  %v5682_v11 = vld [vmem:[#allocation17 + $0x1f4] ss:$8 sps:$4 sm:$0xff]   ;;  %v5680_v12 = vld [vmem:[#allocation17 + $0x1f0] ss:$8 sps:$4 sm:$0xff]   ;;  %v5725_v16 = vld [vmem:[#allocation20 + $0xe0] ss:$8 sps:$4 sm:$0xff]  }
 0x2f1   :  { %1384 = vmatmul.mubr.bf16.vlgmr.msra.gmra.mrb[4].mxu0 %v1015_v18  ;;  %v1017_v51 = vpack.c.bf16 %v949_v50, %v945_v45  ;;  %v1018_v54 = vpack.c.bf16 %v950_v52, %v946_v49  ;;  %v5724_v13 = vld [vmem:[#allocation20 + $0xd4] ss:$8 sps:$4 sm:$0xff]   ;;  %v5722_v14 = vld [vmem:[#allocation20 + $0xd0] ss:$8 sps:$4 sm:$0xff]   ;;  %v5727_v15 = vld [vmem:[#allocation20 + $0xe4] ss:$8 sps:$4 sm:$0xff]  }
 0x2f2   :  { %1395 = vmatpush1.bf16.msra.mxu0 %v5635_v22  ;;  %1681 = vmatprep.subr.bf16.mxu1 %v5724_v13  ;;  %v5730_v17 = vld [vmem:[#allocation20 + $0xf4] ss:$8 sps:$4 sm:$0xff]   ;;  %v5728_v18 = vld [vmem:[#allocation20 + $0xf0] ss:$8 sps:$4 sm:$0xff]   ;;  %v1483_v42 = vld [vmem:[#allocation22] sm:$0x3] }
 0x2f3   :  { %1396 = vmatprep.subr.bf16.mxu0 %v5640_v23  ;;  %1426 = vmatprep.mubr.bf16.mxu0 %v1018_v54  ;;  %v1019_v19 = vld [vmem:[#allocation19] sm:$0x3]  ;;  %v1488_v43 = vrot.slane %v1483_v42, %v7005_v62 }
 0x2f4   :  { %1682 = vmatpush1.bf16.msra.mxu1 %v5722_v14  ;;  %v1024_v20 = vrot.slane %v1019_v19, %v7005_v62  ;;  %v1028_v21 = vrot.slane %v1019_v19, %v7007_v0 }
 0x2f5   :  { %1683 = vmatprep.subr.bf16.mxu1 %v5727_v15 }
 0x2f6   :  { %1397 = vmatpush1.bf16.msra.mxu0 %v5638_v24 }
 0x2f7   :  { %1398 = vmatprep.subr.bf16.mxu0 %v5643_v26 }
 0x2f8   :  { %1684 = vmatpush1.bf16.msra.mxu1 %v5725_v16 }
 0x2f9   :  { %1685 = vmatprep.subr.bf16.mxu1 %v5730_v17 }
 0x2fa   :  { %1399 = vmatpush1.bf16.msra.mxu0 %v5641_v28 }
 0x2fb   :  { %1400 = vmatprep.subr.bf16.mxu0 %v5646_v30 }
 0x2fc   :  { %1686 = vmatpush1.bf16.msra.mxu1 %v5728_v18 }
 0x2fe   :  { %1401 = vmatpush1.bf16.msra.mxu0 %v5644_v33 }
 0x2ff   :  { %1402 = vmatprep.subr.bf16.mxu0 %v5649_v36 }
 0x302   :  { %1403 = vmatpush1.bf16.msra.mxu0 %v5647_v44  ;;  %v1492_v44 = vrot.slane %v1483_v42, %v7007_v0 }
 0x303   :  { %1404 = vmatprep.subr.bf16.mxu0 %v5652_v47 }
 0x306   :  { %1405 = vmatpush1.bf16.msra.mxu0 %v5650_v53 }
 0x307   :  { %1406 = vmatprep.subr.bf16.mxu0 %v5655_v55 }
 0x30a   :  { %1407 = vmatpush1.bf16.msra.mxu0 %v5653_v56 }
 0x30b   :  { %1408 = vmatprep.subr.bf16.mxu0 %v5658_v57  ;;  %v1704_v57 = vld [vmem:[%s7189_s30] sm:$0xff] }
 0x30e   :  { %1409 = vmatpush1.bf16.msra.mxu0 %v5656_v58 }
 0x30f   :  { %1410 = vmatprep.subr.bf16.mxu0 %v5661_v59  ;;  %v1705_v59 = vld [vmem:[%s7189_s30 + $0x8] sm:$0xff] }
 0x312   :  { %1411 = vmatpush1.bf16.msra.mxu0 %v5659_v60 }
 0x313   :  { %1412 = vmatprep.subr.bf16.mxu0 %v5664_v61 }
 0x316   :  { %1413 = vmatpush1.bf16.msra.mxu0 %v5662_v63 }
 0x317   :  { %1414 = vmatprep.subr.bf16.mxu0 %v5667_v1 }
 0x31a   :  { %1415 = vmatpush1.bf16.msra.mxu0 %v5665_v2 }
 0x31b   :  { %1416 = vmatprep.subr.bf16.mxu0 %v5670_v3 }
 0x31e   :  { %1417 = vmatpush1.bf16.msra.mxu0 %v5668_v4 }
 0x31f   :  { %1418 = vmatprep.subr.bf16.mxu0 %v5673_v5 }
 0x322   :  { %1419 = vmatpush1.bf16.msra.mxu0 %v5671_v6 }
 0x323   :  { %1420 = vmatprep.subr.bf16.mxu0 %v5676_v7 }
 0x326   :  { %1421 = vmatpush1.bf16.msra.mxu0 %v5674_v8 }
 0x327   :  { %1422 = vmatprep.subr.bf16.mxu0 %v5679_v9 }
 0x32a   :  { %1423 = vmatpush1.bf16.msra.mxu0 %v5677_v10 }
 0x32b   :  { %1424 = vmatprep.subr.bf16.mxu0 %v5682_v11 }
 0x32e   :  { %1425 = vmatpush1.bf16.msra.mxu0 %v5680_v12 }
 0x331   :  { %1427 = vmatmul.mubr.bf16.vlgmr.msra.gmra.mrb[4].mxu0 %v1017_v51 }
 0x404   :  { %v1428_v22 = vpop.f32.mrb[4].mxu0 }
 0x405   :  { %v5357_v23 = vadd.f32 %v1428_v22, %v1024_v20  ;;  %v1430_v24 = vpop.f32.mrb[5].mxu0 }
 0x406   :  { %v5358_v26 = vadd.f32 %v1430_v24, %v1028_v21  ;;  %v1432_v28 = vpop.f32.mrb[6].mxu0 }
 0x407   :  { %vm1437_vm8 = vcmp.ge.f32.partialorder %v5357_v23, 0.0  ;;  %v1441_v29 = vmul.f32 0.01, %v5357_v23  ;;  %v5359_v30 = vadd.f32 %v1432_v28, %v1024_v20  ;;  %v1434_v31 = vpop.f32.mrb[7].mxu0 }
 0x408   :  { %vm1438_vm9 = vcmp.ge.f32.partialorder %v5358_v26, 0.0  ;;  %v1442_v32 = vmul.f32 0.01, %v5358_v26  ;;  %v5360_v33 = vadd.f32 %v1434_v31, %v1028_v21 }
 0x409   :  { %v1445_v34 = vsel %vm1437_vm8, %v5357_v23, %v1441_v29  ;;  %vm1439_vm10 = vcmp.ge.f32.partialorder %v5359_v30, 0.0  ;;  %v1443_v35 = vmul.f32 0.01, %v5359_v30 }
 0x40a   :  { %1710 = vst [vmem:[%s7187_s15] sm:$0xff] %v1445_v34  ;;  %vm1440_vm11 = vcmp.ge.f32.partialorder %v5360_v33, 0.0  ;;  %v1444_v36 = vmul.f32 0.01, %v5360_v33  ;;  %v1446_v37 = vsel %vm1438_vm9, %v5358_v26, %v1442_v32 }
 0x40b   :  { %v1447_v38 = vsel %vm1439_vm10, %v5359_v30, %v1443_v35  ;;  %1711 = vst [vmem:[%s7187_s15 + $0x8] sm:$0xff] %v1446_v37 }
 0x40c   :  { %v7021_v39 = vpack.c.bf16 %v1447_v38, %v1445_v34  ;;  %1712 = vst [vmem:[%s7187_s15 + $0x10] sm:$0xff] %v1447_v38  ;;  %v1448_v40 = vsel %vm1440_vm11, %v5360_v33, %v1444_v36 }
 0x40d   :  { %v7024_v41 = vpack.c.bf16 %v1448_v40, %v1446_v37  ;;  %1713 = vst [vmem:[%s7187_s15 + $0x18] sm:$0xff] %v1448_v40 }
 0x40f   :  { %1687 = vmatprep.mubr.bf16.mxu1 %v7024_v41 }
 0x410   :  { %1688 = vmatmul.mubr.bf16.vlgmr.msra.gmra.mrb[4].mxu1 %v7021_v39 }
 0x4e3   :  { %v1689_v45 = vpop.f32.mrb[4].mxu1 }
 0x4e4   :  { %v1690_v46 = vadd.f32 %v1689_v45, %v1488_v43  ;;  %v1691_v47 = vpop.f32.mrb[5].mxu1 }
 0x4e5   :  { %v1692_v48 = vadd.f32 %v1691_v47, %v1492_v44  ;;  %v1693_v49 = vpop.f32.mrb[6].mxu1 }
 0x4e6   :  { %1714 = vst [vmem:[%s7188_s2] sm:$0xff] %v1690_v46  ;;  %v1694_v50 = vadd.f32 %v1693_v49, %v1488_v43  ;;  %v1695_v51 = vpop.f32.mrb[7].mxu1 }
 0x4e7   :  { %v1698_v52 = vmul.f32 0.5, %v1692_v48  ;;  %1715 = vst [vmem:[%s7188_s2 + $0x8] sm:$0xff] %v1692_v48  ;;  %v1696_v53 = vadd.f32 %v1695_v51, %v1492_v44 }
 0x4e8   :  { %1716 = vst [vmem:[%s7188_s2 + $0x10] sm:$0xff] %v1694_v50 }
 0x4e9   :  { %v1700_v54 = vmul.f32 1.442695, %v1698_v52  ;;  %v1699_v55 = vmul.f32 0.5, %v1696_v53  ;;  %1717 = vst [vmem:[%s7188_s2 + $0x18] sm:$0xff] %v1696_v53 }
 0x4eb   :  { %5731 = vpow2.f32 %v1700_v54  ;;  %v1702_v56 = vmul.f32 1.442695, %v1699_v55 }
 0x4ed   :  { %5733 = vpow2.f32 %v1702_v56 }
 0x4f5   :  { %v5732_v58 = vpop.eup %5731 }
 0x4f6   :  { %v1706_v60 = vmul.f32 %v5732_v58, %v1704_v57 }
 0x4f7   :  { %v5734_v61 = vpop.eup %5733 }
 0x4f8   :  { %v7037_v63 = vadd.f32 %v1706_v60, %v1690_v46  ;;  %v1707_v1 = vmul.f32 %v5734_v61, %v1705_v59 }
 0x4fa   :  { %1718 = vst [vmem:[%s6865_s5] sm:$0xff] %v7037_v63  ;;  %v7041_v2 = vadd.f32 %v1707_v1, %v1694_v50 }
 0x4fc   :  { %1719 = vst [vmem:[%s6865_s5 + $0x8] sm:$0xff] %v7041_v2 }
 0x4fd   :  { %6633 = dma.done.wait [#allocation3], 49152 }
 0x4fe   :  { %6634 = vsyncadd [#allocation3], 4294918144  ;;  %v1737_v3 = vld [vmem:[#allocation2 + $0x8] sm:$0xff]  ;;  %v1739_v4 = vld [vmem:[#allocation2 + $0x18] sm:$0xff]  ;;  %s7190_s5 = sld [smem:[#allocation52_spill]]  ;;  %s7191_s17 = sld [smem:[#allocation64_spill]] }
 0x4ff   :  { %v1736_v5 = vld [vmem:[#allocation2] sm:$0xff]  ;;  %2202 = vmatprep.subr.bf16.mxu1 %v1737_v3  ;;  %2460 = vmatprep.subr.bf16.mxu0 %v1739_v4  ;;  %v1738_v6 = vld [vmem:[#allocation2 + $0x10] sm:$0xff]  ;;  %v1741_v7 = vld [vmem:[#allocation2 + $0x28] sm:$0xff]  ;;  %s7192_s23 = sld [smem:[#allocation65_spill]]  ;;  %s7193_s14 = sld [smem:[#allocation54_spill]] }
 0x500   :  { %v1743_v8 = vld [vmem:[#allocation2 + $0x38] sm:$0xff]  ;;  %2203 = vmatpush1.bf16.msra.mxu1 %v1736_v5  ;;  %2461 = vmatpush1.bf16.msra.mxu0 %v1738_v6  ;;  %v1740_v9 = vld [vmem:[#allocation2 + $0x20] sm:$0xff]  ;;  %v1742_v10 = vld [vmem:[#allocation2 + $0x30] sm:$0xff]  ;;  %s7194_s7 = sld [smem:[#allocation66_spill]] }
 0x501   :  { %2204 = vmatprep.subr.bf16.mxu1 %v1741_v7  ;;  %2462 = vmatprep.subr.bf16.mxu0 %v1743_v8  ;;  %v1745_v11 = vld [vmem:[#allocation2 + $0x48] sm:$0xff]  ;;  %v1747_v12 = vld [vmem:[#allocation2 + $0x58] sm:$0xff]  ;;  %v1744_v13 = vld [vmem:[#allocation2 + $0x40] sm:$0xff] }
 0x502   :  { %v1746_v14 = vld [vmem:[#allocation2 + $0x50] sm:$0xff]  ;;  %v1749_v15 = vld [vmem:[#allocation2 + $0x68] sm:$0xff]  ;;  %v1751_v16 = vld [vmem:[#allocation2 + $0x78] sm:$0xff] }
 0x503   :  { %v1748_v17 = vld [vmem:[#allocation2 + $0x60] sm:$0xff]  ;;  %v1750_v18 = vld [vmem:[#allocation2 + $0x70] sm:$0xff]  ;;  %v1753_v19 = vld [vmem:[#allocation2 + $0x88] sm:$0xff] }
 0x504   :  { %2205 = vmatpush1.bf16.msra.mxu1 %v1740_v9  ;;  %2463 = vmatpush1.bf16.msra.mxu0 %v1742_v10  ;;  %v1755_v20 = vld [vmem:[#allocation2 + $0x98] sm:$0xff]  ;;  %v1752_v21 = vld [vmem:[#allocation2 + $0x80] sm:$0xff]  ;;  %v1754_v22 = vld [vmem:[#allocation2 + $0x90] sm:$0xff] }
 0x505   :  { %2206 = vmatprep.subr.bf16.mxu1 %v1745_v11  ;;  %2464 = vmatprep.subr.bf16.mxu0 %v1747_v12  ;;  %v1757_v23 = vld [vmem:[#allocation2 + $0xa8] sm:$0xff]  ;;  %v1759_v24 = vld [vmem:[#allocation2 + $0xb8] sm:$0xff]  ;;  %v1756_v26 = vld [vmem:[#allocation2 + $0xa0] sm:$0xff] }
 0x506   :  { %v1758_v28 = vld [vmem:[#allocation2 + $0xb0] sm:$0xff]  ;;  %v1761_v29 = vld [vmem:[#allocation2 + $0xc8] sm:$0xff]  ;;  %v1763_v30 = vld [vmem:[#allocation2 + $0xd8] sm:$0xff] }
 0x507   :  { %v5737_v31 = vld [vmem:[%s7190_s5 + $0x4] ss:$48 sps:$4 sm:$0xff]   ;;  %v1765_v34 = vld [vmem:[#allocation2 + $0xe8] sm:$0xff]  ;;  %v1767_v35 = vld [vmem:[#allocation2 + $0xf8] sm:$0xff] }
 0x508   :  { %2207 = vmatpush1.bf16.msra.mxu1 %v1744_v13  ;;  %2465 = vmatpush1.bf16.msra.mxu0 %v1746_v14  ;;  %v1760_v32 = vld [vmem:[#allocation2 + $0xc0] sm:$0xff]  ;;  %v1762_v33 = vld [vmem:[#allocation2 + $0xd0] sm:$0xff]  ;;  %v1769_v38 = vld [vmem:[#allocation2 + $0x108] sm:$0xff] }
 0x509   :  { %2208 = vmatprep.subr.bf16.mxu1 %v1749_v15  ;;  %2466 = vmatprep.subr.bf16.mxu0 %v1751_v16  ;;  %v1764_v36 = vld [vmem:[#allocation2 + $0xe0] sm:$0xff]  ;;  %v1766_v37 = vld [vmem:[#allocation2 + $0xf0] sm:$0xff]  ;;  %v1771_v40 = vld [vmem:[#allocation2 + $0x118] sm:$0xff] }
 0x50a   :  { %2234 = vmatprep.mubr.bf16.mxu1 %v5737_v31  ;;  %2492 = vmatprep.mubr.bf16.mxu0 %v5737_v31  ;;  %v1768_v42 = vld [vmem:[#allocation2 + $0x100] sm:$0xff]  ;;  %v1770_v43 = vld [vmem:[#allocation2 + $0x110] sm:$0xff]  ;;  %v1773_v44 = vld [vmem:[#allocation2 + $0x128] sm:$0xff] }
 0x50b   :  { %v1775_v45 = vld [vmem:[#allocation2 + $0x138] sm:$0xff]  ;;  %v1772_v46 = vld [vmem:[#allocation2 + $0x120] sm:$0xff]  ;;  %v1774_v47 = vld [vmem:[#allocation2 + $0x130] sm:$0xff] }
 0x50c   :  { %2209 = vmatpush1.bf16.msra.mxu1 %v1748_v17  ;;  %2467 = vmatpush1.bf16.msra.mxu0 %v1750_v18  ;;  %v1777_v48 = vld [vmem:[#allocation2 + $0x148] sm:$0xff]  ;;  %v1779_v49 = vld [vmem:[#allocation2 + $0x158] sm:$0xff]  ;;  %v1776_v50 = vld [vmem:[#allocation2 + $0x140] sm:$0xff] }
 0x50d   :  { %2210 = vmatprep.subr.bf16.mxu1 %v1753_v19  ;;  %2468 = vmatprep.subr.bf16.mxu0 %v1755_v20  ;;  %v1778_v51 = vld [vmem:[#allocation2 + $0x150] sm:$0xff]  ;;  %v1781_v52 = vld [vmem:[#allocation2 + $0x168] sm:$0xff]  ;;  %v1783_v53 = vld [vmem:[#allocation2 + $0x178] sm:$0xff] }
 0x50e   :  { %v1780_v54 = vld [vmem:[#allocation2 + $0x160] sm:$0xff]  ;;  %v1782_v55 = vld [vmem:[#allocation2 + $0x170] sm:$0xff]  ;;  %v1785_v56 = vld [vmem:[#allocation2 + $0x188] sm:$0xff] }
 0x50f   :  { %v1787_v57 = vld [vmem:[#allocation2 + $0x198] sm:$0xff]  ;;  %v1784_v58 = vld [vmem:[#allocation2 + $0x180] sm:$0xff]  ;;  %v1786_v59 = vld [vmem:[#allocation2 + $0x190] sm:$0xff] }
 0x510   :  { %2211 = vmatpush1.bf16.msra.mxu1 %v1752_v21  ;;  %2469 = vmatpush1.bf16.msra.mxu0 %v1754_v22  ;;  %v1789_v60 = vld [vmem:[#allocation2 + $0x1a8] sm:$0xff]  ;;  %v1791_v61 = vld [vmem:[#allocation2 + $0x1b8] sm:$0xff]  ;;  %v1788_v1 = vld [vmem:[#allocation2 + $0x1a0] sm:$0xff] }
 0x511   :  { %2212 = vmatprep.subr.bf16.mxu1 %v1757_v23  ;;  %2470 = vmatprep.subr.bf16.mxu0 %v1759_v24  ;;  %v1790_v3 = vld [vmem:[#allocation2 + $0x1b0] sm:$0xff]  ;;  %v1793_v4 = vld [vmem:[#allocation2 + $0x1c8] sm:$0xff]  ;;  %v1795_v5 = vld [vmem:[#allocation2 + $0x1d8] sm:$0xff] }
 0x512   :  { %v1792_v6 = vld [vmem:[#allocation2 + $0x1c0] sm:$0xff]  ;;  %v1794_v7 = vld [vmem:[#allocation2 + $0x1d0] sm:$0xff]  ;;  %v1797_v8 = vld [vmem:[#allocation2 + $0x1e8] sm:$0xff] }
 0x513   :  { %v1799_v9 = vld [vmem:[#allocation2 + $0x1f8] sm:$0xff]  ;;  %v1796_v10 = vld [vmem:[#allocation2 + $0x1e0] sm:$0xff]  ;;  %v1798_v11 = vld [vmem:[#allocation2 + $0x1f0] sm:$0xff] }
 0x514   :  { %2213 = vmatpush1.bf16.msra.mxu1 %v1756_v26  ;;  %2471 = vmatpush1.bf16.msra.mxu0 %v1758_v28  ;;  %v1801_v12 = vld [vmem:[#allocation2 + $0x208] sm:$0xff]  ;;  %v1803_v13 = vld [vmem:[#allocation2 + $0x218] sm:$0xff]  ;;  %v5735_v14 = vld [vmem:[%s7190_s5] ss:$48 sps:$4 sm:$0xff]  }
 0x515   :  { %2214 = vmatprep.subr.bf16.mxu1 %v1761_v29  ;;  %2472 = vmatprep.subr.bf16.mxu0 %v1763_v30  ;;  %v1800_v15 = vld [vmem:[#allocation2 + $0x200] sm:$0xff]  ;;  %v1802_v16 = vld [vmem:[#allocation2 + $0x210] sm:$0xff]  ;;  %v1805_v17 = vld [vmem:[#allocation2 + $0x228] sm:$0xff] }
 0x516   :  { %v1807_v18 = vld [vmem:[#allocation2 + $0x238] sm:$0xff]  ;;  %v1804_v20 = vld [vmem:[#allocation2 + $0x220] sm:$0xff]  ;;  %v1806_v21 = vld [vmem:[#allocation2 + $0x230] sm:$0xff] }
 0x517   :  { %v5740_v19 = vld [vmem:[%s7190_s5 + $0xc] ss:$48 sps:$4 sm:$0xff]   ;;  %v1808_v24 = vld [vmem:[#allocation2 + $0x240] sm:$0xff]  ;;  %v1810_v26 = vld [vmem:[#allocation2 + $0x250] sm:$0xff] }
 0x518   :  { %2215 = vmatpush1.bf16.msra.mxu1 %v1760_v32  ;;  %2473 = vmatpush1.bf16.msra.mxu0 %v1762_v33  ;;  %v1809_v22 = vld [vmem:[#allocation2 + $0x248] sm:$0xff]  ;;  %v1811_v23 = vld [vmem:[#allocation2 + $0x258] sm:$0xff]  ;;  %v1812_v30 = vld [vmem:[#allocation2 + $0x260] sm:$0xff] }
 0x519   :  { %2216 = vmatprep.subr.bf16.mxu1 %v1765_v34  ;;  %2474 = vmatprep.subr.bf16.mxu0 %v1767_v35  ;;  %v1813_v28 = vld [vmem:[#allocation2 + $0x268] sm:$0xff]  ;;  %v1815_v29 = vld [vmem:[#allocation2 + $0x278] sm:$0xff]  ;;  %v1814_v31 = vld [vmem:[#allocation2 + $0x270] sm:$0xff] }
 0x51a   :  { %v1817_v32 = vld [vmem:[#allocation2 + $0x288] sm:$0xff]  ;;  %v1819_v33 = vld [vmem:[#allocation2 + $0x298] sm:$0xff]  ;;  %v1816_v34 = vld [vmem:[#allocation2 + $0x280] sm:$0xff] }
 0x51b   :  { %v1818_v35 = vld [vmem:[#allocation2 + $0x290] sm:$0xff] }
 0x51c   :  { %2217 = vmatpush1.bf16.msra.mxu1 %v1764_v36  ;;  %2475 = vmatpush1.bf16.msra.mxu0 %v1766_v37  ;;  %v1821_v36 = vld [vmem:[#allocation2 + $0x2a8] sm:$0xff]  ;;  %v1823_v37 = vld [vmem:[#allocation2 + $0x2b8] sm:$0xff] }
 0x51d   :  { %2218 = vmatprep.subr.bf16.mxu1 %v1769_v38  ;;  %2476 = vmatprep.subr.bf16.mxu0 %v1771_v40  ;;  %v1820_v38 = vld [vmem:[#allocation2 + $0x2a0] sm:$0xff]  ;;  %v1822_v40 = vld [vmem:[#allocation2 + $0x2b0] sm:$0xff] }
 0x520   :  { %2219 = vmatpush1.bf16.msra.mxu1 %v1768_v42  ;;  %2477 = vmatpush1.bf16.msra.mxu0 %v1770_v43  ;;  %v1825_v42 = vld [vmem:[#allocation2 + $0x2c8] sm:$0xff]  ;;  %v1827_v43 = vld [vmem:[#allocation2 + $0x2d8] sm:$0xff] }
 0x521   :  { %2220 = vmatprep.subr.bf16.mxu1 %v1773_v44  ;;  %2478 = vmatprep.subr.bf16.mxu0 %v1775_v45  ;;  %v1824_v44 = vld [vmem:[#allocation2 + $0x2c0] sm:$0xff]  ;;  %v1826_v45 = vld [vmem:[#allocation2 + $0x2d0] sm:$0xff] }
 0x524   :  { %2221 = vmatpush1.bf16.msra.mxu1 %v1772_v46  ;;  %2479 = vmatpush1.bf16.msra.mxu0 %v1774_v47  ;;  %v1829_v46 = vld [vmem:[#allocation2 + $0x2e8] sm:$0xff]  ;;  %v1831_v47 = vld [vmem:[#allocation2 + $0x2f8] sm:$0xff] }
 0x525   :  { %2222 = vmatprep.subr.bf16.mxu1 %v1777_v48  ;;  %2480 = vmatprep.subr.bf16.mxu0 %v1779_v49  ;;  %v1828_v48 = vld [vmem:[#allocation2 + $0x2e0] sm:$0xff]  ;;  %v1830_v49 = vld [vmem:[#allocation2 + $0x2f0] sm:$0xff] }
 0x528   :  { %2223 = vmatpush1.bf16.msra.mxu1 %v1776_v50  ;;  %2481 = vmatpush1.bf16.msra.mxu0 %v1778_v51  ;;  %v1833_v50 = vld [vmem:[#allocation2 + $0x308] sm:$0xff]  ;;  %v1835_v51 = vld [vmem:[#allocation2 + $0x318] sm:$0xff] }
 0x529   :  { %2224 = vmatprep.subr.bf16.mxu1 %v1781_v52  ;;  %2482 = vmatprep.subr.bf16.mxu0 %v1783_v53  ;;  %v1832_v52 = vld [vmem:[#allocation2 + $0x300] sm:$0xff]  ;;  %v1834_v53 = vld [vmem:[#allocation2 + $0x310] sm:$0xff] }
 0x52c   :  { %2225 = vmatpush1.bf16.msra.mxu1 %v1780_v54  ;;  %2483 = vmatpush1.bf16.msra.mxu0 %v1782_v55  ;;  %v1837_v54 = vld [vmem:[#allocation2 + $0x328] sm:$0xff]  ;;  %v1839_v55 = vld [vmem:[#allocation2 + $0x338] sm:$0xff] }
 0x52d   :  { %2226 = vmatprep.subr.bf16.mxu1 %v1785_v56  ;;  %2484 = vmatprep.subr.bf16.mxu0 %v1787_v57  ;;  %v1836_v56 = vld [vmem:[#allocation2 + $0x320] sm:$0xff]  ;;  %v1838_v57 = vld [vmem:[#allocation2 + $0x330] sm:$0xff] }
 0x530   :  { %2227 = vmatpush1.bf16.msra.mxu1 %v1784_v58  ;;  %2485 = vmatpush1.bf16.msra.mxu0 %v1786_v59  ;;  %v1841_v58 = vld [vmem:[#allocation2 + $0x348] sm:$0xff]  ;;  %v1843_v59 = vld [vmem:[#allocation2 + $0x358] sm:$0xff] }
 0x531   :  { %2228 = vmatprep.subr.bf16.mxu1 %v1789_v60  ;;  %2486 = vmatprep.subr.bf16.mxu0 %v1791_v61  ;;  %v1840_v60 = vld [vmem:[#allocation2 + $0x340] sm:$0xff]  ;;  %v1842_v61 = vld [vmem:[#allocation2 + $0x350] sm:$0xff] }
 0x534   :  { %2229 = vmatpush1.bf16.msra.mxu1 %v1788_v1  ;;  %2487 = vmatpush1.bf16.msra.mxu0 %v1790_v3  ;;  %v1845_v1 = vld [vmem:[#allocation2 + $0x368] sm:$0xff]  ;;  %v1847_v3 = vld [vmem:[#allocation2 + $0x378] sm:$0xff] }
 0x535   :  { %2230 = vmatprep.subr.bf16.mxu1 %v1793_v4  ;;  %2488 = vmatprep.subr.bf16.mxu0 %v1795_v5  ;;  %v1844_v4 = vld [vmem:[#allocation2 + $0x360] sm:$0xff]  ;;  %v1846_v5 = vld [vmem:[#allocation2 + $0x370] sm:$0xff] }
 0x538   :  { %2231 = vmatpush1.bf16.msra.mxu1 %v1792_v6  ;;  %2489 = vmatpush1.bf16.msra.mxu0 %v1794_v7  ;;  %v1849_v6 = vld [vmem:[#allocation2 + $0x388] sm:$0xff]  ;;  %v1851_v7 = vld [vmem:[#allocation2 + $0x398] sm:$0xff] }
 0x539   :  { %2232 = vmatprep.subr.bf16.mxu1 %v1797_v8  ;;  %2490 = vmatprep.subr.bf16.mxu0 %v1799_v9  ;;  %v1848_v8 = vld [vmem:[#allocation2 + $0x380] sm:$0xff]  ;;  %v1850_v9 = vld [vmem:[#allocation2 + $0x390] sm:$0xff] }
 0x53c   :  { %2233 = vmatpush1.bf16.msra.mxu1 %v1796_v10  ;;  %2491 = vmatpush1.bf16.msra.mxu0 %v1798_v11  ;;  %v1853_v10 = vld [vmem:[#allocation2 + $0x3a8] sm:$0xff]  ;;  %v1855_v11 = vld [vmem:[#allocation2 + $0x3b8] sm:$0xff] }
 0x53d   :  { %2245 = vmatprep.subr.bf16.mxu1 %v1801_v12  ;;  %2503 = vmatprep.subr.bf16.mxu0 %v1803_v13  ;;  %v1852_v12 = vld [vmem:[#allocation2 + $0x3a0] sm:$0xff]  ;;  %v1854_v13 = vld [vmem:[#allocation2 + $0x3b0] sm:$0xff] }
 0x53f   :  { %2235 = vmatmul.mubr.bf16.vlgmr.msra.gmra.mrb[8].mxu1 %v5735_v14  ;;  %2493 = vmatmul.mubr.bf16.vlgmr.msra.gmra.mrb[8].mxu0 %v5735_v14  ;;  %v1857_v14 = vld [vmem:[#allocation2 + $0x3c8] sm:$0xff] }
 0x540   :  { %2246 = vmatpush1.bf16.msra.mxu1 %v1800_v15  ;;  %2504 = vmatpush1.bf16.msra.mxu0 %v1802_v16  ;;  %v1859_v15 = vld [vmem:[#allocation2 + $0x3d8] sm:$0xff]  ;;  %v1856_v16 = vld [vmem:[#allocation2 + $0x3c0] sm:$0xff] }
 0x541   :  { %2247 = vmatprep.subr.bf16.mxu1 %v1805_v17  ;;  %2505 = vmatprep.subr.bf16.mxu0 %v1807_v18  ;;  %v1858_v17 = vld [vmem:[#allocation2 + $0x3d0] sm:$0xff]  ;;  %v1861_v18 = vld [vmem:[#allocation2 + $0x3e8] sm:$0xff] }
 0x542   :  { %2277 = vmatprep.mubr.bf16.mxu1 %v5740_v19  ;;  %2535 = vmatprep.mubr.bf16.mxu0 %v5740_v19  ;;  %v1863_v19 = vld [vmem:[#allocation2 + $0x3f8] sm:$0xff] }
 0x544   :  { %2248 = vmatpush1.bf16.msra.mxu1 %v1804_v20  ;;  %2506 = vmatpush1.bf16.msra.mxu0 %v1806_v21  ;;  %v1860_v20 = vld [vmem:[#allocation2 + $0x3e0] sm:$0xff]  ;;  %v1862_v21 = vld [vmem:[#allocation2 + $0x3f0] sm:$0xff] }
 0x545   :  { %2249 = vmatprep.subr.bf16.mxu1 %v1809_v22  ;;  %2507 = vmatprep.subr.bf16.mxu0 %v1811_v23  ;;  %v5738_v22 = vld [vmem:[%s7190_s5 + $0x8] ss:$48 sps:$4 sm:$0xff]  }
 0x546   :  { %v1865_v23 = vld [vmem:[#allocation2 + $0x408] sm:$0xff] }
 0x548   :  { %2250 = vmatpush1.bf16.msra.mxu1 %v1808_v24  ;;  %2508 = vmatpush1.bf16.msra.mxu0 %v1810_v26  ;;  %v1867_v24 = vld [vmem:[#allocation2 + $0x418] sm:$0xff]  ;;  %v1864_v26 = vld [vmem:[#allocation2 + $0x400] sm:$0xff] }
 0x549   :  { %2251 = vmatprep.subr.bf16.mxu1 %v1813_v28  ;;  %2509 = vmatprep.subr.bf16.mxu0 %v1815_v29  ;;  %v1866_v28 = vld [vmem:[#allocation2 + $0x410] sm:$0xff]  ;;  %v1869_v29 = vld [vmem:[#allocation2 + $0x428] sm:$0xff] }
 0x54c   :  { %2252 = vmatpush1.bf16.msra.mxu1 %v1812_v30  ;;  %2510 = vmatpush1.bf16.msra.mxu0 %v1814_v31  ;;  %v1871_v30 = vld [vmem:[#allocation2 + $0x438] sm:$0xff]  ;;  %v5743_v31 = vld [vmem:[%s7190_s5 + $0x14] ss:$48 sps:$4 sm:$0xff]  }
 0x54d   :  { %2253 = vmatprep.subr.bf16.mxu1 %v1817_v32  ;;  %2511 = vmatprep.subr.bf16.mxu0 %v1819_v33  ;;  %v1868_v32 = vld [vmem:[#allocation2 + $0x420] sm:$0xff]  ;;  %v1870_v33 = vld [vmem:[#allocation2 + $0x430] sm:$0xff] }
 0x550   :  { %2254 = vmatpush1.bf16.msra.mxu1 %v1816_v34  ;;  %2512 = vmatpush1.bf16.msra.mxu0 %v1818_v35  ;;  %v1873_v34 = vld [vmem:[#allocation2 + $0x448] sm:$0xff]  ;;  %v1875_v35 = vld [vmem:[#allocation2 + $0x458] sm:$0xff] }
 0x551   :  { %2255 = vmatprep.subr.bf16.mxu1 %v1821_v36  ;;  %2513 = vmatprep.subr.bf16.mxu0 %v1823_v37  ;;  %v1872_v36 = vld [vmem:[#allocation2 + $0x440] sm:$0xff]  ;;  %v1874_v37 = vld [vmem:[#allocation2 + $0x450] sm:$0xff] }
 0x554   :  { %2256 = vmatpush1.bf16.msra.mxu1 %v1820_v38  ;;  %2514 = vmatpush1.bf16.msra.mxu0 %v1822_v40  ;;  %v1877_v38 = vld [vmem:[#allocation2 + $0x468] sm:$0xff]  ;;  %v1879_v40 = vld [vmem:[#allocation2 + $0x478] sm:$0xff] }
 0x555   :  { %2257 = vmatprep.subr.bf16.mxu1 %v1825_v42  ;;  %2515 = vmatprep.subr.bf16.mxu0 %v1827_v43  ;;  %v1876_v42 = vld [vmem:[#allocation2 + $0x460] sm:$0xff]  ;;  %v1878_v43 = vld [vmem:[#allocation2 + $0x470] sm:$0xff] }
 0x558   :  { %2258 = vmatpush1.bf16.msra.mxu1 %v1824_v44  ;;  %2516 = vmatpush1.bf16.msra.mxu0 %v1826_v45  ;;  %v1881_v44 = vld [vmem:[#allocation2 + $0x488] sm:$0xff]  ;;  %v1883_v45 = vld [vmem:[#allocation2 + $0x498] sm:$0xff] }
 0x559   :  { %2259 = vmatprep.subr.bf16.mxu1 %v1829_v46  ;;  %2517 = vmatprep.subr.bf16.mxu0 %v1831_v47  ;;  %v1880_v46 = vld [vmem:[#allocation2 + $0x480] sm:$0xff]  ;;  %v1882_v47 = vld [vmem:[#allocation2 + $0x490] sm:$0xff] }
 0x55c   :  { %2260 = vmatpush1.bf16.msra.mxu1 %v1828_v48  ;;  %2518 = vmatpush1.bf16.msra.mxu0 %v1830_v49  ;;  %v1885_v48 = vld [vmem:[#allocation2 + $0x4a8] sm:$0xff]  ;;  %v1887_v49 = vld [vmem:[#allocation2 + $0x4b8] sm:$0xff] }
 0x55d   :  { %2261 = vmatprep.subr.bf16.mxu1 %v1833_v50  ;;  %2519 = vmatprep.subr.bf16.mxu0 %v1835_v51  ;;  %v1884_v50 = vld [vmem:[#allocation2 + $0x4a0] sm:$0xff]  ;;  %v1886_v51 = vld [vmem:[#allocation2 + $0x4b0] sm:$0xff] }
 0x560   :  { %2262 = vmatpush1.bf16.msra.mxu1 %v1832_v52  ;;  %2520 = vmatpush1.bf16.msra.mxu0 %v1834_v53  ;;  %v1889_v52 = vld [vmem:[#allocation2 + $0x4c8] sm:$0xff]  ;;  %v1891_v53 = vld [vmem:[#allocation2 + $0x4d8] sm:$0xff] }
 0x561   :  { %2263 = vmatprep.subr.bf16.mxu1 %v1837_v54  ;;  %2521 = vmatprep.subr.bf16.mxu0 %v1839_v55  ;;  %v1888_v54 = vld [vmem:[#allocation2 + $0x4c0] sm:$0xff]  ;;  %v1890_v55 = vld [vmem:[#allocation2 + $0x4d0] sm:$0xff] }
 0x564   :  { %2264 = vmatpush1.bf16.msra.mxu1 %v1836_v56  ;;  %2522 = vmatpush1.bf16.msra.mxu0 %v1838_v57  ;;  %v1893_v56 = vld [vmem:[#allocation2 + $0x4e8] sm:$0xff]  ;;  %v1895_v57 = vld [vmem:[#allocation2 + $0x4f8] sm:$0xff] }
 0x565   :  { %2265 = vmatprep.subr.bf16.mxu1 %v1841_v58  ;;  %2523 = vmatprep.subr.bf16.mxu0 %v1843_v59  ;;  %v1892_v58 = vld [vmem:[#allocation2 + $0x4e0] sm:$0xff]  ;;  %v1894_v59 = vld [vmem:[#allocation2 + $0x4f0] sm:$0xff] }
 0x568   :  { %2266 = vmatpush1.bf16.msra.mxu1 %v1840_v60  ;;  %2524 = vmatpush1.bf16.msra.mxu0 %v1842_v61  ;;  %v1897_v60 = vld [vmem:[#allocation2 + $0x508] sm:$0xff]  ;;  %v1899_v61 = vld [vmem:[#allocation2 + $0x518] sm:$0xff] }
 0x569   :  { %2267 = vmatprep.subr.bf16.mxu1 %v1845_v1  ;;  %2525 = vmatprep.subr.bf16.mxu0 %v1847_v3  ;;  %v1896_v1 = vld [vmem:[#allocation2 + $0x500] sm:$0xff]  ;;  %v1898_v3 = vld [vmem:[#allocation2 + $0x510] sm:$0xff] }
 0x56c   :  { %2268 = vmatpush1.bf16.msra.mxu1 %v1844_v4  ;;  %2526 = vmatpush1.bf16.msra.mxu0 %v1846_v5  ;;  %v1901_v4 = vld [vmem:[#allocation2 + $0x528] sm:$0xff]  ;;  %v1903_v5 = vld [vmem:[#allocation2 + $0x538] sm:$0xff] }
 0x56d   :  { %2269 = vmatprep.subr.bf16.mxu1 %v1849_v6  ;;  %2527 = vmatprep.subr.bf16.mxu0 %v1851_v7  ;;  %v1900_v6 = vld [vmem:[#allocation2 + $0x520] sm:$0xff]  ;;  %v1902_v7 = vld [vmem:[#allocation2 + $0x530] sm:$0xff] }
 0x570   :  { %2270 = vmatpush1.bf16.msra.mxu1 %v1848_v8  ;;  %2528 = vmatpush1.bf16.msra.mxu0 %v1850_v9  ;;  %v1905_v8 = vld [vmem:[#allocation2 + $0x548] sm:$0xff]  ;;  %v1907_v9 = vld [vmem:[#allocation2 + $0x558] sm:$0xff] }
 0x571   :  { %2271 = vmatprep.subr.bf16.mxu1 %v1853_v10  ;;  %2529 = vmatprep.subr.bf16.mxu0 %v1855_v11  ;;  %v1904_v10 = vld [vmem:[#allocation2 + $0x540] sm:$0xff]  ;;  %v1906_v11 = vld [vmem:[#allocation2 + $0x550] sm:$0xff] }
 0x574   :  { %2272 = vmatpush1.bf16.msra.mxu1 %v1852_v12  ;;  %2530 = vmatpush1.bf16.msra.mxu0 %v1854_v13  ;;  %v1909_v12 = vld [vmem:[#allocation2 + $0x568] sm:$0xff]  ;;  %v1911_v13 = vld [vmem:[#allocation2 + $0x578] sm:$0xff] }
 0x575   :  { %2273 = vmatprep.subr.bf16.mxu1 %v1857_v14  ;;  %2531 = vmatprep.subr.bf16.mxu0 %v1859_v15  ;;  %v1908_v14 = vld [vmem:[#allocation2 + $0x560] sm:$0xff]  ;;  %v1910_v15 = vld [vmem:[#allocation2 + $0x570] sm:$0xff] }
 0x578   :  { %2274 = vmatpush1.bf16.msra.mxu1 %v1856_v16  ;;  %2532 = vmatpush1.bf16.msra.mxu0 %v1858_v17  ;;  %v1913_v16 = vld [vmem:[#allocation2 + $0x588] sm:$0xff]  ;;  %v1915_v17 = vld [vmem:[#allocation2 + $0x598] sm:$0xff] }
 0x579   :  { %2275 = vmatprep.subr.bf16.mxu1 %v1861_v18  ;;  %2533 = vmatprep.subr.bf16.mxu0 %v1863_v19  ;;  %v1912_v18 = vld [vmem:[#allocation2 + $0x580] sm:$0xff]  ;;  %v1914_v19 = vld [vmem:[#allocation2 + $0x590] sm:$0xff] }
 0x57c   :  { %2276 = vmatpush1.bf16.msra.mxu1 %v1860_v20  ;;  %2534 = vmatpush1.bf16.msra.mxu0 %v1862_v21  ;;  %v1917_v20 = vld [vmem:[#allocation2 + $0x5a8] sm:$0xff]  ;;  %v1919_v21 = vld [vmem:[#allocation2 + $0x5b8] sm:$0xff] }
 0x57d   :  { %2288 = vmatprep.subr.bf16.mxu1 %v1865_v23  ;;  %2546 = vmatprep.subr.bf16.mxu0 %v1867_v24  ;;  %v1918_v23 = vld [vmem:[#allocation2 + $0x5b0] sm:$0xff]  ;;  %v1921_v24 = vld [vmem:[#allocation2 + $0x5c8] sm:$0xff] }
 0x57f   :  { %2278 = vmatmul.mubr.bf16.vlgmr.msra.gmra.mrb[8].mxu1 %v5738_v22  ;;  %2536 = vmatmul.mubr.bf16.vlgmr.msra.gmra.mrb[8].mxu0 %v5738_v22  ;;  %v1916_v22 = vld [vmem:[#allocation2 + $0x5a0] sm:$0xff] }
 0x580   :  { %2289 = vmatpush1.bf16.msra.mxu1 %v1864_v26  ;;  %2547 = vmatpush1.bf16.msra.mxu0 %v1866_v28  ;;  %v1923_v26 = vld [vmem:[#allocation2 + $0x5d8] sm:$0xff]  ;;  %v1920_v28 = vld [vmem:[#allocation2 + $0x5c0] sm:$0xff] }
 0x581   :  { %2290 = vmatprep.subr.bf16.mxu1 %v1869_v29  ;;  %2548 = vmatprep.subr.bf16.mxu0 %v1871_v30  ;;  %v1922_v29 = vld [vmem:[#allocation2 + $0x5d0] sm:$0xff]  ;;  %v1925_v30 = vld [vmem:[#allocation2 + $0x5e8] sm:$0xff] }
 0x582   :  { %2320 = vmatprep.mubr.bf16.mxu1 %v5743_v31  ;;  %2578 = vmatprep.mubr.bf16.mxu0 %v5743_v31  ;;  %v1927_v31 = vld [vmem:[#allocation2 + $0x5f8] sm:$0xff] }
 0x584   :  { %2291 = vmatpush1.bf16.msra.mxu1 %v1868_v32  ;;  %2549 = vmatpush1.bf16.msra.mxu0 %v1870_v33  ;;  %v1924_v32 = vld [vmem:[#allocation2 + $0x5e0] sm:$0xff]  ;;  %v1926_v33 = vld [vmem:[#allocation2 + $0x5f0] sm:$0xff] }
 0x585   :  { %2292 = vmatprep.subr.bf16.mxu1 %v1873_v34  ;;  %2550 = vmatprep.subr.bf16.mxu0 %v1875_v35  ;;  %v5741_v34 = vld [vmem:[%s7190_s5 + $0x10] ss:$48 sps:$4 sm:$0xff]   ;;  %v1929_v35 = vld [vmem:[#allocation2 + $0x608] sm:$0xff] }
 0x588   :  { %2293 = vmatpush1.bf16.msra.mxu1 %v1872_v36  ;;  %2551 = vmatpush1.bf16.msra.mxu0 %v1874_v37  ;;  %v1931_v36 = vld [vmem:[#allocation2 + $0x618] sm:$0xff]  ;;  %v1928_v37 = vld [vmem:[#allocation2 + $0x600] sm:$0xff] }
 0x589   :  { %2294 = vmatprep.subr.bf16.mxu1 %v1877_v38  ;;  %2552 = vmatprep.subr.bf16.mxu0 %v1879_v40  ;;  %v1930_v38 = vld [vmem:[#allocation2 + $0x610] sm:$0xff]  ;;  %v1933_v40 = vld [vmem:[#allocation2 + $0x628] sm:$0xff] }
 0x58c   :  { %2295 = vmatpush1.bf16.msra.mxu1 %v1876_v42  ;;  %2553 = vmatpush1.bf16.msra.mxu0 %v1878_v43  ;;  %v1935_v42 = vld [vmem:[#allocation2 + $0x638] sm:$0xff] }
 0x58d   :  { %2296 = vmatprep.subr.bf16.mxu1 %v1881_v44  ;;  %2554 = vmatprep.subr.bf16.mxu0 %v1883_v45  ;;  %v5746_v43 = vld [vmem:[%s7190_s5 + $0x1c] ss:$48 sps:$4 sm:$0xff]   ;;  %v1932_v44 = vld [vmem:[#allocation2 + $0x620] sm:$0xff]  ;;  %v1934_v45 = vld [vmem:[#allocation2 + $0x630] sm:$0xff] }
 0x590   :  { %2297 = vmatpush1.bf16.msra.mxu1 %v1880_v46  ;;  %2555 = vmatpush1.bf16.msra.mxu0 %v1882_v47  ;;  %v1937_v46 = vld [vmem:[#allocation2 + $0x648] sm:$0xff]  ;;  %v1939_v47 = vld [vmem:[#allocation2 + $0x658] sm:$0xff] }
 0x591   :  { %2298 = vmatprep.subr.bf16.mxu1 %v1885_v48  ;;  %2556 = vmatprep.subr.bf16.mxu0 %v1887_v49  ;;  %v1936_v48 = vld [vmem:[#allocation2 + $0x640] sm:$0xff]  ;;  %v1938_v49 = vld [vmem:[#allocation2 + $0x650] sm:$0xff] }
 0x594   :  { %2299 = vmatpush1.bf16.msra.mxu1 %v1884_v50  ;;  %2557 = vmatpush1.bf16.msra.mxu0 %v1886_v51  ;;  %v1941_v50 = vld [vmem:[#allocation2 + $0x668] sm:$0xff]  ;;  %v1943_v51 = vld [vmem:[#allocation2 + $0x678] sm:$0xff] }
 0x595   :  { %2300 = vmatprep.subr.bf16.mxu1 %v1889_v52  ;;  %2558 = vmatprep.subr.bf16.mxu0 %v1891_v53  ;;  %v1940_v52 = vld [vmem:[#allocation2 + $0x660] sm:$0xff]  ;;  %v1942_v53 = vld [vmem:[#allocation2 + $0x670] sm:$0xff] }
 0x598   :  { %2301 = vmatpush1.bf16.msra.mxu1 %v1888_v54  ;;  %2559 = vmatpush1.bf16.msra.mxu0 %v1890_v55  ;;  %v1945_v54 = vld [vmem:[#allocation2 + $0x688] sm:$0xff]  ;;  %v1947_v55 = vld [vmem:[#allocation2 + $0x698] sm:$0xff] }
 0x599   :  { %2302 = vmatprep.subr.bf16.mxu1 %v1893_v56  ;;  %2560 = vmatprep.subr.bf16.mxu0 %v1895_v57  ;;  %v1944_v56 = vld [vmem:[#allocation2 + $0x680] sm:$0xff]  ;;  %v1946_v57 = vld [vmem:[#allocation2 + $0x690] sm:$0xff] }
 0x59c   :  { %2303 = vmatpush1.bf16.msra.mxu1 %v1892_v58  ;;  %2561 = vmatpush1.bf16.msra.mxu0 %v1894_v59  ;;  %v1949_v58 = vld [vmem:[#allocation2 + $0x6a8] sm:$0xff]  ;;  %v1951_v59 = vld [vmem:[#allocation2 + $0x6b8] sm:$0xff] }
 0x59d   :  { %2304 = vmatprep.subr.bf16.mxu1 %v1897_v60  ;;  %2562 = vmatprep.subr.bf16.mxu0 %v1899_v61  ;;  %v1948_v60 = vld [vmem:[#allocation2 + $0x6a0] sm:$0xff]  ;;  %v1950_v61 = vld [vmem:[#allocation2 + $0x6b0] sm:$0xff] }
 0x5a0   :  { %2305 = vmatpush1.bf16.msra.mxu1 %v1896_v1  ;;  %2563 = vmatpush1.bf16.msra.mxu0 %v1898_v3  ;;  %v1953_v1 = vld [vmem:[#allocation2 + $0x6c8] sm:$0xff]  ;;  %v1955_v3 = vld [vmem:[#allocation2 + $0x6d8] sm:$0xff] }
 0x5a1   :  { %2306 = vmatprep.subr.bf16.mxu1 %v1901_v4  ;;  %2564 = vmatprep.subr.bf16.mxu0 %v1903_v5  ;;  %v1952_v4 = vld [vmem:[#allocation2 + $0x6c0] sm:$0xff]  ;;  %v1954_v5 = vld [vmem:[#allocation2 + $0x6d0] sm:$0xff] }
 0x5a4   :  { %2307 = vmatpush1.bf16.msra.mxu1 %v1900_v6  ;;  %2565 = vmatpush1.bf16.msra.mxu0 %v1902_v7  ;;  %v1957_v6 = vld [vmem:[#allocation2 + $0x6e8] sm:$0xff]  ;;  %v1959_v7 = vld [vmem:[#allocation2 + $0x6f8] sm:$0xff] }
 0x5a5   :  { %2308 = vmatprep.subr.bf16.mxu1 %v1905_v8  ;;  %2566 = vmatprep.subr.bf16.mxu0 %v1907_v9  ;;  %v1956_v8 = vld [vmem:[#allocation2 + $0x6e0] sm:$0xff]  ;;  %v1958_v9 = vld [vmem:[#allocation2 + $0x6f0] sm:$0xff] }
 0x5a8   :  { %2309 = vmatpush1.bf16.msra.mxu1 %v1904_v10  ;;  %2567 = vmatpush1.bf16.msra.mxu0 %v1906_v11  ;;  %v1961_v10 = vld [vmem:[#allocation2 + $0x708] sm:$0xff]  ;;  %v1963_v11 = vld [vmem:[#allocation2 + $0x718] sm:$0xff] }
 0x5a9   :  { %2310 = vmatprep.subr.bf16.mxu1 %v1909_v12  ;;  %2568 = vmatprep.subr.bf16.mxu0 %v1911_v13  ;;  %v1960_v12 = vld [vmem:[#allocation2 + $0x700] sm:$0xff]  ;;  %v1962_v13 = vld [vmem:[#allocation2 + $0x710] sm:$0xff] }
 0x5ac   :  { %2311 = vmatpush1.bf16.msra.mxu1 %v1908_v14  ;;  %2569 = vmatpush1.bf16.msra.mxu0 %v1910_v15  ;;  %v1965_v14 = vld [vmem:[#allocation2 + $0x728] sm:$0xff]  ;;  %v1967_v15 = vld [vmem:[#allocation2 + $0x738] sm:$0xff] }
 0x5ad   :  { %2312 = vmatprep.subr.bf16.mxu1 %v1913_v16  ;;  %2570 = vmatprep.subr.bf16.mxu0 %v1915_v17  ;;  %v1964_v16 = vld [vmem:[#allocation2 + $0x720] sm:$0xff]  ;;  %v1966_v17 = vld [vmem:[#allocation2 + $0x730] sm:$0xff] }
 0x5b0   :  { %2313 = vmatpush1.bf16.msra.mxu1 %v1912_v18  ;;  %2571 = vmatpush1.bf16.msra.mxu0 %v1914_v19  ;;  %v1969_v18 = vld [vmem:[#allocation2 + $0x748] sm:$0xff]  ;;  %v1971_v19 = vld [vmem:[#allocation2 + $0x758] sm:$0xff] }
 0x5b1   :  { %2314 = vmatprep.subr.bf16.mxu1 %v1917_v20  ;;  %2572 = vmatprep.subr.bf16.mxu0 %v1919_v21  ;;  %v1968_v20 = vld [vmem:[#allocation2 + $0x740] sm:$0xff]  ;;  %v1970_v21 = vld [vmem:[#allocation2 + $0x750] sm:$0xff] }
 0x5b4   :  { %2315 = vmatpush1.bf16.msra.mxu1 %v1916_v22  ;;  %2573 = vmatpush1.bf16.msra.mxu0 %v1918_v23  ;;  %v1973_v22 = vld [vmem:[#allocation2 + $0x768] sm:$0xff]  ;;  %v1975_v23 = vld [vmem:[#allocation2 + $0x778] sm:$0xff] }
 0x5b5   :  { %2316 = vmatprep.subr.bf16.mxu1 %v1921_v24  ;;  %2574 = vmatprep.subr.bf16.mxu0 %v1923_v26  ;;  %v1972_v24 = vld [vmem:[#allocation2 + $0x760] sm:$0xff]  ;;  %v1974_v26 = vld [vmem:[#allocation2 + $0x770] sm:$0xff] }
 0x5b8   :  { %2317 = vmatpush1.bf16.msra.mxu1 %v1920_v28  ;;  %2575 = vmatpush1.bf16.msra.mxu0 %v1922_v29  ;;  %v1977_v28 = vld [vmem:[#allocation2 + $0x788] sm:$0xff]  ;;  %v1979_v29 = vld [vmem:[#allocation2 + $0x798] sm:$0xff] }
 0x5b9   :  { %2318 = vmatprep.subr.bf16.mxu1 %v1925_v30  ;;  %2576 = vmatprep.subr.bf16.mxu0 %v1927_v31  ;;  %v1976_v30 = vld [vmem:[#allocation2 + $0x780] sm:$0xff]  ;;  %v1978_v31 = vld [vmem:[#allocation2 + $0x790] sm:$0xff] }
 0x5bc   :  { %2319 = vmatpush1.bf16.msra.mxu1 %v1924_v32  ;;  %2577 = vmatpush1.bf16.msra.mxu0 %v1926_v33  ;;  %v1981_v32 = vld [vmem:[#allocation2 + $0x7a8] sm:$0xff]  ;;  %v1983_v33 = vld [vmem:[#allocation2 + $0x7b8] sm:$0xff] }
 0x5bd   :  { %2331 = vmatprep.subr.bf16.mxu1 %v1929_v35  ;;  %2589 = vmatprep.subr.bf16.mxu0 %v1931_v36  ;;  %v1982_v35 = vld [vmem:[#allocation2 + $0x7b0] sm:$0xff]  ;;  %v1985_v36 = vld [vmem:[#allocation2 + $0x7c8] sm:$0xff] }
 0x5bf   :  { %2321 = vmatmul.mubr.bf16.vlgmr.msra.gmra.mrb[8].mxu1 %v5741_v34  ;;  %2579 = vmatmul.mubr.bf16.vlgmr.msra.gmra.mrb[8].mxu0 %v5741_v34  ;;  %v1980_v34 = vld [vmem:[#allocation2 + $0x7a0] sm:$0xff] }
 0x5c0   :  { %2332 = vmatpush1.bf16.msra.mxu1 %v1928_v37  ;;  %2590 = vmatpush1.bf16.msra.mxu0 %v1930_v38  ;;  %v1987_v37 = vld [vmem:[#allocation2 + $0x7d8] sm:$0xff]  ;;  %v1984_v38 = vld [vmem:[#allocation2 + $0x7c0] sm:$0xff] }
 0x5c1   :  { %2333 = vmatprep.subr.bf16.mxu1 %v1933_v40  ;;  %2591 = vmatprep.subr.bf16.mxu0 %v1935_v42  ;;  %v1986_v40 = vld [vmem:[#allocation2 + $0x7d0] sm:$0xff]  ;;  %v1989_v42 = vld [vmem:[#allocation2 + $0x7e8] sm:$0xff] }
 0x5c2   :  { %2363 = vmatprep.mubr.bf16.mxu1 %v5746_v43  ;;  %2621 = vmatprep.mubr.bf16.mxu0 %v5746_v43  ;;  %v1991_v43 = vld [vmem:[#allocation2 + $0x7f8] sm:$0xff] }
 0x5c4   :  { %2334 = vmatpush1.bf16.msra.mxu1 %v1932_v44  ;;  %2592 = vmatpush1.bf16.msra.mxu0 %v1934_v45  ;;  %v1988_v44 = vld [vmem:[#allocation2 + $0x7e0] sm:$0xff]  ;;  %v1990_v45 = vld [vmem:[#allocation2 + $0x7f0] sm:$0xff] }
 0x5c5   :  { %2335 = vmatprep.subr.bf16.mxu1 %v1937_v46  ;;  %2593 = vmatprep.subr.bf16.mxu0 %v1939_v47  ;;  %v1993_v46 = vld [vmem:[#allocation2 + $0x808] sm:$0xff]  ;;  %v1995_v47 = vld [vmem:[#allocation2 + $0x818] sm:$0xff] }
 0x5c8   :  { %2336 = vmatpush1.bf16.msra.mxu1 %v1936_v48  ;;  %2594 = vmatpush1.bf16.msra.mxu0 %v1938_v49  ;;  %v5744_v48 = vld [vmem:[%s7190_s5 + $0x18] ss:$48 sps:$4 sm:$0xff]   ;;  %v1992_v49 = vld [vmem:[#allocation2 + $0x800] sm:$0xff] }
 0x5c9   :  { %2337 = vmatprep.subr.bf16.mxu1 %v1941_v50  ;;  %2595 = vmatprep.subr.bf16.mxu0 %v1943_v51  ;;  %v1994_v50 = vld [vmem:[#allocation2 + $0x810] sm:$0xff]  ;;  %v1997_v51 = vld [vmem:[#allocation2 + $0x828] sm:$0xff] }
 0x5cc   :  { %2338 = vmatpush1.bf16.msra.mxu1 %v1940_v52  ;;  %2596 = vmatpush1.bf16.msra.mxu0 %v1942_v53  ;;  %v1999_v52 = vld [vmem:[#allocation2 + $0x838] sm:$0xff]  ;;  %v5749_v53 = vld [vmem:[%s7190_s5 + $0x24] ss:$48 sps:$4 sm:$0xff]  }
 0x5cd   :  { %2339 = vmatprep.subr.bf16.mxu1 %v1945_v54  ;;  %2597 = vmatprep.subr.bf16.mxu0 %v1947_v55  ;;  %v1996_v54 = vld [vmem:[#allocation2 + $0x820] sm:$0xff]  ;;  %v1998_v55 = vld [vmem:[#allocation2 + $0x830] sm:$0xff] }
 0x5d0   :  { %2340 = vmatpush1.bf16.msra.mxu1 %v1944_v56  ;;  %2598 = vmatpush1.bf16.msra.mxu0 %v1946_v57  ;;  %v2001_v56 = vld [vmem:[#allocation2 + $0x848] sm:$0xff]  ;;  %v2003_v57 = vld [vmem:[#allocation2 + $0x858] sm:$0xff] }
 0x5d1   :  { %2341 = vmatprep.subr.bf16.mxu1 %v1949_v58  ;;  %2599 = vmatprep.subr.bf16.mxu0 %v1951_v59  ;;  %v2000_v58 = vld [vmem:[#allocation2 + $0x840] sm:$0xff]  ;;  %v2002_v59 = vld [vmem:[#allocation2 + $0x850] sm:$0xff] }
 0x5d4   :  { %2342 = vmatpush1.bf16.msra.mxu1 %v1948_v60  ;;  %2600 = vmatpush1.bf16.msra.mxu0 %v1950_v61  ;;  %v2005_v60 = vld [vmem:[#allocation2 + $0x868] sm:$0xff]  ;;  %v2007_v61 = vld [vmem:[#allocation2 + $0x878] sm:$0xff] }
 0x5d5   :  { %2343 = vmatprep.subr.bf16.mxu1 %v1953_v1  ;;  %2601 = vmatprep.subr.bf16.mxu0 %v1955_v3  ;;  %v2004_v1 = vld [vmem:[#allocation2 + $0x860] sm:$0xff]  ;;  %v2006_v3 = vld [vmem:[#allocation2 + $0x870] sm:$0xff] }
 0x5d8   :  { %2344 = vmatpush1.bf16.msra.mxu1 %v1952_v4  ;;  %2602 = vmatpush1.bf16.msra.mxu0 %v1954_v5  ;;  %v2009_v4 = vld [vmem:[#allocation2 + $0x888] sm:$0xff]  ;;  %v2011_v5 = vld [vmem:[#allocation2 + $0x898] sm:$0xff] }
 0x5d9   :  { %2345 = vmatprep.subr.bf16.mxu1 %v1957_v6  ;;  %2603 = vmatprep.subr.bf16.mxu0 %v1959_v7  ;;  %v2008_v6 = vld [vmem:[#allocation2 + $0x880] sm:$0xff]  ;;  %v2010_v7 = vld [vmem:[#allocation2 + $0x890] sm:$0xff] }
 0x5dc   :  { %2346 = vmatpush1.bf16.msra.mxu1 %v1956_v8  ;;  %2604 = vmatpush1.bf16.msra.mxu0 %v1958_v9  ;;  %v2013_v8 = vld [vmem:[#allocation2 + $0x8a8] sm:$0xff]  ;;  %v2015_v9 = vld [vmem:[#allocation2 + $0x8b8] sm:$0xff] }
 0x5dd   :  { %2347 = vmatprep.subr.bf16.mxu1 %v1961_v10  ;;  %2605 = vmatprep.subr.bf16.mxu0 %v1963_v11  ;;  %v2012_v10 = vld [vmem:[#allocation2 + $0x8a0] sm:$0xff]  ;;  %v2014_v11 = vld [vmem:[#allocation2 + $0x8b0] sm:$0xff] }
 0x5e0   :  { %2348 = vmatpush1.bf16.msra.mxu1 %v1960_v12  ;;  %2606 = vmatpush1.bf16.msra.mxu0 %v1962_v13  ;;  %v2017_v12 = vld [vmem:[#allocation2 + $0x8c8] sm:$0xff]  ;;  %v2019_v13 = vld [vmem:[#allocation2 + $0x8d8] sm:$0xff] }
 0x5e1   :  { %2349 = vmatprep.subr.bf16.mxu1 %v1965_v14  ;;  %2607 = vmatprep.subr.bf16.mxu0 %v1967_v15  ;;  %v2016_v14 = vld [vmem:[#allocation2 + $0x8c0] sm:$0xff]  ;;  %v2018_v15 = vld [vmem:[#allocation2 + $0x8d0] sm:$0xff] }
 0x5e4   :  { %2350 = vmatpush1.bf16.msra.mxu1 %v1964_v16  ;;  %2608 = vmatpush1.bf16.msra.mxu0 %v1966_v17  ;;  %v2021_v16 = vld [vmem:[#allocation2 + $0x8e8] sm:$0xff]  ;;  %v2023_v17 = vld [vmem:[#allocation2 + $0x8f8] sm:$0xff] }
 0x5e5   :  { %2351 = vmatprep.subr.bf16.mxu1 %v1969_v18  ;;  %2609 = vmatprep.subr.bf16.mxu0 %v1971_v19  ;;  %v2020_v18 = vld [vmem:[#allocation2 + $0x8e0] sm:$0xff]  ;;  %v2022_v19 = vld [vmem:[#allocation2 + $0x8f0] sm:$0xff] }
 0x5e8   :  { %2352 = vmatpush1.bf16.msra.mxu1 %v1968_v20  ;;  %2610 = vmatpush1.bf16.msra.mxu0 %v1970_v21  ;;  %v2025_v20 = vld [vmem:[#allocation2 + $0x908] sm:$0xff]  ;;  %v2027_v21 = vld [vmem:[#allocation2 + $0x918] sm:$0xff] }
 0x5e9   :  { %2353 = vmatprep.subr.bf16.mxu1 %v1973_v22  ;;  %2611 = vmatprep.subr.bf16.mxu0 %v1975_v23  ;;  %v2024_v22 = vld [vmem:[#allocation2 + $0x900] sm:$0xff]  ;;  %v2026_v23 = vld [vmem:[#allocation2 + $0x910] sm:$0xff] }
 0x5ec   :  { %2354 = vmatpush1.bf16.msra.mxu1 %v1972_v24  ;;  %2612 = vmatpush1.bf16.msra.mxu0 %v1974_v26  ;;  %v2029_v24 = vld [vmem:[#allocation2 + $0x928] sm:$0xff]  ;;  %v2031_v26 = vld [vmem:[#allocation2 + $0x938] sm:$0xff] }
 0x5ed   :  { %2355 = vmatprep.subr.bf16.mxu1 %v1977_v28  ;;  %2613 = vmatprep.subr.bf16.mxu0 %v1979_v29  ;;  %v2028_v28 = vld [vmem:[#allocation2 + $0x920] sm:$0xff]  ;;  %v2030_v29 = vld [vmem:[#allocation2 + $0x930] sm:$0xff] }
 0x5f0   :  { %2356 = vmatpush1.bf16.msra.mxu1 %v1976_v30  ;;  %2614 = vmatpush1.bf16.msra.mxu0 %v1978_v31  ;;  %v2033_v30 = vld [vmem:[#allocation2 + $0x948] sm:$0xff]  ;;  %v2035_v31 = vld [vmem:[#allocation2 + $0x958] sm:$0xff] }
 0x5f1   :  { %2357 = vmatprep.subr.bf16.mxu1 %v1981_v32  ;;  %2615 = vmatprep.subr.bf16.mxu0 %v1983_v33  ;;  %v2032_v32 = vld [vmem:[#allocation2 + $0x940] sm:$0xff]  ;;  %v2034_v33 = vld [vmem:[#allocation2 + $0x950] sm:$0xff] }
 0x5f4   :  { %2358 = vmatpush1.bf16.msra.mxu1 %v1980_v34  ;;  %2616 = vmatpush1.bf16.msra.mxu0 %v1982_v35  ;;  %v2037_v34 = vld [vmem:[#allocation2 + $0x968] sm:$0xff]  ;;  %v2039_v35 = vld [vmem:[#allocation2 + $0x978] sm:$0xff] }
 0x5f5   :  { %2359 = vmatprep.subr.bf16.mxu1 %v1985_v36  ;;  %2617 = vmatprep.subr.bf16.mxu0 %v1987_v37  ;;  %v2036_v36 = vld [vmem:[#allocation2 + $0x960] sm:$0xff]  ;;  %v2038_v37 = vld [vmem:[#allocation2 + $0x970] sm:$0xff] }
 0x5f8   :  { %2360 = vmatpush1.bf16.msra.mxu1 %v1984_v38  ;;  %2618 = vmatpush1.bf16.msra.mxu0 %v1986_v40  ;;  %v2041_v38 = vld [vmem:[#allocation2 + $0x988] sm:$0xff]  ;;  %v2043_v40 = vld [vmem:[#allocation2 + $0x998] sm:$0xff] }
 0x5f9   :  { %2361 = vmatprep.subr.bf16.mxu1 %v1989_v42  ;;  %2619 = vmatprep.subr.bf16.mxu0 %v1991_v43  ;;  %v2040_v42 = vld [vmem:[#allocation2 + $0x980] sm:$0xff]  ;;  %v2042_v43 = vld [vmem:[#allocation2 + $0x990] sm:$0xff] }
 0x5fc   :  { %2362 = vmatpush1.bf16.msra.mxu1 %v1988_v44  ;;  %2620 = vmatpush1.bf16.msra.mxu0 %v1990_v45  ;;  %v2045_v44 = vld [vmem:[#allocation2 + $0x9a8] sm:$0xff]  ;;  %v2047_v45 = vld [vmem:[#allocation2 + $0x9b8] sm:$0xff] }
 0x5fd   :  { %2374 = vmatprep.subr.bf16.mxu1 %v1993_v46  ;;  %2632 = vmatprep.subr.bf16.mxu0 %v1995_v47  ;;  %v2044_v46 = vld [vmem:[#allocation2 + $0x9a0] sm:$0xff]  ;;  %v2046_v47 = vld [vmem:[#allocation2 + $0x9b0] sm:$0xff] }
 0x5ff   :  { %2364 = vmatmul.mubr.bf16.vlgmr.msra.gmra.mrb[8].mxu1 %v5744_v48  ;;  %2622 = vmatmul.mubr.bf16.vlgmr.msra.gmra.mrb[8].mxu0 %v5744_v48  ;;  %v2049_v48 = vld [vmem:[#allocation2 + $0x9c8] sm:$0xff] }
 0x600   :  { %2375 = vmatpush1.bf16.msra.mxu1 %v1992_v49  ;;  %2633 = vmatpush1.bf16.msra.mxu0 %v1994_v50  ;;  %v2051_v49 = vld [vmem:[#allocation2 + $0x9d8] sm:$0xff]  ;;  %v2048_v50 = vld [vmem:[#allocation2 + $0x9c0] sm:$0xff] }
 0x601   :  { %2376 = vmatprep.subr.bf16.mxu1 %v1997_v51  ;;  %2634 = vmatprep.subr.bf16.mxu0 %v1999_v52  ;;  %v2050_v51 = vld [vmem:[#allocation2 + $0x9d0] sm:$0xff]  ;;  %v2053_v52 = vld [vmem:[#allocation2 + $0x9e8] sm:$0xff] }
 0x602   :  { %2406 = vmatprep.mubr.bf16.mxu1 %v5749_v53  ;;  %2664 = vmatprep.mubr.bf16.mxu0 %v5749_v53  ;;  %v2055_v53 = vld [vmem:[#allocation2 + $0x9f8] sm:$0xff] }
 0x604   :  { %2377 = vmatpush1.bf16.msra.mxu1 %v1996_v54  ;;  %2635 = vmatpush1.bf16.msra.mxu0 %v1998_v55  ;;  %v2052_v54 = vld [vmem:[#allocation2 + $0x9e0] sm:$0xff]  ;;  %v2054_v55 = vld [vmem:[#allocation2 + $0x9f0] sm:$0xff] }
 0x605   :  { %2378 = vmatprep.subr.bf16.mxu1 %v2001_v56  ;;  %2636 = vmatprep.subr.bf16.mxu0 %v2003_v57  ;;  %v2057_v56 = vld [vmem:[#allocation2 + $0xa08] sm:$0xff]  ;;  %v2059_v57 = vld [vmem:[#allocation2 + $0xa18] sm:$0xff] }
 0x608   :  { %2379 = vmatpush1.bf16.msra.mxu1 %v2000_v58  ;;  %2637 = vmatpush1.bf16.msra.mxu0 %v2002_v59  ;;  %v5747_v58 = vld [vmem:[%s7190_s5 + $0x20] ss:$48 sps:$4 sm:$0xff]  }
 0x609   :  { %2380 = vmatprep.subr.bf16.mxu1 %v2005_v60  ;;  %2638 = vmatprep.subr.bf16.mxu0 %v2007_v61  ;;  %v2056_v59 = vld [vmem:[#allocation2 + $0xa00] sm:$0xff]  ;;  %v2058_v60 = vld [vmem:[#allocation2 + $0xa10] sm:$0xff]  ;;  %v2061_v61 = vld [vmem:[#allocation2 + $0xa28] sm:$0xff] }
 0x60c   :  { %2381 = vmatpush1.bf16.msra.mxu1 %v2004_v1  ;;  %2639 = vmatpush1.bf16.msra.mxu0 %v2006_v3  ;;  %v2063_v1 = vld [vmem:[#allocation2 + $0xa38] sm:$0xff] }
 0x60d   :  { %2382 = vmatprep.subr.bf16.mxu1 %v2009_v4  ;;  %2640 = vmatprep.subr.bf16.mxu0 %v2011_v5  ;;  %v5752_v3 = vld [vmem:[%s7190_s5 + $0x2c] ss:$48 sps:$4 sm:$0xff]   ;;  %v2060_v4 = vld [vmem:[#allocation2 + $0xa20] sm:$0xff]  ;;  %v2062_v5 = vld [vmem:[#allocation2 + $0xa30] sm:$0xff] }
 0x610   :  { %2383 = vmatpush1.bf16.msra.mxu1 %v2008_v6  ;;  %2641 = vmatpush1.bf16.msra.mxu0 %v2010_v7  ;;  %v2065_v6 = vld [vmem:[#allocation2 + $0xa48] sm:$0xff]  ;;  %v2067_v7 = vld [vmem:[#allocation2 + $0xa58] sm:$0xff] }
 0x611   :  { %2384 = vmatprep.subr.bf16.mxu1 %v2013_v8  ;;  %2642 = vmatprep.subr.bf16.mxu0 %v2015_v9  ;;  %v2064_v8 = vld [vmem:[#allocation2 + $0xa40] sm:$0xff]  ;;  %v2066_v9 = vld [vmem:[#allocation2 + $0xa50] sm:$0xff] }
 0x614   :  { %2385 = vmatpush1.bf16.msra.mxu1 %v2012_v10  ;;  %2643 = vmatpush1.bf16.msra.mxu0 %v2014_v11  ;;  %v2069_v10 = vld [vmem:[#allocation2 + $0xa68] sm:$0xff]  ;;  %v2071_v11 = vld [vmem:[#allocation2 + $0xa78] sm:$0xff] }
 0x615   :  { %2386 = vmatprep.subr.bf16.mxu1 %v2017_v12  ;;  %2644 = vmatprep.subr.bf16.mxu0 %v2019_v13  ;;  %v2068_v12 = vld [vmem:[#allocation2 + $0xa60] sm:$0xff]  ;;  %v2070_v13 = vld [vmem:[#allocation2 + $0xa70] sm:$0xff] }
 0x618   :  { %2387 = vmatpush1.bf16.msra.mxu1 %v2016_v14  ;;  %2645 = vmatpush1.bf16.msra.mxu0 %v2018_v15  ;;  %v2073_v14 = vld [vmem:[#allocation2 + $0xa88] sm:$0xff]  ;;  %v2075_v15 = vld [vmem:[#allocation2 + $0xa98] sm:$0xff] }
 0x619   :  { %2388 = vmatprep.subr.bf16.mxu1 %v2021_v16  ;;  %2646 = vmatprep.subr.bf16.mxu0 %v2023_v17  ;;  %v2072_v16 = vld [vmem:[#allocation2 + $0xa80] sm:$0xff]  ;;  %v2074_v17 = vld [vmem:[#allocation2 + $0xa90] sm:$0xff] }
 0x61c   :  { %2389 = vmatpush1.bf16.msra.mxu1 %v2020_v18  ;;  %2647 = vmatpush1.bf16.msra.mxu0 %v2022_v19  ;;  %v2077_v18 = vld [vmem:[#allocation2 + $0xaa8] sm:$0xff]  ;;  %v2079_v19 = vld [vmem:[#allocation2 + $0xab8] sm:$0xff] }
 0x61d   :  { %2390 = vmatprep.subr.bf16.mxu1 %v2025_v20  ;;  %2648 = vmatprep.subr.bf16.mxu0 %v2027_v21  ;;  %v2076_v20 = vld [vmem:[#allocation2 + $0xaa0] sm:$0xff]  ;;  %v2078_v21 = vld [vmem:[#allocation2 + $0xab0] sm:$0xff] }
 0x620   :  { %2391 = vmatpush1.bf16.msra.mxu1 %v2024_v22  ;;  %2649 = vmatpush1.bf16.msra.mxu0 %v2026_v23  ;;  %v2081_v22 = vld [vmem:[#allocation2 + $0xac8] sm:$0xff]  ;;  %v2083_v23 = vld [vmem:[#allocation2 + $0xad8] sm:$0xff] }
 0x621   :  { %2392 = vmatprep.subr.bf16.mxu1 %v2029_v24  ;;  %2650 = vmatprep.subr.bf16.mxu0 %v2031_v26  ;;  %v2080_v24 = vld [vmem:[#allocation2 + $0xac0] sm:$0xff]  ;;  %v2082_v26 = vld [vmem:[#allocation2 + $0xad0] sm:$0xff] }
 0x624   :  { %2393 = vmatpush1.bf16.msra.mxu1 %v2028_v28  ;;  %2651 = vmatpush1.bf16.msra.mxu0 %v2030_v29  ;;  %v2085_v28 = vld [vmem:[#allocation2 + $0xae8] sm:$0xff]  ;;  %v2087_v29 = vld [vmem:[#allocation2 + $0xaf8] sm:$0xff] }
 0x625   :  { %2394 = vmatprep.subr.bf16.mxu1 %v2033_v30  ;;  %2652 = vmatprep.subr.bf16.mxu0 %v2035_v31  ;;  %v2084_v30 = vld [vmem:[#allocation2 + $0xae0] sm:$0xff]  ;;  %v2086_v31 = vld [vmem:[#allocation2 + $0xaf0] sm:$0xff] }
 0x628   :  { %2395 = vmatpush1.bf16.msra.mxu1 %v2032_v32  ;;  %2653 = vmatpush1.bf16.msra.mxu0 %v2034_v33  ;;  %v2089_v32 = vld [vmem:[#allocation2 + $0xb08] sm:$0xff]  ;;  %v2091_v33 = vld [vmem:[#allocation2 + $0xb18] sm:$0xff] }
 0x629   :  { %2396 = vmatprep.subr.bf16.mxu1 %v2037_v34  ;;  %2654 = vmatprep.subr.bf16.mxu0 %v2039_v35  ;;  %v2088_v34 = vld [vmem:[#allocation2 + $0xb00] sm:$0xff]  ;;  %v2090_v35 = vld [vmem:[#allocation2 + $0xb10] sm:$0xff] }
 0x62c   :  { %2397 = vmatpush1.bf16.msra.mxu1 %v2036_v36  ;;  %2655 = vmatpush1.bf16.msra.mxu0 %v2038_v37  ;;  %v2093_v36 = vld [vmem:[#allocation2 + $0xb28] sm:$0xff]  ;;  %v2095_v37 = vld [vmem:[#allocation2 + $0xb38] sm:$0xff] }
 0x62d   :  { %2398 = vmatprep.subr.bf16.mxu1 %v2041_v38  ;;  %2656 = vmatprep.subr.bf16.mxu0 %v2043_v40  ;;  %v2092_v38 = vld [vmem:[#allocation2 + $0xb20] sm:$0xff]  ;;  %v2094_v40 = vld [vmem:[#allocation2 + $0xb30] sm:$0xff] }
 0x630   :  { %2399 = vmatpush1.bf16.msra.mxu1 %v2040_v42  ;;  %2657 = vmatpush1.bf16.msra.mxu0 %v2042_v43  ;;  %v2097_v42 = vld [vmem:[#allocation2 + $0xb48] sm:$0xff]  ;;  %v2099_v43 = vld [vmem:[#allocation2 + $0xb58] sm:$0xff] }
 0x631   :  { %2400 = vmatprep.subr.bf16.mxu1 %v2045_v44  ;;  %2658 = vmatprep.subr.bf16.mxu0 %v2047_v45  ;;  %v2096_v44 = vld [vmem:[#allocation2 + $0xb40] sm:$0xff]  ;;  %v2098_v45 = vld [vmem:[#allocation2 + $0xb50] sm:$0xff] }
 0x634   :  { %2401 = vmatpush1.bf16.msra.mxu1 %v2044_v46  ;;  %2659 = vmatpush1.bf16.msra.mxu0 %v2046_v47  ;;  %v2101_v46 = vld [vmem:[#allocation2 + $0xb68] sm:$0xff]  ;;  %v2103_v47 = vld [vmem:[#allocation2 + $0xb78] sm:$0xff] }
 0x635   :  { %2402 = vmatprep.subr.bf16.mxu1 %v2049_v48  ;;  %2660 = vmatprep.subr.bf16.mxu0 %v2051_v49  ;;  %v2100_v48 = vld [vmem:[#allocation2 + $0xb60] sm:$0xff]  ;;  %v2102_v49 = vld [vmem:[#allocation2 + $0xb70] sm:$0xff] }
 0x638   :  { %2403 = vmatpush1.bf16.msra.mxu1 %v2048_v50  ;;  %2661 = vmatpush1.bf16.msra.mxu0 %v2050_v51  ;;  %v2105_v50 = vld [vmem:[#allocation2 + $0xb88] sm:$0xff]  ;;  %v2107_v51 = vld [vmem:[#allocation2 + $0xb98] sm:$0xff] }
 0x639   :  { %2404 = vmatprep.subr.bf16.mxu1 %v2053_v52  ;;  %2662 = vmatprep.subr.bf16.mxu0 %v2055_v53  ;;  %v2104_v52 = vld [vmem:[#allocation2 + $0xb80] sm:$0xff]  ;;  %v2106_v53 = vld [vmem:[#allocation2 + $0xb90] sm:$0xff] }
 0x63c   :  { %2405 = vmatpush1.bf16.msra.mxu1 %v2052_v54  ;;  %2663 = vmatpush1.bf16.msra.mxu0 %v2054_v55  ;;  %v2109_v54 = vld [vmem:[#allocation2 + $0xba8] sm:$0xff]  ;;  %v2111_v55 = vld [vmem:[#allocation2 + $0xbb8] sm:$0xff] }
 0x63d   :  { %2417 = vmatprep.subr.bf16.mxu1 %v2057_v56  ;;  %2675 = vmatprep.subr.bf16.mxu0 %v2059_v57  ;;  %v2108_v56 = vld [vmem:[#allocation2 + $0xba0] sm:$0xff]  ;;  %v2110_v57 = vld [vmem:[#allocation2 + $0xbb0] sm:$0xff] }
 0x63f   :  { %2407 = vmatmul.mubr.bf16.vlgmr.msra.gmra.mrb[8].mxu1 %v5747_v58  ;;  %2665 = vmatmul.mubr.bf16.vlgmr.msra.gmra.mrb[8].mxu0 %v5747_v58  ;;  %v2113_v58 = vld [vmem:[#allocation2 + $0xbc8] sm:$0xff] }
 0x640   :  { %2418 = vmatpush1.bf16.msra.mxu1 %v2056_v59  ;;  %2676 = vmatpush1.bf16.msra.mxu0 %v2058_v60  ;;  %v2115_v59 = vld [vmem:[#allocation2 + $0xbd8] sm:$0xff]  ;;  %v2112_v60 = vld [vmem:[#allocation2 + $0xbc0] sm:$0xff] }
 0x641   :  { %2419 = vmatprep.subr.bf16.mxu1 %v2061_v61  ;;  %2677 = vmatprep.subr.bf16.mxu0 %v2063_v1  ;;  %v2114_v61 = vld [vmem:[#allocation2 + $0xbd0] sm:$0xff]  ;;  %v2117_v1 = vld [vmem:[#allocation2 + $0xbe8] sm:$0xff] }
 0x642   :  { %2449 = vmatprep.mubr.bf16.mxu1 %v5752_v3  ;;  %2707 = vmatprep.mubr.bf16.mxu0 %v5752_v3  ;;  %v2119_v3 = vld [vmem:[#allocation2 + $0xbf8] sm:$0xff] }
 0x644   :  { %2420 = vmatpush1.bf16.msra.mxu1 %v2060_v4  ;;  %2678 = vmatpush1.bf16.msra.mxu0 %v2062_v5  ;;  %v2116_v4 = vld [vmem:[#allocation2 + $0xbe0] sm:$0xff]  ;;  %v2118_v5 = vld [vmem:[#allocation2 + $0xbf0] sm:$0xff] }
 0x645   :  { %2421 = vmatprep.subr.bf16.mxu1 %v2065_v6  ;;  %2679 = vmatprep.subr.bf16.mxu0 %v2067_v7  ;;  %v5755_v6 = vld [vmem:[#allocation8 + $0x4] ss:$8 sps:$4 sm:$0xff]  }
 0x646   :  { %v5750_v7 = vld [vmem:[%s7190_s5 + $0x28] ss:$48 sps:$4 sm:$0xff]  }
 0x648   :  { %2422 = vmatpush1.bf16.msra.mxu1 %v2064_v8  ;;  %2680 = vmatpush1.bf16.msra.mxu0 %v2066_v9  ;;  %v5753_v8 = vld [vmem:[#allocation8] ss:$8 sps:$4 sm:$0xff]   ;;  %v5758_v9 = vld [vmem:[#allocation8 + $0x14] ss:$8 sps:$4 sm:$0xff]  }
 0x649   :  { %2423 = vmatprep.subr.bf16.mxu1 %v2069_v10  ;;  %2681 = vmatprep.subr.bf16.mxu0 %v2071_v11  ;;  %v5756_v10 = vld [vmem:[#allocation8 + $0x10] ss:$8 sps:$4 sm:$0xff]   ;;  %v5761_v11 = vld [vmem:[#allocation8 + $0x24] ss:$8 sps:$4 sm:$0xff]  }
 0x64c   :  { %2424 = vmatpush1.bf16.msra.mxu1 %v2068_v12  ;;  %2682 = vmatpush1.bf16.msra.mxu0 %v2070_v13  ;;  %v5759_v12 = vld [vmem:[#allocation8 + $0x20] ss:$8 sps:$4 sm:$0xff]   ;;  %v5764_v13 = vld [vmem:[#allocation8 + $0x34] ss:$8 sps:$4 sm:$0xff]  }
 0x64d   :  { %2425 = vmatprep.subr.bf16.mxu1 %v2073_v14  ;;  %2683 = vmatprep.subr.bf16.mxu0 %v2075_v15  ;;  %v5762_v14 = vld [vmem:[#allocation8 + $0x30] ss:$8 sps:$4 sm:$0xff]   ;;  %v5767_v15 = vld [vmem:[#allocation8 + $0x44] ss:$8 sps:$4 sm:$0xff]  }
 0x650   :  { %2426 = vmatpush1.bf16.msra.mxu1 %v2072_v16  ;;  %2684 = vmatpush1.bf16.msra.mxu0 %v2074_v17  ;;  %v5765_v16 = vld [vmem:[#allocation8 + $0x40] ss:$8 sps:$4 sm:$0xff]   ;;  %v5770_v17 = vld [vmem:[#allocation8 + $0x54] ss:$8 sps:$4 sm:$0xff]  }
 0x651   :  { %2427 = vmatprep.subr.bf16.mxu1 %v2077_v18  ;;  %2685 = vmatprep.subr.bf16.mxu0 %v2079_v19  ;;  %v5768_v18 = vld [vmem:[#allocation8 + $0x50] ss:$8 sps:$4 sm:$0xff]   ;;  %v5773_v19 = vld [vmem:[#allocation8 + $0x64] ss:$8 sps:$4 sm:$0xff]  }
 0x654   :  { %2428 = vmatpush1.bf16.msra.mxu1 %v2076_v20  ;;  %2686 = vmatpush1.bf16.msra.mxu0 %v2078_v21  ;;  %v5771_v20 = vld [vmem:[#allocation8 + $0x60] ss:$8 sps:$4 sm:$0xff]   ;;  %v5776_v21 = vld [vmem:[#allocation8 + $0x74] ss:$8 sps:$4 sm:$0xff]  }
 0x655   :  { %2429 = vmatprep.subr.bf16.mxu1 %v2081_v22  ;;  %2687 = vmatprep.subr.bf16.mxu0 %v2083_v23  ;;  %v5774_v22 = vld [vmem:[#allocation8 + $0x70] ss:$8 sps:$4 sm:$0xff]   ;;  %v5779_v23 = vld [vmem:[#allocation8 + $0x84] ss:$8 sps:$4 sm:$0xff]  }
 0x658   :  { %2430 = vmatpush1.bf16.msra.mxu1 %v2080_v24  ;;  %2688 = vmatpush1.bf16.msra.mxu0 %v2082_v26  ;;  %v5777_v24 = vld [vmem:[#allocation8 + $0x80] ss:$8 sps:$4 sm:$0xff]   ;;  %v5782_v26 = vld [vmem:[#allocation8 + $0x94] ss:$8 sps:$4 sm:$0xff]  }
 0x659   :  { %2431 = vmatprep.subr.bf16.mxu1 %v2085_v28  ;;  %2689 = vmatprep.subr.bf16.mxu0 %v2087_v29  ;;  %v5780_v28 = vld [vmem:[#allocation8 + $0x90] ss:$8 sps:$4 sm:$0xff]   ;;  %v5785_v29 = vld [vmem:[#allocation8 + $0xa4] ss:$8 sps:$4 sm:$0xff]  }
 0x65c   :  { %2432 = vmatpush1.bf16.msra.mxu1 %v2084_v30  ;;  %2690 = vmatpush1.bf16.msra.mxu0 %v2086_v31  ;;  %v5783_v30 = vld [vmem:[#allocation8 + $0xa0] ss:$8 sps:$4 sm:$0xff]   ;;  %v5788_v31 = vld [vmem:[#allocation8 + $0xb4] ss:$8 sps:$4 sm:$0xff]  }
 0x65d   :  { %2433 = vmatprep.subr.bf16.mxu1 %v2089_v32  ;;  %2691 = vmatprep.subr.bf16.mxu0 %v2091_v33  ;;  %v5786_v32 = vld [vmem:[#allocation8 + $0xb0] ss:$8 sps:$4 sm:$0xff]   ;;  %v5791_v33 = vld [vmem:[#allocation8 + $0xc4] ss:$8 sps:$4 sm:$0xff]  }
 0x660   :  { %2434 = vmatpush1.bf16.msra.mxu1 %v2088_v34  ;;  %2692 = vmatpush1.bf16.msra.mxu0 %v2090_v35  ;;  %v5789_v34 = vld [vmem:[#allocation8 + $0xc0] ss:$8 sps:$4 sm:$0xff]   ;;  %v5794_v35 = vld [vmem:[#allocation8 + $0xd4] ss:$8 sps:$4 sm:$0xff]  }
 0x661   :  { %2435 = vmatprep.subr.bf16.mxu1 %v2093_v36  ;;  %2693 = vmatprep.subr.bf16.mxu0 %v2095_v37  ;;  %v5792_v36 = vld [vmem:[#allocation8 + $0xd0] ss:$8 sps:$4 sm:$0xff]   ;;  %v5797_v37 = vld [vmem:[#allocation8 + $0xe4] ss:$8 sps:$4 sm:$0xff]  }
 0x664   :  { %2436 = vmatpush1.bf16.msra.mxu1 %v2092_v38  ;;  %2694 = vmatpush1.bf16.msra.mxu0 %v2094_v40  ;;  %v5795_v38 = vld [vmem:[#allocation8 + $0xe0] ss:$8 sps:$4 sm:$0xff]   ;;  %v5800_v40 = vld [vmem:[#allocation8 + $0xf4] ss:$8 sps:$4 sm:$0xff]  }
 0x665   :  { %2437 = vmatprep.subr.bf16.mxu1 %v2097_v42  ;;  %2695 = vmatprep.subr.bf16.mxu0 %v2099_v43  ;;  %v5798_v42 = vld [vmem:[#allocation8 + $0xf0] ss:$8 sps:$4 sm:$0xff]   ;;  %v5803_v43 = vld [vmem:[#allocation8 + $0x104] ss:$8 sps:$4 sm:$0xff]  }
 0x668   :  { %2438 = vmatpush1.bf16.msra.mxu1 %v2096_v44  ;;  %2696 = vmatpush1.bf16.msra.mxu0 %v2098_v45  ;;  %v5849_v44 = vld [vmem:[#allocation11] ss:$8 sps:$4 sm:$0xff]   ;;  %v5851_v45 = vld [vmem:[#allocation11 + $0x4] ss:$8 sps:$4 sm:$0xff]  }
 0x669   :  { %2439 = vmatprep.subr.bf16.mxu1 %v2101_v46  ;;  %2697 = vmatprep.subr.bf16.mxu0 %v2103_v47  ;;  %v5854_v46 = vld [vmem:[#allocation11 + $0x14] ss:$8 sps:$4 sm:$0xff]   ;;  %v5852_v47 = vld [vmem:[#allocation11 + $0x10] ss:$8 sps:$4 sm:$0xff]  }
 0x66c   :  { %2440 = vmatpush1.bf16.msra.mxu1 %v2100_v48  ;;  %2698 = vmatpush1.bf16.msra.mxu0 %v2102_v49  ;;  %v5857_v48 = vld [vmem:[#allocation11 + $0x24] ss:$8 sps:$4 sm:$0xff]   ;;  %v5855_v49 = vld [vmem:[#allocation11 + $0x20] ss:$8 sps:$4 sm:$0xff]  }
 0x66d   :  { %2441 = vmatprep.subr.bf16.mxu1 %v2105_v50  ;;  %2699 = vmatprep.subr.bf16.mxu0 %v2107_v51  ;;  %v5860_v50 = vld [vmem:[#allocation11 + $0x34] ss:$8 sps:$4 sm:$0xff]   ;;  %v5858_v51 = vld [vmem:[#allocation11 + $0x30] ss:$8 sps:$4 sm:$0xff]  }
 0x670   :  { %2442 = vmatpush1.bf16.msra.mxu1 %v2104_v52  ;;  %2700 = vmatpush1.bf16.msra.mxu0 %v2106_v53  ;;  %v5863_v52 = vld [vmem:[#allocation11 + $0x44] ss:$8 sps:$4 sm:$0xff]   ;;  %v5861_v53 = vld [vmem:[#allocation11 + $0x40] ss:$8 sps:$4 sm:$0xff]  }
 0x671   :  { %2443 = vmatprep.subr.bf16.mxu1 %v2109_v54  ;;  %2701 = vmatprep.subr.bf16.mxu0 %v2111_v55  ;;  %v5866_v54 = vld [vmem:[#allocation11 + $0x54] ss:$8 sps:$4 sm:$0xff]   ;;  %v5864_v55 = vld [vmem:[#allocation11 + $0x50] ss:$8 sps:$4 sm:$0xff]  }
 0x674   :  { %2444 = vmatpush1.bf16.msra.mxu1 %v2108_v56  ;;  %2702 = vmatpush1.bf16.msra.mxu0 %v2110_v57  ;;  %v5869_v56 = vld [vmem:[#allocation11 + $0x64] ss:$8 sps:$4 sm:$0xff]   ;;  %v5867_v57 = vld [vmem:[#allocation11 + $0x60] ss:$8 sps:$4 sm:$0xff]  }
 0x675   :  { %2445 = vmatprep.subr.bf16.mxu1 %v2113_v58  ;;  %2703 = vmatprep.subr.bf16.mxu0 %v2115_v59  ;;  %v5872_v58 = vld [vmem:[#allocation11 + $0x74] ss:$8 sps:$4 sm:$0xff]   ;;  %v5870_v59 = vld [vmem:[#allocation11 + $0x70] ss:$8 sps:$4 sm:$0xff]  }
 0x678   :  { %2446 = vmatpush1.bf16.msra.mxu1 %v2112_v60  ;;  %2704 = vmatpush1.bf16.msra.mxu0 %v2114_v61  ;;  %v5875_v60 = vld [vmem:[#allocation11 + $0x84] ss:$8 sps:$4 sm:$0xff]   ;;  %v5873_v61 = vld [vmem:[#allocation11 + $0x80] ss:$8 sps:$4 sm:$0xff]  }
 0x679   :  { %2447 = vmatprep.subr.bf16.mxu1 %v2117_v1  ;;  %2705 = vmatprep.subr.bf16.mxu0 %v2119_v3  ;;  %v5878_v1 = vld [vmem:[#allocation11 + $0x94] ss:$8 sps:$4 sm:$0xff]   ;;  %v5876_v3 = vld [vmem:[#allocation11 + $0x90] ss:$8 sps:$4 sm:$0xff]  }
 0x67c   :  { %2448 = vmatpush1.bf16.msra.mxu1 %v2116_v4  ;;  %2706 = vmatpush1.bf16.msra.mxu0 %v2118_v5  ;;  %v5881_v4 = vld [vmem:[#allocation11 + $0xa4] ss:$8 sps:$4 sm:$0xff]   ;;  %v5879_v5 = vld [vmem:[#allocation11 + $0xa0] ss:$8 sps:$4 sm:$0xff]  }
 0x67d   :  { %3142 = vmatprep.subr.bf16.mxu1 %v5755_v6  ;;  %3434 = vmatprep.subr.bf16.mxu0 %v5851_v45  ;;  %v5884_v6 = vld [vmem:[#allocation11 + $0xb4] ss:$8 sps:$4 sm:$0xff]  }
 0x67f   :  { %2450 = vmatmul.mubr.bf16.vlgmr.msra.gmra.mrb[8].mxu1 %v5750_v7  ;;  %2708 = vmatmul.mubr.bf16.vlgmr.msra.gmra.mrb[8].mxu0 %v5750_v7  ;;  %v5882_v7 = vld [vmem:[#allocation11 + $0xb0] ss:$8 sps:$4 sm:$0xff]  }
 0x680   :  { %3143 = vmatpush1.bf16.msra.mxu1 %v5753_v8  ;;  %3435 = vmatpush1.bf16.msra.mxu0 %v5849_v44  ;;  %v2120_v8 = vld [vmem:[#allocation6] sm:$0xf] }
 0x681   :  { %3144 = vmatprep.subr.bf16.mxu1 %v5758_v9  ;;  %3436 = vmatprep.subr.bf16.mxu0 %v5854_v46  ;;  %v5887_v9 = vld [vmem:[#allocation11 + $0xc4] ss:$8 sps:$4 sm:$0xff]  }
 0x684   :  { %3145 = vmatpush1.bf16.msra.mxu1 %v5756_v10  ;;  %3437 = vmatpush1.bf16.msra.mxu0 %v5852_v47  ;;  %v2125_v10 = vrot.slane %v2120_v8, %v7005_v62 }
 0x685   :  { %3146 = vmatprep.subr.bf16.mxu1 %v5761_v11  ;;  %3438 = vmatprep.subr.bf16.mxu0 %v5857_v48  ;;  %v2133_v11 = vrot.slane %v2120_v8, %v7011_v25 }
 0x688   :  { %3147 = vmatpush1.bf16.msra.mxu1 %v5759_v12  ;;  %3439 = vmatpush1.bf16.msra.mxu0 %v5855_v49  ;;  %v5885_v12 = vld [vmem:[#allocation11 + $0xc0] ss:$8 sps:$4 sm:$0xff]  }
 0x689   :  { %3148 = vmatprep.subr.bf16.mxu1 %v5764_v13  ;;  %3440 = vmatprep.subr.bf16.mxu0 %v5860_v50  ;;  %v2129_v13 = vrot.slane %v2120_v8, %v7007_v0 }
 0x68c   :  { %3149 = vmatpush1.bf16.msra.mxu1 %v5762_v14  ;;  %3441 = vmatpush1.bf16.msra.mxu0 %v5858_v51  ;;  %v2137_v14 = vrot.slane %v2120_v8, %v7013_v27  ;;  %v5821_v8 = vld [vmem:[#allocation8 + $0x164] ss:$8 sps:$4 sm:$0xff]  }
 0x68d   :  { %3150 = vmatprep.subr.bf16.mxu1 %v5767_v15  ;;  %3442 = vmatprep.subr.bf16.mxu0 %v5863_v52  ;;  %v5890_v15 = vld [vmem:[#allocation11 + $0xd4] ss:$8 sps:$4 sm:$0xff]  }
 0x690   :  { %3151 = vmatpush1.bf16.msra.mxu1 %v5765_v16  ;;  %3443 = vmatpush1.bf16.msra.mxu0 %v5861_v53 }
 0x691   :  { %3152 = vmatprep.subr.bf16.mxu1 %v5770_v17  ;;  %3444 = vmatprep.subr.bf16.mxu0 %v5866_v54 }
 0x694   :  { %3153 = vmatpush1.bf16.msra.mxu1 %v5768_v18  ;;  %3445 = vmatpush1.bf16.msra.mxu0 %v5864_v55 }
 0x695   :  { %3154 = vmatprep.subr.bf16.mxu1 %v5773_v19  ;;  %3446 = vmatprep.subr.bf16.mxu0 %v5869_v56  ;;  %v5801_v56 = vld [vmem:[#allocation8 + $0x100] ss:$8 sps:$4 sm:$0xff]  }
 0x698   :  { %3155 = vmatpush1.bf16.msra.mxu1 %v5771_v20  ;;  %3447 = vmatpush1.bf16.msra.mxu0 %v5867_v57 }
 0x699   :  { %3156 = vmatprep.subr.bf16.mxu1 %v5776_v21  ;;  %3448 = vmatprep.subr.bf16.mxu0 %v5872_v58  ;;  %v5806_v58 = vld [vmem:[#allocation8 + $0x114] ss:$8 sps:$4 sm:$0xff]  }
 0x69c   :  { %3157 = vmatpush1.bf16.msra.mxu1 %v5774_v22  ;;  %3449 = vmatpush1.bf16.msra.mxu0 %v5870_v59  ;;  %v5888_v22 = vld [vmem:[#allocation11 + $0xd0] ss:$8 sps:$4 sm:$0xff]  }
 0x69d   :  { %3158 = vmatprep.subr.bf16.mxu1 %v5779_v23  ;;  %3450 = vmatprep.subr.bf16.mxu0 %v5875_v60  ;;  %v5804_v59 = vld [vmem:[#allocation8 + $0x110] ss:$8 sps:$4 sm:$0xff]   ;;  %v5809_v60 = vld [vmem:[#allocation8 + $0x124] ss:$8 sps:$4 sm:$0xff]  }
 0x6a0   :  { %3159 = vmatpush1.bf16.msra.mxu1 %v5777_v24  ;;  %3451 = vmatpush1.bf16.msra.mxu0 %v5873_v61  ;;  %v5807_v61 = vld [vmem:[#allocation8 + $0x120] ss:$8 sps:$4 sm:$0xff]  }
 0x6a1   :  { %3160 = vmatprep.subr.bf16.mxu1 %v5782_v26  ;;  %3452 = vmatprep.subr.bf16.mxu0 %v5878_v1  ;;  %v5812_v1 = vld [vmem:[#allocation8 + $0x134] ss:$8 sps:$4 sm:$0xff]  }
 0x6a4   :  { %3161 = vmatpush1.bf16.msra.mxu1 %v5780_v28  ;;  %3453 = vmatpush1.bf16.msra.mxu0 %v5876_v3  ;;  %v5810_v3 = vld [vmem:[#allocation8 + $0x130] ss:$8 sps:$4 sm:$0xff]  }
 0x6a5   :  { %3162 = vmatprep.subr.bf16.mxu1 %v5785_v29  ;;  %3454 = vmatprep.subr.bf16.mxu0 %v5881_v4  ;;  %v5815_v4 = vld [vmem:[#allocation8 + $0x144] ss:$8 sps:$4 sm:$0xff]  }
 0x6a8   :  { %3163 = vmatpush1.bf16.msra.mxu1 %v5783_v30  ;;  %3455 = vmatpush1.bf16.msra.mxu0 %v5879_v5  ;;  %v5813_v5 = vld [vmem:[#allocation8 + $0x140] ss:$8 sps:$4 sm:$0xff]  }
 0x6a9   :  { %3164 = vmatprep.subr.bf16.mxu1 %v5788_v31  ;;  %3456 = vmatprep.subr.bf16.mxu0 %v5884_v6  ;;  %v5818_v6 = vld [vmem:[#allocation8 + $0x154] ss:$8 sps:$4 sm:$0xff]  }
 0x6ac   :  { %3165 = vmatpush1.bf16.msra.mxu1 %v5786_v32  ;;  %3457 = vmatpush1.bf16.msra.mxu0 %v5882_v7  ;;  %v5816_v7 = vld [vmem:[#allocation8 + $0x150] ss:$8 sps:$4 sm:$0xff]  }
 0x6ad   :  { %3166 = vmatprep.subr.bf16.mxu1 %v5791_v33  ;;  %3458 = vmatprep.subr.bf16.mxu0 %v5887_v9  ;;  %v5819_v9 = vld [vmem:[#allocation8 + $0x160] ss:$8 sps:$4 sm:$0xff]  }
 0x6b0   :  { %3167 = vmatpush1.bf16.msra.mxu1 %v5789_v34  ;;  %3459 = vmatpush1.bf16.msra.mxu0 %v5885_v12  ;;  %v5827_v12 = vld [vmem:[#allocation8 + $0x184] ss:$8 sps:$4 sm:$0xff]  }
 0x6b1   :  { %3168 = vmatprep.subr.bf16.mxu1 %v5794_v35  ;;  %3460 = vmatprep.subr.bf16.mxu0 %v5890_v15  ;;  %v5828_v15 = vld [vmem:[#allocation8 + $0x190] ss:$8 sps:$4 sm:$0xff]  }
 0x6b4   :  { %3169 = vmatpush1.bf16.msra.mxu1 %v5792_v36  ;;  %3461 = vmatpush1.bf16.msra.mxu0 %v5888_v22  ;;  %v5842_v22 = vld [vmem:[#allocation8 + $0x1d4] ss:$8 sps:$4 sm:$0xff]  }
 0x6b5   :  { %3170 = vmatprep.subr.bf16.mxu1 %v5797_v37 }
 0x6b8   :  { %3171 = vmatpush1.bf16.msra.mxu1 %v5795_v38 }
 0x6b9   :  { %3172 = vmatprep.subr.bf16.mxu1 %v5800_v40 }
 0x6bc   :  { %3173 = vmatpush1.bf16.msra.mxu1 %v5798_v42 }
 0x6bd   :  { %3185 = vmatprep.subr.bf16.mxu1 %v5803_v43 }
 0x752   :  { %v2451_v16 = vpop.f32.mrb[8].mxu1  ;;  %v2709_v17 = vpop.f32.mrb[8].mxu0 }
 0x753   :  { %v5361_v18 = vadd.f32 %v2451_v16, %v2125_v10  ;;  %v5365_v19 = vadd.f32 %v2709_v17, %v2133_v11  ;;  %v2453_v20 = vpop.f32.mrb[9].mxu1  ;;  %v2711_v21 = vpop.f32.mrb[9].mxu0  ;;  %v5833_v16 = vld [vmem:[#allocation8 + $0x1a4] ss:$8 sps:$4 sm:$0xff]   ;;  %v5831_v17 = vld [vmem:[#allocation8 + $0x1a0] ss:$8 sps:$4 sm:$0xff]  }
 0x754   :  { %v5362_v23 = vadd.f32 %v2453_v20, %v2129_v13  ;;  %v5366_v24 = vadd.f32 %v2711_v21, %v2137_v14  ;;  %v2455_v26 = vpop.f32.mrb[10].mxu1  ;;  %v2713_v28 = vpop.f32.mrb[10].mxu0  ;;  %v5839_v20 = vld [vmem:[#allocation8 + $0x1c4] ss:$8 sps:$4 sm:$0xff]   ;;  %v5837_v21 = vld [vmem:[#allocation8 + $0x1c0] ss:$8 sps:$4 sm:$0xff]  }
 0x755   :  { %vm2718_vm12 = vcmp.ge.f32.partialorder %v5361_v18, 0.0  ;;  %v2726_v29 = vmul.f32 0.01, %v5361_v18  ;;  %vm2720_vm13 = vcmp.ge.f32.partialorder %v5365_v19, 0.0  ;;  %v2728_v30 = vmul.f32 0.01, %v5365_v19 }
 0x756   :  { %vm2719_vm14 = vcmp.ge.f32.partialorder %v5362_v23, 0.0  ;;  %v2727_v31 = vmul.f32 0.01, %v5362_v23  ;;  %vm2721_vm15 = vcmp.ge.f32.partialorder %v5366_v24, 0.0  ;;  %v2729_v32 = vmul.f32 0.01, %v5366_v24 }
 0x757   :  { %v5363_v33 = vadd.f32 %v2455_v26, %v2125_v10  ;;  %v5367_v34 = vadd.f32 %v2713_v28, %v2133_v11  ;;  %v2457_v35 = vpop.f32.mrb[11].mxu1  ;;  %v2715_v36 = vpop.f32.mrb[11].mxu0  ;;  %v2734_v37 = vsel %vm2718_vm12, %v5361_v18, %v2726_v29  ;;  %v7061_v38 = vsel %vm2720_vm13, %v5365_v19, %v2728_v30  ;;  %v5824_v10 = vld [vmem:[#allocation8 + $0x174] ss:$8 sps:$4 sm:$0xff]   ;;  %v5822_v11 = vld [vmem:[#allocation8 + $0x170] ss:$8 sps:$4 sm:$0xff]  }
 0x758   :  { %v5364_v40 = vadd.f32 %v2457_v35, %v2129_v13  ;;  %v5368_v42 = vadd.f32 %v2715_v36, %v2137_v14  ;;  %v2735_v49 = vsel %vm2719_vm14, %v5362_v23, %v2727_v31  ;;  %v2737_v50 = vsel %vm2721_vm15, %v5366_v24, %v2729_v32  ;;  %v5825_v13 = vld [vmem:[#allocation8 + $0x180] ss:$8 sps:$4 sm:$0xff]   ;;  %v5830_v14 = vld [vmem:[#allocation8 + $0x194] ss:$8 sps:$4 sm:$0xff]   ;;  %v5834_v19 = vld [vmem:[#allocation8 + $0x1b0] ss:$8 sps:$4 sm:$0xff]  }
 0x759   :  { %vm2722_vm0 = vcmp.ge.f32.partialorder %v5363_v33, 0.0  ;;  %v2730_v43 = vmul.f32 0.01, %v5363_v33  ;;  %vm2724_vm1 = vcmp.ge.f32.partialorder %v5367_v34, 0.0  ;;  %v2732_v44 = vmul.f32 0.01, %v5367_v34 }
 0x75a   :  { %vm2723_vm2 = vcmp.ge.f32.partialorder %v5364_v40, 0.0  ;;  %v2731_v45 = vmul.f32 0.01, %v5364_v40  ;;  %vm2725_vm3 = vcmp.ge.f32.partialorder %v5368_v42, 0.0  ;;  %v2733_v46 = vmul.f32 0.01, %v5368_v42 }
 0x75b   :  { %v2738_v47 = vsel %vm2722_vm0, %v5363_v33, %v2730_v43  ;;  %v7063_v48 = vsel %vm2724_vm1, %v5367_v34, %v2732_v44  ;;  %v5836_v18 = vld [vmem:[#allocation8 + $0x1b4] ss:$8 sps:$4 sm:$0xff]   ;;  %v5840_v23 = vld [vmem:[#allocation8 + $0x1d0] ss:$8 sps:$4 sm:$0xff]   ;;  %v5845_v24 = vld [vmem:[#allocation8 + $0x1e4] ss:$8 sps:$4 sm:$0xff]  }
 0x75c   :  { %v2806_v51 = vpack.c.bf16 %v2738_v47, %v2734_v37  ;;  %v2808_v52 = vpack.c.bf16 %v7063_v48, %v7061_v38  ;;  %v2739_v53 = vsel %vm2723_vm2, %v5364_v40, %v2731_v45  ;;  %v2741_v54 = vsel %vm2725_vm3, %v5368_v42, %v2733_v46  ;;  %v5843_v26 = vld [vmem:[#allocation8 + $0x1e0] ss:$8 sps:$4 sm:$0xff]   ;;  %v5848_v28 = vld [vmem:[#allocation8 + $0x1f4] ss:$8 sps:$4 sm:$0xff]   ;;  %v5846_v29 = vld [vmem:[#allocation8 + $0x1f0] ss:$8 sps:$4 sm:$0xff]  }
 0x75d   :  { %v2807_v55 = vpack.c.bf16 %v2739_v53, %v2735_v49  ;;  %v2809_v57 = vpack.c.bf16 %v2741_v54, %v2737_v50  ;;  %v5893_v30 = vld [vmem:[#allocation11 + $0xe4] ss:$8 sps:$4 sm:$0xff]   ;;  %v5891_v31 = vld [vmem:[#allocation11 + $0xe0] ss:$8 sps:$4 sm:$0xff]   ;;  %v5896_v32 = vld [vmem:[#allocation11 + $0xf4] ss:$8 sps:$4 sm:$0xff]  }
 0x75e   :  { %3462 = vmatprep.subr.bf16.mxu0 %v5893_v30  ;;  %v5894_v33 = vld [vmem:[#allocation11 + $0xf0] ss:$8 sps:$4 sm:$0xff]   ;;  %v2810_v38 = vld [vmem:[#allocation10] sm:$0x3] }
 0x75f   :  { %3174 = vmatprep.mubr.bf16.mxu1 %v2807_v55  ;;  %3463 = vmatpush1.bf16.msra.mxu0 %v5891_v31  ;;  %v5899_v34 = vld [vmem:[#allocation23 + $0x4] ss:$16 sps:$4 sm:$0xff]   ;;  %v5900_v35 = vld [vmem:[#allocation23 + $0x8] ss:$16 sps:$4 sm:$0xff]   ;;  %v5902_v36 = vld [vmem:[#allocation23 + $0xc] ss:$16 sps:$4 sm:$0xff]   ;;  %v2815_v42 = vrot.slane %v2810_v38, %v7005_v62  ;;  %v2819_v43 = vrot.slane %v2810_v38, %v7007_v0 }
 0x760   :  { %3175 = vmatmul.mubr.bf16.vlgmr.msra.gmra.mrb[12].mxu1 %v2806_v51  ;;  %3464 = vmatprep.subr.bf16.mxu0 %v5896_v32  ;;  %v5908_v37 = vld [vmem:[#allocation23 + $0x2c] ss:$16 sps:$4 sm:$0xff]   ;;  %v5906_v40 = vld [vmem:[#allocation23 + $0x28] ss:$16 sps:$4 sm:$0xff]   ;;  %v5897_v54 = vld [vmem:[#allocation23] ss:$16 sps:$4 sm:$0xff]  }
 0x761   :  { %3186 = vmatpush1.bf16.msra.mxu1 %v5801_v56  ;;  %3217 = vmatprep.mubr.bf16.mxu1 %v2809_v57  ;;  %v5905_v55 = vld [vmem:[#allocation23 + $0x24] ss:$16 sps:$4 sm:$0xff]   ;;  %v5903_v56 = vld [vmem:[#allocation23 + $0x20] ss:$16 sps:$4 sm:$0xff]  }
 0x762   :  { %3187 = vmatprep.subr.bf16.mxu1 %v5806_v58  ;;  %v5911_v57 = vld [vmem:[#allocation23 + $0x44] ss:$16 sps:$4 sm:$0xff]   ;;  %v5914_v58 = vld [vmem:[#allocation23 + $0x4c] ss:$16 sps:$4 sm:$0xff]  }
 0x763   :  { %3465 = vmatpush1.bf16.msra.mxu0 %v5894_v33 }
 0x764   :  { %3739 = vmatprep.subr.bf16.mxu0 %v5899_v34 }
 0x765   :  { %3188 = vmatpush1.bf16.msra.mxu1 %v5804_v59  ;;  %v5909_v59 = vld [vmem:[#allocation23 + $0x40] ss:$16 sps:$4 sm:$0xff]  }
 0x766   :  { %3189 = vmatprep.subr.bf16.mxu1 %v5809_v60  ;;  %v5912_v60 = vld [vmem:[#allocation23 + $0x48] ss:$16 sps:$4 sm:$0xff]  }
 0x769   :  { %3190 = vmatpush1.bf16.msra.mxu1 %v5807_v61  ;;  %v5917_v61 = vld [vmem:[#allocation23 + $0x64] ss:$16 sps:$4 sm:$0xff]  }
 0x76a   :  { %3191 = vmatprep.subr.bf16.mxu1 %v5812_v1  ;;  %v5920_v1 = vld [vmem:[#allocation23 + $0x6c] ss:$16 sps:$4 sm:$0xff]  }
 0x76d   :  { %3192 = vmatpush1.bf16.msra.mxu1 %v5810_v3  ;;  %v5915_v3 = vld [vmem:[#allocation23 + $0x60] ss:$16 sps:$4 sm:$0xff]  }
 0x76e   :  { %3193 = vmatprep.subr.bf16.mxu1 %v5815_v4  ;;  %v5918_v4 = vld [vmem:[#allocation23 + $0x68] ss:$16 sps:$4 sm:$0xff]  }
 0x771   :  { %3194 = vmatpush1.bf16.msra.mxu1 %v5813_v5  ;;  %v5923_v5 = vld [vmem:[#allocation23 + $0x84] ss:$16 sps:$4 sm:$0xff]  }
 0x772   :  { %3195 = vmatprep.subr.bf16.mxu1 %v5818_v6  ;;  %v5926_v6 = vld [vmem:[#allocation23 + $0x8c] ss:$16 sps:$4 sm:$0xff]  }
 0x775   :  { %3196 = vmatpush1.bf16.msra.mxu1 %v5816_v7  ;;  %v5921_v7 = vld [vmem:[#allocation23 + $0x80] ss:$16 sps:$4 sm:$0xff]  }
 0x776   :  { %3197 = vmatprep.subr.bf16.mxu1 %v5821_v8  ;;  %v5924_v8 = vld [vmem:[#allocation23 + $0x88] ss:$16 sps:$4 sm:$0xff]  }
 0x779   :  { %3198 = vmatpush1.bf16.msra.mxu1 %v5819_v9  ;;  %v5929_v9 = vld [vmem:[#allocation23 + $0xa4] ss:$16 sps:$4 sm:$0xff]  }
 0x77a   :  { %3199 = vmatprep.subr.bf16.mxu1 %v5824_v10  ;;  %v5932_v10 = vld [vmem:[#allocation23 + $0xac] ss:$16 sps:$4 sm:$0xff]  }
 0x77d   :  { %3200 = vmatpush1.bf16.msra.mxu1 %v5822_v11  ;;  %v5927_v11 = vld [vmem:[#allocation23 + $0xa0] ss:$16 sps:$4 sm:$0xff]  }
 0x77e   :  { %3201 = vmatprep.subr.bf16.mxu1 %v5827_v12  ;;  %v5930_v12 = vld [vmem:[#allocation23 + $0xa8] ss:$16 sps:$4 sm:$0xff]  }
 0x781   :  { %3202 = vmatpush1.bf16.msra.mxu1 %v5825_v13  ;;  %v5935_v13 = vld [vmem:[#allocation23 + $0xc4] ss:$16 sps:$4 sm:$0xff]  }
 0x782   :  { %3203 = vmatprep.subr.bf16.mxu1 %v5830_v14  ;;  %v5938_v14 = vld [vmem:[#allocation23 + $0xcc] ss:$16 sps:$4 sm:$0xff]  }
 0x785   :  { %3204 = vmatpush1.bf16.msra.mxu1 %v5828_v15  ;;  %v6701_v15 = vmov 0  }
 0x786   :  { %3205 = vmatprep.subr.bf16.mxu1 %v5833_v16  ;;  %v5933_v16 = vld [vmem:[#allocation23 + $0xc0] ss:$16 sps:$4 sm:$0xff]  }
 0x789   :  { %3206 = vmatpush1.bf16.msra.mxu1 %v5831_v17  ;;  %v5936_v17 = vld [vmem:[#allocation23 + $0xc8] ss:$16 sps:$4 sm:$0xff]  }
 0x78a   :  { %3207 = vmatprep.subr.bf16.mxu1 %v5836_v18  ;;  %v5941_v18 = vld [vmem:[#allocation23 + $0xe4] ss:$16 sps:$4 sm:$0xff]  }
 0x78d   :  { %3208 = vmatpush1.bf16.msra.mxu1 %v5834_v19  ;;  %v5944_v19 = vld [vmem:[#allocation23 + $0xec] ss:$16 sps:$4 sm:$0xff]  }
 0x78e   :  { %3209 = vmatprep.subr.bf16.mxu1 %v5839_v20  ;;  %v5939_v20 = vld [vmem:[#allocation23 + $0xe0] ss:$16 sps:$4 sm:$0xff]  }
 0x791   :  { %3210 = vmatpush1.bf16.msra.mxu1 %v5837_v21  ;;  %v5942_v21 = vld [vmem:[#allocation23 + $0xe8] ss:$16 sps:$4 sm:$0xff]  }
 0x792   :  { %3211 = vmatprep.subr.bf16.mxu1 %v5842_v22  ;;  %v5947_v22 = vld [vmem:[#allocation26 + $0x4] ss:$8 sps:$4 sm:$0xff]  }
 0x795   :  { %3212 = vmatpush1.bf16.msra.mxu1 %v5840_v23  ;;  %v5950_v23 = vld [vmem:[#allocation29 + $0x4] ss:$8 sps:$4 sm:$0xff]  }
 0x796   :  { %3213 = vmatprep.subr.bf16.mxu1 %v5845_v24  ;;  %v3262_v24 = vld [vmem:[#allocation13] sm:$0x3] }
 0x799   :  { %3214 = vmatpush1.bf16.msra.mxu1 %v5843_v26  ;;  %v3267_v26 = vrot.slane %v3262_v24, %v7005_v62 }
 0x79a   :  { %3215 = vmatprep.subr.bf16.mxu1 %v5848_v28  ;;  %v3271_v28 = vrot.slane %v3262_v24, %v7007_v0  ;;  %v5998_v24 = vld [vmem:[#allocation29 + $0x84] ss:$8 sps:$4 sm:$0xff]  }
 0x79d   :  { %3216 = vmatpush1.bf16.msra.mxu1 %v5846_v29 }
 0x79e   :  { %3792 = vmatprep.subr.bf16.mxu1 %v5902_v36 }
 0x7a0   :  { %3218 = vmatmul.mubr.bf16.vlgmr.msra.gmra.mrb[12].mxu1 %v2808_v52 }
 0x7a1   :  { %3793 = vmatpush1.bf16.msra.mxu1 %v5900_v35  ;;  %3824 = vmatprep.mubr.bf16.mxu1 %v6701_v15 }
 0x7a2   :  { %3794 = vmatprep.subr.bf16.mxu1 %v5908_v37 }
 0x7a5   :  { %3795 = vmatpush1.bf16.msra.mxu1 %v5906_v40 }
 0x7a6   :  { %3796 = vmatprep.subr.bf16.mxu1 %v5914_v58  ;;  %v5951_v58 = vld [vmem:[#allocation26 + $0x10] ss:$8 sps:$4 sm:$0xff]  }
 0x7a9   :  { %3797 = vmatpush1.bf16.msra.mxu1 %v5912_v60  ;;  %v5959_v60 = vld [vmem:[#allocation26 + $0x24] ss:$8 sps:$4 sm:$0xff]  }
 0x7aa   :  { %3798 = vmatprep.subr.bf16.mxu1 %v5920_v1  ;;  %v3556_v1 = vpack.c.bf16 %v7041_v2, %v7037_v63  ;;  %v5969_v63 = vld [vmem:[#allocation26 + $0x40] ss:$8 sps:$4 sm:$0xff]  }
 0x7ab   :  { %v5972_v2 = vld [vmem:[#allocation29 + $0x40] ss:$8 sps:$4 sm:$0xff]  }
 0x7ad   :  { %3799 = vmatpush1.bf16.msra.mxu1 %v5918_v4  ;;  %v5960_v4 = vld [vmem:[#allocation29 + $0x20] ss:$8 sps:$4 sm:$0xff]  }
 0x7ae   :  { %3800 = vmatprep.subr.bf16.mxu1 %v5926_v6  ;;  %v5968_v6 = vld [vmem:[#allocation29 + $0x34] ss:$8 sps:$4 sm:$0xff]  }
 0x7b1   :  { %3801 = vmatpush1.bf16.msra.mxu1 %v5924_v8  ;;  %v5966_v8 = vld [vmem:[#allocation29 + $0x30] ss:$8 sps:$4 sm:$0xff]  }
 0x7b2   :  { %3802 = vmatprep.subr.bf16.mxu1 %v5932_v10  ;;  %v5974_v10 = vld [vmem:[#allocation29 + $0x44] ss:$8 sps:$4 sm:$0xff]  }
 0x7b5   :  { %3803 = vmatpush1.bf16.msra.mxu1 %v5930_v12  ;;  %v5980_v12 = vld [vmem:[#allocation29 + $0x54] ss:$8 sps:$4 sm:$0xff]  }
 0x7b6   :  { %3804 = vmatprep.subr.bf16.mxu1 %v5938_v14  ;;  %v5978_v14 = vld [vmem:[#allocation29 + $0x50] ss:$8 sps:$4 sm:$0xff]  }
 0x7b9   :  { %3805 = vmatpush1.bf16.msra.mxu1 %v5936_v17  ;;  %v5981_v17 = vld [vmem:[#allocation26 + $0x60] ss:$8 sps:$4 sm:$0xff]  }
 0x7ba   :  { %3806 = vmatprep.subr.bf16.mxu1 %v5944_v19  ;;  %v5989_v19 = vld [vmem:[#allocation26 + $0x74] ss:$8 sps:$4 sm:$0xff]  }
 0x7bd   :  { %3807 = vmatpush1.bf16.msra.mxu1 %v5942_v21  ;;  %v5987_v21 = vld [vmem:[#allocation26 + $0x70] ss:$8 sps:$4 sm:$0xff]  }
 0x7be   :  { %4378 = vmatprep.subr.bf16.mxu1 %v5950_v23  ;;  %v5995_v23 = vld [vmem:[#allocation26 + $0x84] ss:$8 sps:$4 sm:$0xff]  }
 0x873   :  { %v3219_v44 = vpop.f32.mrb[12].mxu1 }
 0x874   :  { %v5369_v45 = vadd.f32 %v3219_v44, %v2815_v42  ;;  %v3221_v46 = vpop.f32.mrb[13].mxu1 }
 0x875   :  { %v5370_v47 = vadd.f32 %v3221_v46, %v2819_v43  ;;  %v3223_v48 = vpop.f32.mrb[14].mxu1 }
 0x876   :  { %3489 = vst [vmem:[%s7191_s17] sm:$0xff] %v5369_v45  ;;  %v5371_v49 = vadd.f32 %v3223_v48, %v2815_v42  ;;  %v3225_v50 = vpop.f32.mrb[15].mxu1 }
 0x877   :  { %3490 = vst [vmem:[%s7191_s17 + $0x8] sm:$0xff] %v5370_v47  ;;  %v5372_v51 = vadd.f32 %v3225_v50, %v2819_v43  ;;  %v3483_v43 = vld [vmem:[%s7193_s14] sm:$0xff] }
 0x878   :  { %v7076_v52 = vpack.c.bf16 %v5371_v49, %v5369_v45  ;;  %3491 = vst [vmem:[%s7191_s17 + $0x10] sm:$0xff] %v5371_v49  ;;  %v3484_v45 = vld [vmem:[%s7193_s14 + $0x8] sm:$0xff] }
 0x879   :  { %v7079_v53 = vpack.c.bf16 %v5372_v51, %v5370_v47  ;;  %3492 = vst [vmem:[%s7191_s17 + $0x18] sm:$0xff] %v5372_v51  ;;  %v5945_v51 = vld [vmem:[#allocation26] ss:$8 sps:$4 sm:$0xff]  }
 0x87b   :  { %3466 = vmatprep.mubr.bf16.mxu0 %v7079_v53 }
 0x87c   :  { %3467 = vmatmul.mubr.bf16.vlgmr.msra.gmra.mrb[12].mxu0 %v7076_v52 }
 0x87d   :  { %3740 = vmatpush1.bf16.msra.mxu0 %v5897_v54  ;;  %3771 = vmatprep.mubr.bf16.mxu0 %v6701_v15 }
 0x87e   :  { %3741 = vmatprep.subr.bf16.mxu0 %v5905_v55  ;;  %v5948_v55 = vld [vmem:[#allocation29] ss:$8 sps:$4 sm:$0xff]  }
 0x881   :  { %3742 = vmatpush1.bf16.msra.mxu0 %v5903_v56  ;;  %v5953_v56 = vld [vmem:[#allocation26 + $0x14] ss:$8 sps:$4 sm:$0xff]  }
 0x882   :  { %3743 = vmatprep.subr.bf16.mxu0 %v5911_v57  ;;  %v5956_v57 = vld [vmem:[#allocation29 + $0x14] ss:$8 sps:$4 sm:$0xff]  }
 0x885   :  { %3744 = vmatpush1.bf16.msra.mxu0 %v5909_v59  ;;  %v5954_v59 = vld [vmem:[#allocation29 + $0x10] ss:$8 sps:$4 sm:$0xff]  }
 0x886   :  { %3745 = vmatprep.subr.bf16.mxu0 %v5917_v61  ;;  %v5962_v61 = vld [vmem:[#allocation29 + $0x24] ss:$8 sps:$4 sm:$0xff]  }
 0x889   :  { %3746 = vmatpush1.bf16.msra.mxu0 %v5915_v3  ;;  %v5957_v3 = vld [vmem:[#allocation26 + $0x20] ss:$8 sps:$4 sm:$0xff]  }
 0x88a   :  { %3747 = vmatprep.subr.bf16.mxu0 %v5923_v5  ;;  %v5965_v5 = vld [vmem:[#allocation26 + $0x34] ss:$8 sps:$4 sm:$0xff]  }
 0x88d   :  { %3748 = vmatpush1.bf16.msra.mxu0 %v5921_v7  ;;  %v5963_v7 = vld [vmem:[#allocation26 + $0x30] ss:$8 sps:$4 sm:$0xff]  }
 0x88e   :  { %3749 = vmatprep.subr.bf16.mxu0 %v5929_v9  ;;  %v5971_v9 = vld [vmem:[#allocation26 + $0x44] ss:$8 sps:$4 sm:$0xff]  }
 0x891   :  { %3750 = vmatpush1.bf16.msra.mxu0 %v5927_v11  ;;  %v5977_v11 = vld [vmem:[#allocation26 + $0x54] ss:$8 sps:$4 sm:$0xff]  }
 0x892   :  { %3751 = vmatprep.subr.bf16.mxu0 %v5935_v13  ;;  %v5975_v13 = vld [vmem:[#allocation26 + $0x50] ss:$8 sps:$4 sm:$0xff]  }
 0x895   :  { %3752 = vmatpush1.bf16.msra.mxu0 %v5933_v16  ;;  %v5986_v16 = vld [vmem:[#allocation29 + $0x64] ss:$8 sps:$4 sm:$0xff]  }
 0x896   :  { %3753 = vmatprep.subr.bf16.mxu0 %v5941_v18  ;;  %v5984_v18 = vld [vmem:[#allocation29 + $0x60] ss:$8 sps:$4 sm:$0xff]  }
 0x899   :  { %3754 = vmatpush1.bf16.msra.mxu0 %v5939_v20  ;;  %v5992_v20 = vld [vmem:[#allocation29 + $0x74] ss:$8 sps:$4 sm:$0xff]  }
 0x89a   :  { %4069 = vmatprep.subr.bf16.mxu0 %v5947_v22  ;;  %v5990_v22 = vld [vmem:[#allocation29 + $0x70] ss:$8 sps:$4 sm:$0xff]  }
 0x94f   :  { %v3468_v29 = vpop.f32.mrb[12].mxu0 }
 0x950   :  { %v3469_v30 = vadd.f32 %v3468_v29, %v3267_v26  ;;  %v3470_v31 = vpop.f32.mrb[13].mxu0  ;;  %v6001_v29 = vld [vmem:[#allocation26 + $0x94] ss:$8 sps:$4 sm:$0xff]  }
 0x951   :  { %v3471_v32 = vadd.f32 %v3470_v31, %v3271_v28  ;;  %v3472_v33 = vpop.f32.mrb[14].mxu0  ;;  %v5999_v31 = vld [vmem:[#allocation26 + $0x90] ss:$8 sps:$4 sm:$0xff]  }
 0x952   :  { %3493 = vst [vmem:[%s7192_s23] sm:$0xff] %v3469_v30  ;;  %v3473_v34 = vadd.f32 %v3472_v33, %v3267_v26  ;;  %v3474_v35 = vpop.f32.mrb[15].mxu0  ;;  %v5993_v26 = vld [vmem:[#allocation26 + $0x80] ss:$8 sps:$4 sm:$0xff]   ;;  %v6007_v33 = vld [vmem:[#allocation26 + $0xa4] ss:$8 sps:$4 sm:$0xff]  }
 0x953   :  { %v3477_v36 = vmul.f32 0.5, %v3471_v32  ;;  %3494 = vst [vmem:[%s7192_s23 + $0x8] sm:$0xff] %v3471_v32  ;;  %v3475_v37 = vadd.f32 %v3474_v35, %v3271_v28  ;;  %v5996_v28 = vld [vmem:[#allocation29 + $0x80] ss:$8 sps:$4 sm:$0xff]   ;;  %v6002_v32 = vld [vmem:[#allocation29 + $0x90] ss:$8 sps:$4 sm:$0xff]  }
 0x954   :  { %3495 = vst [vmem:[%s7192_s23 + $0x10] sm:$0xff] %v3473_v34  ;;  %v6005_v35 = vld [vmem:[#allocation26 + $0xa0] ss:$8 sps:$4 sm:$0xff]  }
 0x955   :  { %v3479_v40 = vmul.f32 1.442695, %v3477_v36  ;;  %v3478_v38 = vmul.f32 0.5, %v3475_v37  ;;  %3496 = vst [vmem:[%s7192_s23 + $0x18] sm:$0xff] %v3475_v37  ;;  %v6008_v36 = vld [vmem:[#allocation29 + $0xa0] ss:$8 sps:$4 sm:$0xff]  }
 0x956   :  { %v6013_v37 = vld [vmem:[#allocation26 + $0xb4] ss:$8 sps:$4 sm:$0xff]  }
 0x957   :  { %6065 = vpow2.f32 %v3479_v40  ;;  %v3481_v42 = vmul.f32 1.442695, %v3478_v38  ;;  %v6016_v40 = vld [vmem:[#allocation29 + $0xb4] ss:$8 sps:$4 sm:$0xff]  }
 0x958   :  { %v6011_v38 = vld [vmem:[#allocation26 + $0xb0] ss:$8 sps:$4 sm:$0xff]  }
 0x959   :  { %6067 = vpow2.f32 %v3481_v42  ;;  %v6014_v42 = vld [vmem:[#allocation29 + $0xb0] ss:$8 sps:$4 sm:$0xff]  }
 0x961   :  { %v6066_v44 = vpop.eup %6065 }
 0x962   :  { %v3485_v46 = vmul.f32 %v6066_v44, %v3483_v43  ;;  %v6019_v43 = vld [vmem:[#allocation26 + $0xc4] ss:$8 sps:$4 sm:$0xff]  }
 0x963   :  { %v6068_v47 = vpop.eup %6067  ;;  %v6022_v44 = vld [vmem:[#allocation29 + $0xc4] ss:$8 sps:$4 sm:$0xff]  }
 0x964   :  { %v3486_v48 = vmul.f32 %v6068_v47, %v3484_v45  ;;  %v3487_v49 = vadd.f32 %v3485_v46, %v3469_v30  ;;  %v6004_v30 = vld [vmem:[#allocation29 + $0x94] ss:$8 sps:$4 sm:$0xff]   ;;  %v6020_v46 = vld [vmem:[#allocation29 + $0xc0] ss:$8 sps:$4 sm:$0xff]  }
 0x965   :  { %v6017_v45 = vld [vmem:[#allocation26 + $0xc0] ss:$8 sps:$4 sm:$0xff]   ;;  %v6025_v47 = vld [vmem:[#allocation26 + $0xd4] ss:$8 sps:$4 sm:$0xff]  }
 0x966   :  { %v3488_v50 = vadd.f32 %v3486_v48, %v3473_v34  ;;  %3497 = vst [vmem:[%s7194_s7] sm:$0xff] %v3487_v49  ;;  %v6010_v34 = vld [vmem:[#allocation29 + $0xa4] ss:$8 sps:$4 sm:$0xff]   ;;  %v6028_v48 = vld [vmem:[#allocation29 + $0xd4] ss:$8 sps:$4 sm:$0xff]  }
 0x968   :  { %3498 = vst [vmem:[%s7194_s7 + $0x8] sm:$0xff] %v3488_v50  ;;  %v3555_v54 = vpack.c.bf16 %v3488_v50, %v3487_v49  ;;  %v6023_v49 = vld [vmem:[#allocation26 + $0xd0] ss:$8 sps:$4 sm:$0xff]  }
 0x969   :  { %v6026_v50 = vld [vmem:[#allocation29 + $0xd0] ss:$8 sps:$4 sm:$0xff]  }
 0x96a   :  { %3772 = vmatmul.mubr.bf16.vlgmr.msra.gmra.mrb[16].mxu0 %v3555_v54  ;;  %3825 = vmatmul.mubr.bf16.vlgmr.msra.gmra.mrb[16].mxu1 %v3555_v54  ;;  %v6029_v54 = vld [vmem:[#allocation26 + $0xe0] ss:$8 sps:$4 sm:$0xff]  }
 0x96b   :  { %3781 = vmatprep.mubr.bf16.mxu0 %v6701_v15  ;;  %4070 = vmatpush1.bf16.msra.mxu0 %v5945_v51  ;;  %v6031_v51 = vld [vmem:[#allocation26 + $0xe4] ss:$8 sps:$4 sm:$0xff]  }
 0x96c   :  { %4379 = vmatpush1.bf16.msra.mxu1 %v5948_v55  ;;  %4071 = vmatprep.subr.bf16.mxu0 %v5953_v56  ;;  %v6034_v55 = vld [vmem:[#allocation29 + $0xe4] ss:$8 sps:$4 sm:$0xff]   ;;  %v6032_v56 = vld [vmem:[#allocation29 + $0xe0] ss:$8 sps:$4 sm:$0xff]  }
 0x96d   :  { %4380 = vmatprep.subr.bf16.mxu1 %v5956_v57  ;;  %3834 = vmatprep.mubr.bf16.mxu1 %v6701_v15  ;;  %v5983_v15 = vld [vmem:[#allocation26 + $0x64] ss:$8 sps:$4 sm:$0xff]   ;;  %v6037_v57 = vld [vmem:[#allocation26 + $0xf4] ss:$8 sps:$4 sm:$0xff]  }
 0x96f   :  { %4072 = vmatpush1.bf16.msra.mxu0 %v5951_v58  ;;  %v6035_v58 = vld [vmem:[#allocation26 + $0xf0] ss:$8 sps:$4 sm:$0xff]  }
 0x970   :  { %4381 = vmatpush1.bf16.msra.mxu1 %v5954_v59  ;;  %4073 = vmatprep.subr.bf16.mxu0 %v5959_v60  ;;  %v6040_v59 = vld [vmem:[#allocation29 + $0xf4] ss:$8 sps:$4 sm:$0xff]   ;;  %v6038_v60 = vld [vmem:[#allocation29 + $0xf0] ss:$8 sps:$4 sm:$0xff]  }
 0x971   :  { %4382 = vmatprep.subr.bf16.mxu1 %v5962_v61  ;;  %v6041_v61 = vld [vmem:[#allocation32 + $0x40] sm:$0xff]  }
 0x972   :  { %3782 = vmatmul.mubr.bf16.gmra.mrb[20].mxu0 %v3556_v1  ;;  %3835 = vmatmul.mubr.bf16.gmra.mrb[20].mxu1 %v3556_v1  ;;  %v3557_v1 = vld [vmem:[#allocation25] sm:$0xf] }
 0x973   :  { %4074 = vmatpush1.bf16.msra.mxu0 %v5957_v3  ;;  %v3562_v3 = vrot.slane %v3557_v1, %v7005_v62 }
 0x974   :  { %4383 = vmatpush1.bf16.msra.mxu1 %v5960_v4  ;;  %4075 = vmatprep.subr.bf16.mxu0 %v5965_v5  ;;  %v3570_v4 = vrot.slane %v3557_v1, %v7011_v25  ;;  %v3566_v5 = vrot.slane %v3557_v1, %v7007_v0 }
 0x975   :  { %4384 = vmatprep.subr.bf16.mxu1 %v5968_v6  ;;  %v3574_v6 = vrot.slane %v3557_v1, %v7013_v27 }
 0x977   :  { %4076 = vmatpush1.bf16.msra.mxu0 %v5963_v7 }
 0x978   :  { %4385 = vmatpush1.bf16.msra.mxu1 %v5966_v8  ;;  %4077 = vmatprep.subr.bf16.mxu0 %v5971_v9 }
 0x979   :  { %4386 = vmatprep.subr.bf16.mxu1 %v5974_v10 }
 0x97b   :  { %4078 = vmatpush1.bf16.msra.mxu0 %v5969_v63 }
 0x97c   :  { %4387 = vmatpush1.bf16.msra.mxu1 %v5972_v2  ;;  %4079 = vmatprep.subr.bf16.mxu0 %v5977_v11 }
 0x97d   :  { %4388 = vmatprep.subr.bf16.mxu1 %v5980_v12 }
 0x97f   :  { %4080 = vmatpush1.bf16.msra.mxu0 %v5975_v13 }
 0x980   :  { %4389 = vmatpush1.bf16.msra.mxu1 %v5978_v14  ;;  %4081 = vmatprep.subr.bf16.mxu0 %v5983_v15 }
 0x981   :  { %4390 = vmatprep.subr.bf16.mxu1 %v5986_v16 }
 0x983   :  { %4082 = vmatpush1.bf16.msra.mxu0 %v5981_v17 }
 0x984   :  { %4391 = vmatpush1.bf16.msra.mxu1 %v5984_v18  ;;  %4083 = vmatprep.subr.bf16.mxu0 %v5989_v19 }
 0x985   :  { %4392 = vmatprep.subr.bf16.mxu1 %v5992_v20 }
 0x987   :  { %4084 = vmatpush1.bf16.msra.mxu0 %v5987_v21 }
 0x988   :  { %4393 = vmatpush1.bf16.msra.mxu1 %v5990_v22  ;;  %4085 = vmatprep.subr.bf16.mxu0 %v5995_v23 }
 0x989   :  { %4394 = vmatprep.subr.bf16.mxu1 %v5998_v24 }
 0x98b   :  { %4086 = vmatpush1.bf16.msra.mxu0 %v5993_v26 }
 0x98c   :  { %4395 = vmatpush1.bf16.msra.mxu1 %v5996_v28  ;;  %4087 = vmatprep.subr.bf16.mxu0 %v6001_v29 }
 0x98d   :  { %4396 = vmatprep.subr.bf16.mxu1 %v6004_v30 }
 0x98f   :  { %4088 = vmatpush1.bf16.msra.mxu0 %v5999_v31 }
 0x990   :  { %4397 = vmatpush1.bf16.msra.mxu1 %v6002_v32  ;;  %4089 = vmatprep.subr.bf16.mxu0 %v6007_v33 }
 0x991   :  { %4398 = vmatprep.subr.bf16.mxu1 %v6010_v34  ;;  %v6042_v34 = vld [vmem:[#allocation32] sm:$0xff]  }
 0x993   :  { %4090 = vmatpush1.bf16.msra.mxu0 %v6005_v35 }
 0x994   :  { %4399 = vmatpush1.bf16.msra.mxu1 %v6008_v36  ;;  %4091 = vmatprep.subr.bf16.mxu0 %v6013_v37 }
 0x995   :  { %4400 = vmatprep.subr.bf16.mxu1 %v6016_v40  ;;  %v6043_v40 = vld [vmem:[#allocation32 + $0x48] sm:$0xff]  }
 0x997   :  { %4092 = vmatpush1.bf16.msra.mxu0 %v6011_v38 }
 0x998   :  { %4401 = vmatpush1.bf16.msra.mxu1 %v6014_v42  ;;  %4093 = vmatprep.subr.bf16.mxu0 %v6019_v43 }
 0x999   :  { %4402 = vmatprep.subr.bf16.mxu1 %v6022_v44 }
 0x99b   :  { %4094 = vmatpush1.bf16.msra.mxu0 %v6017_v45 }
 0x99c   :  { %4403 = vmatpush1.bf16.msra.mxu1 %v6020_v46  ;;  %4095 = vmatprep.subr.bf16.mxu0 %v6025_v47 }
 0x99d   :  { %4404 = vmatprep.subr.bf16.mxu1 %v6028_v48 }
 0x99f   :  { %4096 = vmatpush1.bf16.msra.mxu0 %v6023_v49 }
 0x9a0   :  { %4405 = vmatpush1.bf16.msra.mxu1 %v6026_v50  ;;  %4097 = vmatprep.subr.bf16.mxu0 %v6031_v51 }
 0x9a1   :  { %4406 = vmatprep.subr.bf16.mxu1 %v6034_v55 }
 0x9a3   :  { %4098 = vmatpush1.bf16.msra.mxu0 %v6029_v54 }
 0x9a4   :  { %4407 = vmatpush1.bf16.msra.mxu1 %v6032_v56  ;;  %4099 = vmatprep.subr.bf16.mxu0 %v6037_v57  ;;  %v6044_v57 = vld [vmem:[#allocation32 + $0x8] sm:$0xff]  }
 0x9a5   :  { %4408 = vmatprep.subr.bf16.mxu1 %v6040_v59 }
 0x9a7   :  { %4100 = vmatpush1.bf16.msra.mxu0 %v6035_v58 }
 0x9a8   :  { %4409 = vmatpush1.bf16.msra.mxu1 %v6038_v60  ;;  %5299 = vmatprep.subr.bf16.mxu0 %v6041_v61  ;;  %v6045_v61 = vld [vmem:[#allocation32 + $0x50] sm:$0xff]  }
 0xa3d   :  { %v3773_v7 = vpop.f32.mrb[16].mxu0  ;;  %v3826_v8 = vpop.f32.mrb[16].mxu1 }
 0xa3e   :  { %v3774_v9 = vadd.f32 %v3773_v7, %v3562_v3  ;;  %v3827_v10 = vadd.f32 %v3826_v8, %v3570_v4  ;;  %v3775_v63 = vpop.f32.mrb[17].mxu0  ;;  %v3828_v2 = vpop.f32.mrb[17].mxu1 }
 0xa3f   :  { %v3776_v11 = vadd.f32 %v3775_v63, %v3566_v5  ;;  %v3829_v12 = vadd.f32 %v3828_v2, %v3574_v6  ;;  %v3777_v13 = vpop.f32.mrb[18].mxu0  ;;  %v3830_v14 = vpop.f32.mrb[18].mxu1  ;;  %v6046_v63 = vld [vmem:[#allocation32 + $0x10] sm:$0xff]  }
 0xa40   :  { %v3778_v15 = vadd.f32 %v3777_v13, %v3562_v3  ;;  %v3831_v16 = vadd.f32 %v3830_v14, %v3570_v4  ;;  %v3779_v17 = vpop.f32.mrb[19].mxu0  ;;  %v3832_v18 = vpop.f32.mrb[19].mxu1  ;;  %v3845_v20 = vmax.f32 %v3774_v9, 0.0  ;;  %v3847_v21 = vmax.f32 %v3827_v10, 0.0  ;;  %v6052_v13 = vld [vmem:[#allocation32 + $0x28] sm:$0xff]   ;;  %v6053_v14 = vld [vmem:[#allocation32 + $0x70] sm:$0xff]  }
 0xa41   :  { %v3780_v19 = vadd.f32 %v3779_v17, %v3566_v5  ;;  %v3833_v25 = vadd.f32 %v3832_v18, %v3574_v6  ;;  %v3846_v23 = vmax.f32 %v3776_v11, 0.0  ;;  %v3848_v24 = vmax.f32 %v3829_v12, 0.0  ;;  %v6050_v11 = vld [vmem:[#allocation32 + $0x20] sm:$0xff]   ;;  %v6051_v12 = vld [vmem:[#allocation32 + $0x68] sm:$0xff]   ;;  %v6056_v17 = vld [vmem:[#allocation32 + $0x38] sm:$0xff]  }
 0xa42   :  { %v3849_v22 = vmax.f32 %v3778_v15, 0.0  ;;  %v3851_v27 = vmax.f32 %v3831_v16, 0.0  ;;  %v6054_v15 = vld [vmem:[#allocation32 + $0x30] sm:$0xff]   ;;  %v6055_v16 = vld [vmem:[#allocation32 + $0x78] sm:$0xff]  }
 0xa43   :  { %v3850_v26 = vmax.f32 %v3780_v19, 0.0  ;;  %v3852_v28 = vmax.f32 %v3833_v25, 0.0  ;;  %v6058_v18 = vld [vmem:[#allocation35 + $0x8] sm:$0xff]   ;;  %v6059_v19 = vld [vmem:[#allocation35 + $0x10] sm:$0xff]   ;;  %v6060_v25 = vld [vmem:[#allocation35 + $0x18] sm:$0xff]  }
 0xa44   :  { %v3893_v29 = vpack.c.bf16 %v3849_v22, %v3845_v20  ;;  %v4202_v30 = vpack.c.bf16 %v3851_v27, %v3847_v21  ;;  %v6061_v20 = vld [vmem:[#allocation35 + $0x20] sm:$0xff]   ;;  %v3897_v21 = vld [vmem:[#allocation28] sm:$0x3]  ;;  %v4206_v22 = vld [vmem:[#allocation31] sm:$0x3] }
 0xa45   :  { %v3894_v31 = vpack.c.bf16 %v3850_v26, %v3846_v23  ;;  %v4203_v32 = vpack.c.bf16 %v3852_v28, %v3848_v24  ;;  %v3783_v33 = vpop.f32.mrb[20].mxu0  ;;  %v3836_v35 = vpop.f32.mrb[20].mxu1  ;;  %v3902_v27 = vrot.slane %v3897_v21, %v7005_v62  ;;  %v7110_v23 = vrot.slane %v4206_v22, %v7005_v62 }
 0xa46   :  { %v3784_v36 = vadd.f32 %v3783_v33, %v3562_v3  ;;  %v3785_v37 = vpop.f32.mrb[21].mxu0  ;;  %v3837_v38 = vadd.f32 %v3836_v35, %v3570_v4  ;;  %v3838_v42 = vpop.f32.mrb[21].mxu1  ;;  %v3906_v24 = vrot.slane %v3897_v21, %v7007_v0  ;;  %v7114_v26 = vrot.slane %v4206_v22, %v7007_v0 }
 0xa47   :  { %v3786_v43 = vadd.f32 %v3785_v37, %v3566_v5  ;;  %v3787_v44 = vpop.f32.mrb[22].mxu0  ;;  %4101 = vmatprep.mubr.bf16.mxu0 %v3894_v31  ;;  %4410 = vmatprep.mubr.bf16.mxu1 %v4203_v32  ;;  %v3839_v45 = vadd.f32 %v3838_v42, %v3574_v6  ;;  %v3840_v46 = vpop.f32.mrb[22].mxu1 }
 0xa48   :  { %v3853_v47 = vmax.f32 %v3784_v36, 0.0  ;;  %v3788_v48 = vadd.f32 %v3787_v44, %v3562_v3  ;;  %v3789_v49 = vpop.f32.mrb[23].mxu0  ;;  %4102 = vmatmul.mubr.bf16.vlgmr.msra.gmra.mrb[24].mxu0 %v3893_v29  ;;  %4411 = vmatmul.mubr.bf16.vlgmr.msra.gmra.mrb[24].mxu1 %v4202_v30  ;;  %v3855_v50 = vmax.f32 %v3837_v38, 0.0  ;;  %v3841_v51 = vadd.f32 %v3840_v46, %v3570_v4  ;;  %v3842_v54 = vpop.f32.mrb[23].mxu1  ;;  %v6047_v4 = vld [vmem:[#allocation32 + $0x58] sm:$0xff]  }
 0xa49   :  { %v3854_v55 = vmax.f32 %v3786_v43, 0.0  ;;  %v3790_v56 = vadd.f32 %v3789_v49, %v3566_v5  ;;  %5300 = vmatpush3.bf16.msra.mxu0 %v6042_v34  ;;  %v3856_v58 = vmax.f32 %v3839_v45, 0.0  ;;  %v3843_v59 = vadd.f32 %v3842_v54, %v3574_v6  ;;  %v6048_v5 = vld [vmem:[#allocation32 + $0x18] sm:$0xff]   ;;  %v6049_v6 = vld [vmem:[#allocation32 + $0x60] sm:$0xff]  }
 0xa4a   :  { %v3857_v60 = vmax.f32 %v3788_v48, 0.0  ;;  %5301 = vmatprep.subr.bf16.mxu0 %v6043_v40  ;;  %v3859_v1 = vmax.f32 %v3841_v51, 0.0 }
 0xa4b   :  { %v3858_v7 = vmax.f32 %v3790_v56, 0.0  ;;  %v3860_v8 = vmax.f32 %v3843_v59, 0.0 }
 0xa4c   :  { %v3895_v9 = vpack.c.bf16 %v3857_v60, %v3853_v47  ;;  %v4204_v3 = vpack.c.bf16 %v3859_v1, %v3855_v50 }
 0xa4d   :  { %v3896_v10 = vpack.c.bf16 %v3858_v7, %v3854_v55  ;;  %5302 = vmatpush3.bf16.msra.mxu0 %v6044_v57  ;;  %v4205_v2 = vpack.c.bf16 %v3860_v8, %v3856_v58 }
 0xa4e   :  { %5303 = vmatprep.subr.bf16.mxu0 %v6045_v61 }
 0xa4f   :  { %4111 = vmatprep.mubr.bf16.mxu0 %v3896_v10  ;;  %4420 = vmatprep.mubr.bf16.mxu1 %v4205_v2 }
 0xa50   :  { %4112 = vmatmul.mubr.bf16.gmra.mrb[28].mxu0 %v3895_v9  ;;  %4421 = vmatmul.mubr.bf16.gmra.mrb[28].mxu1 %v4204_v3 }
 0xa51   :  { %5304 = vmatpush3.bf16.msra.mxu0 %v6046_v63  ;;  %4650 = vmatprep.mubr.bf16.mxu0 %v7079_v53  ;;  %v6057_v53 = vld [vmem:[#allocation35] sm:$0xff]  }
 0xa52   :  { %5305 = vmatprep.subr.bf16.mxu0 %v6047_v4  ;;  %5337 = vmatprep.subr.bf16.mxu1 %v6057_v53 }
 0xa53   :  { %5338 = vmatpush3.bf16.msra.mxu1 %v6057_v53 }
 0xa54   :  { %5339 = vmatprep.subr.bf16.mxu1 %v6058_v18 }
 0xa55   :  { %5306 = vmatpush3.bf16.msra.mxu0 %v6048_v5 }
 0xa56   :  { %5307 = vmatprep.subr.bf16.mxu0 %v6049_v6 }
 0xa57   :  { %5340 = vmatpush3.bf16.msra.mxu1 %v6058_v18 }
 0xa58   :  { %5341 = vmatprep.subr.bf16.mxu1 %v6059_v19 }
 0xa59   :  { %5308 = vmatpush3.bf16.msra.mxu0 %v6050_v11 }
 0xa5a   :  { %5309 = vmatprep.subr.bf16.mxu0 %v6051_v12 }
 0xa5b   :  { %5342 = vmatpush3.bf16.msra.mxu1 %v6059_v19 }
 0xa5c   :  { %5343 = vmatprep.subr.bf16.mxu1 %v6060_v25 }
 0xa5d   :  { %5310 = vmatpush3.bf16.msra.mxu0 %v6052_v13 }
 0xa5e   :  { %5311 = vmatprep.subr.bf16.mxu0 %v6053_v14 }
 0xa5f   :  { %5344 = vmatpush3.bf16.msra.mxu1 %v6060_v25 }
 0xa60   :  { %5345 = vmatprep.subr.bf16.mxu1 %v6061_v20 }
 0xa61   :  { %5312 = vmatpush3.bf16.msra.mxu0 %v6054_v15 }
 0xa62   :  { %5313 = vmatprep.subr.bf16.mxu0 %v6055_v16 }
 0xa63   :  { %5346 = vmatpush3.bf16.msra.mxu1 %v6061_v20 }
 0xa65   :  { %5314 = vmatpush3.bf16.msra.mxu0 %v6056_v17 }
 0xa68   :  { %4651 = vmatmul.mubr.bf16.vlgmr.msra.gmra.mrb[32].mxu0 %v7076_v52  ;;  %v6062_v52 = vld [vmem:[#allocation35 + $0x28] sm:$0xff]  }
 0xa69   :  { %4658 = vmatprep.mubr.bf16.mxu0 %v7024_v41  ;;  %5347 = vmatprep.subr.bf16.mxu1 %v6062_v52  ;;  %v6063_v41 = vld [vmem:[#allocation35 + $0x30] sm:$0xff]  }
 0xa6a   :  { %5348 = vmatpush3.bf16.msra.mxu1 %v6062_v52 }
 0xa6b   :  { %5349 = vmatprep.subr.bf16.mxu1 %v6063_v41 }
 0xa6e   :  { %5350 = vmatpush3.bf16.msra.mxu1 %v6063_v41 }
 0xa70   :  { %4659 = vmatmul.mubr.bf16.gmra.mrb[36].mxu0 %v7021_v39  ;;  %v6064_v39 = vld [vmem:[#allocation35 + $0x38] sm:$0xff]  }
 0xa71   :  { %5351 = vmatprep.subr.bf16.mxu1 %v6064_v39 }
 0xa72   :  { %5352 = vmatpush3.bf16.msra.mxu1 %v6064_v39 }
 0xb1b   :  { %v4103_v28 = vpop.f32.mrb[24].mxu0  ;;  %v4412_v29 = vpop.f32.mrb[24].mxu1 }
 0xb1c   :  { %v4104_v30 = vadd.f32 %v4103_v28, %v3902_v27  ;;  %v4413_v31 = vadd.f32 %v4412_v29, %v7110_v23  ;;  %v4105_v32 = vpop.f32.mrb[25].mxu0  ;;  %v4414_v33 = vpop.f32.mrb[25].mxu1 }
 0xb1d   :  { %v4106_v34 = vadd.f32 %v4105_v32, %v3906_v24  ;;  %v4415_v35 = vadd.f32 %v4414_v33, %v7114_v26  ;;  %v4107_v36 = vpop.f32.mrb[26].mxu0  ;;  %v4416_v37 = vpop.f32.mrb[26].mxu1 }
 0xb1e   :  { %v4122_v40 = vsub.f32 0.0, %v4104_v30  ;;  %v4431_v62 = vsub.f32 0.0, %v4413_v31  ;;  %v4108_v38 = vadd.f32 %v4107_v36, %v3902_v27  ;;  %v4417_v42 = vadd.f32 %v4416_v37, %v7110_v23  ;;  %v4109_v43 = vpop.f32.mrb[27].mxu0  ;;  %v4418_v0 = vpop.f32.mrb[27].mxu1 }
 0xb1f   :  { %v4123_v44 = vsub.f32 0.0, %v4106_v34  ;;  %v4432_v45 = vsub.f32 0.0, %v4415_v35  ;;  %v4110_v46 = vadd.f32 %v4109_v43, %v3906_v24  ;;  %v4419_v47 = vadd.f32 %v4418_v0, %v7114_v26 }
 0xb20   :  { %v4130_v48 = vmul.f32 1.442695, %v4122_v40  ;;  %v4439_v49 = vmul.f32 1.442695, %v4431_v62  ;;  %v4124_v50 = vsub.f32 0.0, %v4108_v38  ;;  %v4433_v51 = vsub.f32 0.0, %v4417_v42 }
 0xb21   :  { %v4132_v54 = vmul.f32 1.442695, %v4123_v44  ;;  %v4441_v55 = vmul.f32 1.442695, %v4432_v45  ;;  %v4125_v56 = vsub.f32 0.0, %v4110_v46  ;;  %v4434_v57 = vsub.f32 0.0, %v4419_v47 }
 0xb22   :  { %6069 = vpow2.f32 %v4130_v48  ;;  %v4134_v58 = vmul.f32 1.442695, %v4124_v50  ;;  %v4443_v59 = vmul.f32 1.442695, %v4433_v51 }
 0xb23   :  { %6071 = vpow2.f32 %v4439_v49  ;;  %v4113_v60 = vpop.f32.mrb[28].mxu0  ;;  %v4422_v61 = vpop.f32.mrb[28].mxu1  ;;  %v4136_v1 = vmul.f32 1.442695, %v4125_v56  ;;  %v4445_v10 = vmul.f32 1.442695, %v4434_v57 }
 0xb24   :  { %6073 = vpow2.f32 %v4132_v54  ;;  %v4114_v7 = vadd.f32 %v4113_v60, %v3902_v27  ;;  %v4115_v8 = vpop.f32.mrb[29].mxu0  ;;  %v4423_v9 = vadd.f32 %v4422_v61, %v7110_v23  ;;  %v4424_v3 = vpop.f32.mrb[29].mxu1  ;;  %v5272_v61 = vld [vmem:[#allocation34] ss:$0 sm:$0xff] }
 0xb25   :  { %6075 = vpow2.f32 %v4441_v55  ;;  %v4116_v63 = vadd.f32 %v4115_v8, %v3906_v24  ;;  %v4117_v2 = vpop.f32.mrb[30].mxu0  ;;  %v4426_v4 = vpop.f32.mrb[30].mxu1  ;;  %v4425_v30 = vadd.f32 %v4424_v3, %v7114_v26 }
 0xb26   :  { %6077 = vpow2.f32 %v4134_v58  ;;  %v4126_v5 = vsub.f32 0.0, %v4114_v7  ;;  %v4118_v6 = vadd.f32 %v4117_v2, %v3902_v27  ;;  %v4119_v11 = vpop.f32.mrb[31].mxu0  ;;  %v4435_v12 = vsub.f32 0.0, %v4423_v9  ;;  %v4428_v13 = vpop.f32.mrb[31].mxu1 }
 0xb27   :  { %6079 = vpow2.f32 %v4443_v59  ;;  %v4127_v14 = vsub.f32 0.0, %v4116_v63  ;;  %v4120_v15 = vadd.f32 %v4119_v11, %v3906_v24  ;;  %v4427_v33 = vadd.f32 %v4426_v4, %v7110_v23 }
 0xb28   :  { %6081 = vpow2.f32 %v4136_v1  ;;  %v4138_v16 = vmul.f32 1.442695, %v4126_v5  ;;  %v4128_v17 = vsub.f32 0.0, %v4118_v6  ;;  %v4447_v25 = vmul.f32 1.442695, %v4435_v12 }
 0xb29   :  { %6083 = vpow2.f32 %v4445_v10  ;;  %v4140_v53 = vmul.f32 1.442695, %v4127_v14  ;;  %v4129_v18 = vsub.f32 0.0, %v4120_v15  ;;  %v4429_v36 = vadd.f32 %v4428_v13, %v7114_v26 }
 0xb2a   :  { %6085 = vpow2.f32 %v4138_v16  ;;  %v4142_v19 = vmul.f32 1.442695, %v4128_v17  ;;  %v4436_v42 = vsub.f32 0.0, %v4425_v30  ;;  %v4437_v44 = vsub.f32 0.0, %v4427_v33 }
 0xb2b   :  { %6087 = vpow2.f32 %v4140_v53  ;;  %v4144_v20 = vmul.f32 1.442695, %v4129_v18  ;;  %v4438_v46 = vsub.f32 0.0, %v4429_v36 }
 0xb2c   :  { %v6070_v52 = vpop.eup %6069  ;;  %6089 = vpow2.f32 %v4142_v19  ;;  %v4449_v50 = vmul.f32 1.442695, %v4436_v42  ;;  %v4451_v55 = vmul.f32 1.442695, %v4437_v44 }
 0xb2d   :  { %v6072_v41 = vpop.eup %6071  ;;  %v4146_v39 = vadd.f32 1.0, %v6070_v52  ;;  %6091 = vpow2.f32 %v4144_v20  ;;  %v4453_v57 = vmul.f32 1.442695, %v4438_v46 }
 0xb2e   :  { %v6074_v21 = vpop.eup %6073  ;;  %v4455_v22 = vadd.f32 1.0, %v6072_v41  ;;  %6093 = vpow2.f32 %v4447_v25 }
 0xb2f   :  { %v6076_v27 = vpop.eup %6075  ;;  %6095 = vrcp.f32 %v4146_v39  ;;  %v4147_v24 = vadd.f32 1.0, %v6074_v21 }
 0xb30   :  { %v6078_v28 = vpop.eup %6077  ;;  %6097 = vrcp.f32 %v4455_v22  ;;  %v4456_v29 = vadd.f32 1.0, %v6076_v27 }
 0xb31   :  { %v6080_v31 = vpop.eup %6079  ;;  %6099 = vrcp.f32 %v4147_v24  ;;  %v4148_v32 = vadd.f32 1.0, %v6078_v28 }
 0xb32   :  { %v6082_v34 = vpop.eup %6081  ;;  %6101 = vrcp.f32 %v4456_v29  ;;  %v4457_v35 = vadd.f32 1.0, %v6080_v31 }
 0xb33   :  { %v6084_v37 = vpop.eup %6083  ;;  %6103 = vrcp.f32 %v4148_v32  ;;  %v4149_v40 = vadd.f32 1.0, %v6082_v34 }
 0xb34   :  { %v6086_v62 = vpop.eup %6085  ;;  %6105 = vrcp.f32 %v4457_v35  ;;  %v4458_v38 = vadd.f32 1.0, %v6084_v37  ;;  %v5289_v37 = vld [vmem:[#allocation37] ss:$0 sm:$0xff] }
 0xb35   :  { %v6088_v43 = vpop.eup %6087  ;;  %6107 = vrcp.f32 %v4149_v40  ;;  %v4150_v0 = vadd.f32 1.0, %v6086_v62 }
 0xb36   :  { %v6090_v45 = vpop.eup %6089  ;;  %6109 = vrcp.f32 %v4458_v38  ;;  %v4151_v23 = vadd.f32 1.0, %v6088_v43 }
 0xb37   :  { %v6092_v47 = vpop.eup %6091  ;;  %6111 = vrcp.f32 %v4150_v0  ;;  %v4152_v26 = vadd.f32 1.0, %v6090_v45 }
 0xb38   :  { %v6094_v48 = vpop.eup %6093  ;;  %6113 = vrcp.f32 %v4151_v23  ;;  %v4153_v49 = vadd.f32 1.0, %v6092_v47 }
 0xb39   :  { %v6096_v51 = vpop.eup %6095  ;;  %6115 = vrcp.f32 %v4152_v26  ;;  %v4459_v54 = vadd.f32 1.0, %v6094_v48 }
 0xb3a   :  { %v6098_v56 = vpop.eup %6097  ;;  %4162 = vst [vmem:[%s6870_s6] sm:$0xff] %v6096_v51  ;;  %6117 = vrcp.f32 %v4153_v49 }
 0xb3b   :  { %v6100_v58 = vpop.eup %6099  ;;  %4471 = vst [vmem:[%s6875_s9] sm:$0xff] %v6098_v56  ;;  %v5315_v59 = vpop.f32.mrb[32].mxu0  ;;  %6119 = vrcp.f32 %v4459_v54 }
 0xb3c   :  { %v6102_v60 = vpop.eup %6101  ;;  %4163 = vst [vmem:[%s6870_s6 + $0x8] sm:$0xff] %v6100_v58  ;;  %v5316_v1 = vpop.f32.mrb[33].mxu0  ;;  %6121 = vpow2.f32 %v4449_v50 }
 0xb3d   :  { %v6104_v7 = vpop.eup %6103  ;;  %4472 = vst [vmem:[%s6875_s9 + $0x8] sm:$0xff] %v6102_v60  ;;  %v5317_v8 = vadd.f32 %v5316_v1, %v5315_v59  ;;  %v5318_v9 = vpop.f32.mrb[34].mxu0  ;;  %6123 = vpow2.f32 %v4451_v55 }
 0xb3e   :  { %v6106_v3 = vpop.eup %6105  ;;  %4164 = vst [vmem:[%s6870_s6 + $0x10] sm:$0xff] %v6104_v7  ;;  %v5319_v10 = vpop.f32.mrb[35].mxu0  ;;  %6125 = vpow2.f32 %v4453_v57 }
 0xb3f   :  { %v6108_v63 = vpop.eup %6107  ;;  %4473 = vst [vmem:[%s6875_s9 + $0x10] sm:$0xff] %v6106_v3  ;;  %v4653_v2 = vadd.f32 %v5317_v8, %v5272_v61  ;;  %v5320_v4 = vadd.f32 %v5319_v10, %v5318_v9 }
 0xb40   :  { %v6110_v5 = vpop.eup %6109  ;;  %4165 = vst [vmem:[%s6870_s6 + $0x18] sm:$0xff] %v6108_v63 }
 0xb41   :  { %v6112_v6 = vpop.eup %6111  ;;  %4474 = vst [vmem:[%s6875_s9 + $0x18] sm:$0xff] %v6110_v5  ;;  %v4656_v11 = vadd.f32 %v5320_v4, %v5272_v61  ;;  %v4667_v14 = vmax.f32 %v4653_v2, 0.0 }
 0xb42   :  { %v6114_v12 = vpop.eup %6113  ;;  %4166 = vst [vmem:[%s6870_s6 + $0x20] sm:$0xff] %v6112_v6 }
 0xb43   :  { %v6116_v13 = vpop.eup %6115  ;;  %4167 = vst [vmem:[%s6870_s6 + $0x28] sm:$0xff] %v6114_v12  ;;  %v4668_v15 = vmax.f32 %v4656_v11, 0.0  ;;  %v5321_v16 = vpop.f32.mrb[36].mxu0 }
 0xb44   :  { %v6118_v17 = vpop.eup %6117  ;;  %4168 = vst [vmem:[%s6870_s6 + $0x30] sm:$0xff] %v6116_v13  ;;  %v5322_v53 = vpop.f32.mrb[37].mxu0 }
 0xb45   :  { %v6120_v18 = vpop.eup %6119  ;;  %4169 = vst [vmem:[%s6870_s6 + $0x38] sm:$0xff] %v6118_v17  ;;  %v5323_v19 = vadd.f32 %v5322_v53, %v5321_v16  ;;  %v5324_v25 = vpop.f32.mrb[38].mxu0  ;;  %v4687_v20 = vpack.c.bf16 %v4668_v15, %v4667_v14 }
 0xb46   :  { %v6122_v52 = vpop.eup %6121  ;;  %v5325_v41 = vpop.f32.mrb[39].mxu0  ;;  %4475 = vst [vmem:[%s6875_s9 + $0x20] sm:$0xff] %v6120_v18 }
 0xb47   :  { %v6124_v39 = vpop.eup %6123  ;;  %v4661_v21 = vadd.f32 %v5323_v19, %v5272_v61  ;;  %v5326_v22 = vadd.f32 %v5325_v41, %v5324_v25  ;;  %5353 = vmatprep.mubr.bf16.mxu1 %v4687_v20  ;;  %v4460_v27 = vadd.f32 1.0, %v6122_v52 }
 0xb48   :  { %v6126_v24 = vpop.eup %6125  ;;  %v4461_v28 = vadd.f32 1.0, %v6124_v39 }
 0xb49   :  { %v4664_v29 = vadd.f32 %v5326_v22, %v5272_v61  ;;  %6127 = vrcp.f32 %v4460_v27  ;;  %v4462_v30 = vadd.f32 1.0, %v6126_v24  ;;  %v4669_v31 = vmax.f32 %v4661_v21, 0.0 }
 0xb4a   :  { %6129 = vrcp.f32 %v4461_v28 }
 0xb4b   :  { %v4670_v32 = vmax.f32 %v4664_v29, 0.0  ;;  %6131 = vrcp.f32 %v4462_v30 }
 0xb4d   :  { %v4688_v33 = vpack.c.bf16 %v4670_v32, %v4669_v31 }
 0xb4f   :  { %5354 = vmatmul.mubr.bf16.vlgmr.msra.gmra.mrb[32].mxu1 %v4688_v33 }
 0xb53   :  { %v6128_v34 = vpop.eup %6127 }
 0xb54   :  { %v6130_v35 = vpop.eup %6129  ;;  %4476 = vst [vmem:[%s6875_s9 + $0x28] sm:$0xff] %v6128_v34 }
 0xb55   :  { %v6132_v36 = vpop.eup %6131  ;;  %4477 = vst [vmem:[%s6875_s9 + $0x30] sm:$0xff] %v6130_v35 }
 0xb56   :  { %4478 = vst [vmem:[%s6875_s9 + $0x38] sm:$0xff] %v6132_v36 }
 0xc22   :  { %v5355_v40 = vpop.f32.mrb[32].mxu1 }
 0xc23   :  { %v4787_v62 = vadd.f32 %v5355_v40, %v5289_v37  ;;  %v4778_v38 = vpop.f32.mrb[33].mxu1 }
 0xc24   :  { %v4779_v42 = vadd.f32 %v5289_v37, %v4778_v38  ;;  %v5356_v43 = vpop.f32.mrb[34].mxu1 }
 0xc25   :  { %v4795_v0 = vsub.f32 0.0, %v4787_v62  ;;  %v4790_v44 = vadd.f32 %v5356_v43, %v5289_v37  ;;  %v4781_v45 = vpop.f32.mrb[35].mxu1 }
 0xc26   :  { %v4793_v23 = vsub.f32 0.0, %v4779_v42  ;;  %v4782_v46 = vadd.f32 %v5289_v37, %v4781_v45 }
 0xc27   :  { %v4801_v47 = vmul.f32 1.442695, %v4795_v0  ;;  %v4796_v26 = vsub.f32 0.0, %v4790_v44 }
 0xc28   :  { %v4797_v48 = vmul.f32 1.442695, %v4793_v23  ;;  %v4794_v49 = vsub.f32 0.0, %v4782_v46 }
 0xc29   :  { %6133 = vpow2.f32 %v4801_v47  ;;  %v4803_v50 = vmul.f32 1.442695, %v4796_v26 }
 0xc2a   :  { %6135 = vpow2.f32 %v4797_v48  ;;  %v4799_v51 = vmul.f32 1.442695, %v4794_v49 }
 0xc2b   :  { %6137 = vpow2.f32 %v4803_v50 }
 0xc2c   :  { %6139 = vpow2.f32 %v4799_v51 }
 0xc33   :  { %v6134_v54 = vpop.eup %6133 }
 0xc34   :  { %v6136_v55 = vpop.eup %6135  ;;  %v4807_v56 = vadd.f32 1.0, %v6134_v54 }
 0xc35   :  { %v6138_v57 = vpop.eup %6137  ;;  %v4805_v58 = vadd.f32 1.0, %v6136_v55 }
 0xc36   :  { %v6140_v59 = vpop.eup %6139  ;;  %6141 = vrcp.f32 %v4807_v56  ;;  %v4808_v60 = vadd.f32 1.0, %v6138_v57 }
 0xc37   :  { %6143 = vrcp.f32 %v4805_v58  ;;  %v4806_v61 = vadd.f32 1.0, %v6140_v59 }
 0xc38   :  { %6145 = vrcp.f32 %v4808_v60 }
 0xc39   :  { %6147 = vrcp.f32 %v4806_v61 }
 0xc40   :  { %v6142_v1 = vpop.eup %6141 }
 0xc41   :  { %v6144_v7 = vpop.eup %6143  ;;  %4815 = vst [vmem:[%s6880_s20 + $0x10] sm:$0xff] %v6142_v1 }
 0xc42   :  { %v6146_v8 = vpop.eup %6145  ;;  %4813 = vst [vmem:[%s6880_s20] sm:$0xff] %v6144_v7 }
 0xc43   :  { %v6148_v9 = vpop.eup %6147  ;;  %4816 = vst [vmem:[%s6880_s20 + $0x18] sm:$0xff] %v6146_v8 }
 0xc44   :  { %4814 = vst [vmem:[%s6880_s20 + $0x8] sm:$0xff] %v6148_v9 }
 0xc45   :  { %4853 = vsyncpa [#allocation7], 1 }
 0xc46   :  { %4854 = vsyncpa [#allocation9], 1 }
 0xc47   :  { %4855 = vsyncpa [#allocation12], 1 }
 0xc48   :  { %4856 = vsyncpa [#allocation15], 1 }
 0xc49   :  { %4857 = vsyncpa [#allocation18], 1 }
 0xc4a   :  { %4858 = vsyncpa [#allocation21], 1 }
 0xc4b   :  { %4859 = vsyncpa [#allocation24], 1 }
 0xc4c   :  { %4860 = vsyncpa [#allocation27], 1 }
 0xc4d   :  { %4861 = vsyncpa [#allocation30], 1 }
 0xc4e   :  { %4862 = vsyncpa [#allocation33], 1 }
 0xc4f   :  { %4863 = vsyncpa [#allocation36], 1 }
 0xc50   :  { %4864 = vsyncmov [#allocation3] }
 0xc53   :  { %s4865_s9 = vpop.sfrf %4864 }
 0xc54   :  { %p5298_p0 = scmp.ne.s32.totalorder %s4865_s9, 0 }
 0xc56   :  { %4869 = shalt.err (%p5298_p0)  }

</bundles_post_ra>
